<compile_context>
chip_gen: v7x
topology: tpu7x:2x2x1
jax: 0.10.0
libtpu: 0.0.40
codegen_flags: <defaults>
</compile_context>

<pallas_src>
import functools

import numpy as np
import jax
import jax.numpy as jnp
from jax.experimental import pallas as pl
from jax.experimental.pallas import tpu as pltpu

_EPS = 1e-5  # PyTorch InstanceNorm2d default eps


# ----------------------------- fused Pallas kernel -------------------------

def _make_fused_kernel(se_dims, sa_dims, H, W, k, Bb):
    """se_dims / sa_dims: tuples of (cin, cout) per layer.  Bb: batch per block."""
    HW = H * W
    p = k // 2
    kk = k * k
    inv_hw = 1.0 / HW
    taps = [(dh, dw) for dh in range(k) for dw in range(k)]

    def cmac(w, x):
        """(Cout, Cin) x (Cin, HW) -> (Cout, HW), exact f32, lane-dense VPU.

        K = Cin <= 4 here, so broadcast MACs beat an MXU matmul (no pad-to-tile
        waste, no bf16 truncation).  Swap for jnp.dot if channels grow."""
        cout, cin = w.shape
        acc = w[:, 0:1] * x[0:1, :]
        for ci in range(1, cin):
            acc = acc + w[:, ci:ci + 1] * x[ci:ci + 1, :]
        return acc

    def inorm(y, g, b):
        """InstanceNorm2d over HW (lane) axis; two-pass, cancellation-safe."""
        mean = jnp.sum(y, axis=-1, keepdims=True) * inv_hw
        d = y - mean
        var = jnp.sum(d * d, axis=-1, keepdims=True) * inv_hw
        return d * jax.lax.rsqrt(var + _EPS) * g + b

    def kernel(x_ref, mask_ref, se_w_ref, se_p_ref, sa_w_ref, sa_p_ref, o_ref):
        # ---- load the tiny shared weights/params once (reused over batch) ----
        se_layers = []
        for li, (ci, co) in enumerate(se_dims):
            w = se_w_ref[li][0:co, 0:ci]                 # (co, ci)
            pv = se_p_ref[li]                            # (co_max, 3)
            se_layers.append((w, pv[0:co, 0:1], pv[0:co, 1:2], pv[0:co, 2:3]))
        sa_layers = []
        for li, (ci, co) in enumerate(sa_dims):
            w_taps = [sa_w_ref[li * kk + t][0:co, 0:ci] for t in range(kk)]
            pv = sa_p_ref[li]
            sa_layers.append((w_taps, pv[0:co, 0:1], pv[0:co, 1:2], pv[0:co, 2:3]))
        masks = mask_ref[...]                            # (k*k, HW) {0,1}

        # ---- unrolled batch loop (Bb is tiny; one block per grid step) -------
        for bi in range(Bb):
            x = x_ref[bi]                                # (Cin, HW) f32

            # SE path: [1x1 conv -> ReLU -> InstanceNorm] * n_se
            h = x
            for (w, b, g, beta) in se_layers:
                y = jnp.maximum(cmac(w, h) + b, 0.0)
                h = inorm(y, g, beta)

            # SA path: [kxk SAME conv -> ReLU -> InstanceNorm] * n_sa
            # Each tap is a static lane roll of the activation; the boundary
            # mask zeroes every out-of-image source (incl. positions the
            # circular roll wraps), reproducing zero padding exactly.
            s = x
            for (w_taps, b, g, beta) in sa_layers:
                acc = None
                for t, (dh, dw) in enumerate(taps):
                    sh = (dh - p) * W + (dw - p)         # flattened source offset
                    if sh == 0:
                        xs = s                           # centre tap, always valid
                    else:
                        xs = pltpu.roll(s, shift=(-sh) % HW, axis=1)
                    contrib = cmac(w_taps[t], xs)        # (Cout, HW)
                    if (dh, dw) != (p, p):
                        contrib = masks[t:t + 1, :] * contrib
                    acc = contrib if acc is None else acc + contrib
                y = jnp.maximum(acc + b, 0.0)
                s = inorm(y, g, beta)

            # GALA gating: saliency (1, HW) * channel attention (out_ch, HW)
            o_ref[bi] = h * s

    return kernel


# ----------------------------- wrapper --------------------------------------

def _tap_masks(H, W, k):
    """(k*k, H*W) {0,1} masks: for tap (dh, dw), whether the SAME-conv source
    pixel (h+dh-p, w+dw-p) lies inside the image, indexed by output n=h*W+w."""
    p = k // 2
    hh, ww = np.meshgrid(np.arange(H), np.arange(W), indexing="ij")
    rows = []
    for dh in range(k):
        for dw in range(k):
            ok = ((hh + dh - p >= 0) & (hh + dh - p < H) &
                  (ww + dw - p >= 0) & (ww + dw - p < W))
            rows.append(ok.reshape(-1))
    return jnp.asarray(np.stack(rows).astype(np.float32))


@functools.lru_cache(maxsize=None)
def _tensorcores_per_chip():
    """2 TensorCores on v7x, 1 on v5e/v6e (and as a safe fallback)."""
    try:
        kind = jax.devices()[0].device_kind.lower()
    except Exception:
        return 1
    return 2 if "v7" in kind else 1


@functools.partial(jax.jit, static_argnames=("k",))
def gala_attention_forward(x_nchw, se_params, sa_params, k):
    """GALA_Attention forward: x (B, C, H, W) NCHW -> (B, out_ch, H, W)."""
    B, C, H, W = x_nchw.shape
    HW = H * W
    kk = k * k
    out_ch = se_params[-1][0].shape[0]

    n_se, n_sa = len(se_params), len(sa_params)
    se_dims = tuple((w.shape[1], w.shape[0]) for (w, _, _, _) in se_params)
    sa_dims = tuple((w.shape[1], w.shape[0]) for (w, _, _, _) in sa_params)
    se_co_max = max(co for _, co in se_dims)
    se_ci_max = max(ci for ci, _ in se_dims)
    sa_co_max = max(co for _, co in sa_dims)
    sa_ci_max = max(ci for ci, _ in sa_dims)

    # ---- pack the many tiny per-layer params into 4 refs ----
    se_w_pack = jnp.zeros((n_se, se_co_max, se_ci_max), jnp.float32)
    se_p_pack = jnp.zeros((n_se, se_co_max, 3), jnp.float32)
    for i, (w, b, g, beta) in enumerate(se_params):
        co, ci = w.shape
        se_w_pack = se_w_pack.at[i, :co, :ci].set(w)
        se_p_pack = se_p_pack.at[i, :co, 0].set(b)
        se_p_pack = se_p_pack.at[i, :co, 1].set(g)
        se_p_pack = se_p_pack.at[i, :co, 2].set(beta)

    sa_w_pack = jnp.zeros((n_sa * kk, sa_co_max, sa_ci_max), jnp.float32)
    sa_p_pack = jnp.zeros((n_sa, sa_co_max, 3), jnp.float32)
    for i, (w, b, g, beta) in enumerate(sa_params):          # w: (Cout, Cin, k, k)
        co, ci = w.shape[0], w.shape[1]
        w_taps = jnp.transpose(w, (2, 3, 0, 1)).reshape(kk, co, ci)
        sa_w_pack = sa_w_pack.at[i * kk:(i + 1) * kk, :co, :ci].set(w_taps)
        sa_p_pack = sa_p_pack.at[i, :co, 0].set(b)
        sa_p_pack = sa_p_pack.at[i, :co, 1].set(g)
        sa_p_pack = sa_p_pack.at[i, :co, 2].set(beta)

    # Kernel layout (C, HW) is exactly flattened NCHW: reshape only, no transpose.
    x_flat = x_nchw.reshape(B, C, HW)
    masks = _tap_masks(H, W, k)

    # Grid: single step on 1-TC chips (v5e/v6e); split the batch across the two
    # TensorCores on v7x.  (For B==1 / odd B on v7x, a second parallel axis over
    # HW tiles would keep the second core busy — not needed at these sizes.)
    ncore = _tensorcores_per_chip()
    G = ncore if (ncore > 1 and B % ncore == 0) else 1
    Bb = B // G

    in_specs = [
        pl.BlockSpec((Bb, C, HW), lambda i: (i, 0, 0)),
        pl.BlockSpec((kk, HW), lambda i: (0, 0)),
        pl.BlockSpec(se_w_pack.shape, lambda i: (0, 0, 0)),
        pl.BlockSpec(se_p_pack.shape, lambda i: (0, 0, 0)),
        pl.BlockSpec(sa_w_pack.shape, lambda i: (0, 0, 0)),
        pl.BlockSpec(sa_p_pack.shape, lambda i: (0, 0, 0)),
    ]
    out_specs = pl.BlockSpec((Bb, out_ch, HW), lambda i: (i, 0, 0))

    kernel = _make_fused_kernel(se_dims, sa_dims, H, W, k, Bb)
    out = pl.pallas_call(
        kernel,
        out_shape=jax.ShapeDtypeStruct((B, out_ch, HW), jnp.float32),
        grid=(G,),
        in_specs=in_specs,
        out_specs=out_specs,
        compiler_params=pltpu.CompilerParams(
            dimension_semantics=("parallel",),
            # Explicit scaling guard: tiny here, but budgets against v7x's
            # smaller VMEM if the same kernel is reused at larger H*W.
            vmem_limit_bytes=32 * 1024 * 1024,
        ),
    )(x_flat, masks, se_w_pack, se_p_pack, sa_w_pack, sa_p_pack)
    return out.reshape(B, out_ch, H, W)


# ----------------------------- params / reference --------------------------

def _orthogonal(key, rows, cols):
    """Deterministic orthogonal init (same scheme as torch.nn.init.orthogonal_)."""
    big, small = max(rows, cols), min(rows, cols)
    a = np.asarray(jax.random.normal(key, (big, small), jnp.float32))
    q, r = np.linalg.qr(a)
    q = q * np.sign(np.diag(r))[None, :]
    if rows < cols:
        q = q.T
    return jnp.asarray(q, jnp.float32)


def build_params(key, in_ch, out_ch, k, layers):
    # SE channel plan (downsample -> upsample), SA plan (halve til 1).
    se_plan, curr = [], in_ch
    for i in range(layers):
        if i == layers - 1:
            nxt = out_ch
        elif i < layers // 2:
            nxt = curr // 2
        else:
            nxt = curr * 2
        se_plan.append((curr, nxt)); curr = nxt
    sa_plan, curr = [], in_ch
    for i in range(layers):
        nxt = 1 if i == layers - 1 else curr // 2
        sa_plan.append((curr, nxt)); curr = nxt

    keys = jax.random.split(key, 2 * layers)
    se_params, sa_params = [], []
    for i, (ci, co) in enumerate(se_plan):
        w = _orthogonal(keys[i], co, ci)                              # (Cout, Cin)
        se_params.append((w,
                          jnp.zeros((co,), jnp.float32),              # conv bias = 0
                          jnp.full((co,), 0.1, jnp.float32),          # IN weight = 0.1
                          jnp.zeros((co,), jnp.float32)))             # IN bias = 0
    for i, (ci, co) in enumerate(sa_plan):
        w = _orthogonal(keys[layers + i], co, ci * k * k).reshape(co, ci, k, k)
        sa_params.append((w,
                          jnp.zeros((co,), jnp.float32),
                          jnp.full((co,), 0.1, jnp.float32),
                          jnp.zeros((co,), jnp.float32)))
    return se_params, sa_params


def _ref_instance_norm(y, g, beta, axes):
    mean = jnp.mean(y, axis=axes, keepdims=True)
    var = jnp.mean((y - mean) ** 2, axis=axes, keepdims=True)
    return (y - mean) * jax.lax.rsqrt(var + _EPS) * g + beta


def gala_attention_reference(x_nchw, se_params, sa_params, k):
    x = jnp.transpose(x_nchw, (0, 2, 3, 1))
    h = x
    for (w, b, g, beta) in se_params:
        h = jnp.einsum("bhwi,oi->bhwo", h, w,
                       precision=jax.lax.Precision.HIGHEST) + b
        h = jnp.maximum(h, 0.0)
        h = _ref_instance_norm(h, g, beta, (1, 2))
    s = x
    for (w, b, g, beta) in sa_params:
        wt = jnp.transpose(w, (2, 3, 1, 0))
        s = jax.lax.conv_general_dilated(
            s, wt, (1, 1), "SAME",
            dimension_numbers=("NHWC", "HWIO", "NHWC"),
            precision=jax.lax.Precision.HIGHEST) + b
        s = jnp.maximum(s, 0.0)
        s = _ref_instance_norm(s, g, beta, (1, 2))
    return jnp.transpose(s * h, (0, 3, 1, 2))


# ----------------------------- main ----------------------------------------

if __name__ == "__main__":
    B, C, H, W = 2, 4, 16, 16
    out_ch, k, layers = 8, 3, 2

    root = jax.random.PRNGKey(0)
    kx, kp = jax.random.split(root)
    x = jax.random.normal(kx, (B, C, H, W), jnp.float32)
    se_params, sa_params = build_params(kp, C, out_ch, k, layers)

    out = gala_attention_forward(x, se_params, sa_params, k)
    out = jax.block_until_ready(out)

    ref = gala_attention_reference(x, se_params, sa_params, k)
    assert out.shape == (B, out_ch, H, W), out.shape
    max_err = float(jnp.max(jnp.abs(out - ref)))
    assert max_err < 1e-3, f"max abs error {max_err}"

    print("KERNEL_OK")
</pallas_src>

<mosaic_0001>
module attributes {stable_mosaic.version = 11 : i64} {
  func.func @kernel(%arg0: i32, %arg1: memref<2x4x256xf32, #tpu.memory_space<vmem>>, %arg2: memref<9x256xf32, #tpu.memory_space<vmem>>, %arg3: memref<2x8x4xf32, #tpu.memory_space<vmem>>, %arg4: memref<2x8x3xf32, #tpu.memory_space<vmem>>, %arg5: memref<18x2x4xf32, #tpu.memory_space<vmem>>, %arg6: memref<2x2x3xf32, #tpu.memory_space<vmem>>, %arg7: memref<2x8x256xf32, #tpu.memory_space<vmem>>) attributes {dimension_semantics = [#tpu.dimension_semantics<parallel>], iteration_bounds = array<i64: 1>, scalar_prefetch = 0 : i64, scratch_operands = 0 : i64, tpu.core_type = #tpu.core_type<tc>, window_params = [{transform_indices = @transform_0, window_bounds = array<i64: 2, 4, 256>}, {pipeline_mode = #tpu.pipeline_mode<synchronous>, transform_indices = @transform_1, window_bounds = array<i64: 9, 256>}, {pipeline_mode = #tpu.pipeline_mode<synchronous>, transform_indices = @transform_2, window_bounds = array<i64: 2, 8, 4>}, {pipeline_mode = #tpu.pipeline_mode<synchronous>, transform_indices = @transform_3, window_bounds = array<i64: 2, 8, 3>}, {pipeline_mode = #tpu.pipeline_mode<synchronous>, transform_indices = @transform_4, window_bounds = array<i64: 18, 2, 4>}, {pipeline_mode = #tpu.pipeline_mode<synchronous>, transform_indices = @transform_5, window_bounds = array<i64: 2, 2, 3>}, {transform_indices = @transform_6, window_bounds = array<i64: 2, 8, 256>}]} {
    %c0 = arith.constant 0 : index
    %c0_0 = arith.constant 0 : index
    %c0_1 = arith.constant 0 : index
    %0 = vector.load %arg3[%c0, %c0_0, %c0_1] : memref<2x8x4xf32, #tpu.memory_space<vmem>>, vector<1x8x4xf32>
    %1 = vector.shape_cast %0 : vector<1x8x4xf32> to vector<8x4xf32>
    %2 = vector.extract_strided_slice %1 {offsets = [0, 0], sizes = [2, 4], strides = [1, 1]} : vector<8x4xf32> to vector<2x4xf32>
    %c0_2 = arith.constant 0 : index
    %c0_3 = arith.constant 0 : index
    %c0_4 = arith.constant 0 : index
    %3 = vector.load %arg4[%c0_2, %c0_3, %c0_4] : memref<2x8x3xf32, #tpu.memory_space<vmem>>, vector<1x8x3xf32>
    %4 = vector.shape_cast %3 : vector<1x8x3xf32> to vector<8x3xf32>
    %5 = vector.extract_strided_slice %4 {offsets = [0, 0], sizes = [2, 1], strides = [1, 1]} : vector<8x3xf32> to vector<2x1xf32>
    %6 = vector.extract_strided_slice %4 {offsets = [0, 1], sizes = [2, 1], strides = [1, 1]} : vector<8x3xf32> to vector<2x1xf32>
    %7 = vector.extract_strided_slice %4 {offsets = [0, 2], sizes = [2, 1], strides = [1, 1]} : vector<8x3xf32> to vector<2x1xf32>
    %c1 = arith.constant 1 : index
    %c0_5 = arith.constant 0 : index
    %c0_6 = arith.constant 0 : index
    %8 = vector.load %arg3[%c1, %c0_5, %c0_6] : memref<2x8x4xf32, #tpu.memory_space<vmem>>, vector<1x8x4xf32>
    %9 = vector.shape_cast %8 : vector<1x8x4xf32> to vector<8x4xf32>
    %10 = vector.extract_strided_slice %9 {offsets = [0, 0], sizes = [8, 2], strides = [1, 1]} : vector<8x4xf32> to vector<8x2xf32>
    %c1_7 = arith.constant 1 : index
    %c0_8 = arith.constant 0 : index
    %c0_9 = arith.constant 0 : index
    %11 = vector.load %arg4[%c1_7, %c0_8, %c0_9] : memref<2x8x3xf32, #tpu.memory_space<vmem>>, vector<1x8x3xf32>
    %12 = vector.shape_cast %11 : vector<1x8x3xf32> to vector<8x3xf32>
    %13 = vector.extract_strided_slice %12 {offsets = [0, 0], sizes = [8, 1], strides = [1, 1]} : vector<8x3xf32> to vector<8x1xf32>
    %14 = vector.extract_strided_slice %12 {offsets = [0, 1], sizes = [8, 1], strides = [1, 1]} : vector<8x3xf32> to vector<8x1xf32>
    %15 = vector.extract_strided_slice %12 {offsets = [0, 2], sizes = [8, 1], strides = [1, 1]} : vector<8x3xf32> to vector<8x1xf32>
    %c0_10 = arith.constant 0 : index
    %c0_11 = arith.constant 0 : index
    %c0_12 = arith.constant 0 : index
    %16 = vector.load %arg5[%c0_10, %c0_11, %c0_12] : memref<18x2x4xf32, #tpu.memory_space<vmem>>, vector<1x2x4xf32>
    %17 = vector.shape_cast %16 : vector<1x2x4xf32> to vector<2x4xf32>
    %c1_13 = arith.constant 1 : index
    %c0_14 = arith.constant 0 : index
    %c0_15 = arith.constant 0 : index
    %18 = vector.load %arg5[%c1_13, %c0_14, %c0_15] : memref<18x2x4xf32, #tpu.memory_space<vmem>>, vector<1x2x4xf32>
    %19 = vector.shape_cast %18 : vector<1x2x4xf32> to vector<2x4xf32>
    %c2 = arith.constant 2 : index
    %c0_16 = arith.constant 0 : index
    %c0_17 = arith.constant 0 : index
    %20 = vector.load %arg5[%c2, %c0_16, %c0_17] : memref<18x2x4xf32, #tpu.memory_space<vmem>>, vector<1x2x4xf32>
    %21 = vector.shape_cast %20 : vector<1x2x4xf32> to vector<2x4xf32>
    %c3 = arith.constant 3 : index
    %c0_18 = arith.constant 0 : index
    %c0_19 = arith.constant 0 : index
    %22 = vector.load %arg5[%c3, %c0_18, %c0_19] : memref<18x2x4xf32, #tpu.memory_space<vmem>>, vector<1x2x4xf32>
    %23 = vector.shape_cast %22 : vector<1x2x4xf32> to vector<2x4xf32>
    %c4 = arith.constant 4 : index
    %c0_20 = arith.constant 0 : index
    %c0_21 = arith.constant 0 : index
    %24 = vector.load %arg5[%c4, %c0_20, %c0_21] : memref<18x2x4xf32, #tpu.memory_space<vmem>>, vector<1x2x4xf32>
    %25 = vector.shape_cast %24 : vector<1x2x4xf32> to vector<2x4xf32>
    %c5 = arith.constant 5 : index
    %c0_22 = arith.constant 0 : index
    %c0_23 = arith.constant 0 : index
    %26 = vector.load %arg5[%c5, %c0_22, %c0_23] : memref<18x2x4xf32, #tpu.memory_space<vmem>>, vector<1x2x4xf32>
    %27 = vector.shape_cast %26 : vector<1x2x4xf32> to vector<2x4xf32>
    %c6 = arith.constant 6 : index
    %c0_24 = arith.constant 0 : index
    %c0_25 = arith.constant 0 : index
    %28 = vector.load %arg5[%c6, %c0_24, %c0_25] : memref<18x2x4xf32, #tpu.memory_space<vmem>>, vector<1x2x4xf32>
    %29 = vector.shape_cast %28 : vector<1x2x4xf32> to vector<2x4xf32>
    %c7 = arith.constant 7 : index
    %c0_26 = arith.constant 0 : index
    %c0_27 = arith.constant 0 : index
    %30 = vector.load %arg5[%c7, %c0_26, %c0_27] : memref<18x2x4xf32, #tpu.memory_space<vmem>>, vector<1x2x4xf32>
    %31 = vector.shape_cast %30 : vector<1x2x4xf32> to vector<2x4xf32>
    %c8 = arith.constant 8 : index
    %c0_28 = arith.constant 0 : index
    %c0_29 = arith.constant 0 : index
    %32 = vector.load %arg5[%c8, %c0_28, %c0_29] : memref<18x2x4xf32, #tpu.memory_space<vmem>>, vector<1x2x4xf32>
    %33 = vector.shape_cast %32 : vector<1x2x4xf32> to vector<2x4xf32>
    %c0_30 = arith.constant 0 : index
    %c0_31 = arith.constant 0 : index
    %c0_32 = arith.constant 0 : index
    %34 = vector.load %arg6[%c0_30, %c0_31, %c0_32] : memref<2x2x3xf32, #tpu.memory_space<vmem>>, vector<1x2x3xf32>
    %35 = vector.shape_cast %34 : vector<1x2x3xf32> to vector<2x3xf32>
    %36 = vector.extract_strided_slice %35 {offsets = [0, 0], sizes = [2, 1], strides = [1, 1]} : vector<2x3xf32> to vector<2x1xf32>
    %37 = vector.extract_strided_slice %35 {offsets = [0, 1], sizes = [2, 1], strides = [1, 1]} : vector<2x3xf32> to vector<2x1xf32>
    %38 = vector.extract_strided_slice %35 {offsets = [0, 2], sizes = [2, 1], strides = [1, 1]} : vector<2x3xf32> to vector<2x1xf32>
    %c9 = arith.constant 9 : index
    %c0_33 = arith.constant 0 : index
    %c0_34 = arith.constant 0 : index
    %39 = vector.load %arg5[%c9, %c0_33, %c0_34] : memref<18x2x4xf32, #tpu.memory_space<vmem>>, vector<1x2x4xf32>
    %40 = vector.shape_cast %39 : vector<1x2x4xf32> to vector<2x4xf32>
    %41 = vector.extract_strided_slice %40 {offsets = [0, 0], sizes = [1, 2], strides = [1, 1]} : vector<2x4xf32> to vector<1x2xf32>
    %c10 = arith.constant 10 : index
    %c0_35 = arith.constant 0 : index
    %c0_36 = arith.constant 0 : index
    %42 = vector.load %arg5[%c10, %c0_35, %c0_36] : memref<18x2x4xf32, #tpu.memory_space<vmem>>, vector<1x2x4xf32>
    %43 = vector.shape_cast %42 : vector<1x2x4xf32> to vector<2x4xf32>
    %44 = vector.extract_strided_slice %43 {offsets = [0, 0], sizes = [1, 2], strides = [1, 1]} : vector<2x4xf32> to vector<1x2xf32>
    %c11 = arith.constant 11 : index
    %c0_37 = arith.constant 0 : index
    %c0_38 = arith.constant 0 : index
    %45 = vector.load %arg5[%c11, %c0_37, %c0_38] : memref<18x2x4xf32, #tpu.memory_space<vmem>>, vector<1x2x4xf32>
    %46 = vector.shape_cast %45 : vector<1x2x4xf32> to vector<2x4xf32>
    %47 = vector.extract_strided_slice %46 {offsets = [0, 0], sizes = [1, 2], strides = [1, 1]} : vector<2x4xf32> to vector<1x2xf32>
    %c12 = arith.constant 12 : index
    %c0_39 = arith.constant 0 : index
    %c0_40 = arith.constant 0 : index
    %48 = vector.load %arg5[%c12, %c0_39, %c0_40] : memref<18x2x4xf32, #tpu.memory_space<vmem>>, vector<1x2x4xf32>
    %49 = vector.shape_cast %48 : vector<1x2x4xf32> to vector<2x4xf32>
    %50 = vector.extract_strided_slice %49 {offsets = [0, 0], sizes = [1, 2], strides = [1, 1]} : vector<2x4xf32> to vector<1x2xf32>
    %c13 = arith.constant 13 : index
    %c0_41 = arith.constant 0 : index
    %c0_42 = arith.constant 0 : index
    %51 = vector.load %arg5[%c13, %c0_41, %c0_42] : memref<18x2x4xf32, #tpu.memory_space<vmem>>, vector<1x2x4xf32>
    %52 = vector.shape_cast %51 : vector<1x2x4xf32> to vector<2x4xf32>
    %53 = vector.extract_strided_slice %52 {offsets = [0, 0], sizes = [1, 2], strides = [1, 1]} : vector<2x4xf32> to vector<1x2xf32>
    %c14 = arith.constant 14 : index
    %c0_43 = arith.constant 0 : index
    %c0_44 = arith.constant 0 : index
    %54 = vector.load %arg5[%c14, %c0_43, %c0_44] : memref<18x2x4xf32, #tpu.memory_space<vmem>>, vector<1x2x4xf32>
    %55 = vector.shape_cast %54 : vector<1x2x4xf32> to vector<2x4xf32>
    %56 = vector.extract_strided_slice %55 {offsets = [0, 0], sizes = [1, 2], strides = [1, 1]} : vector<2x4xf32> to vector<1x2xf32>
    %c15 = arith.constant 15 : index
    %c0_45 = arith.constant 0 : index
    %c0_46 = arith.constant 0 : index
    %57 = vector.load %arg5[%c15, %c0_45, %c0_46] : memref<18x2x4xf32, #tpu.memory_space<vmem>>, vector<1x2x4xf32>
    %58 = vector.shape_cast %57 : vector<1x2x4xf32> to vector<2x4xf32>
    %59 = vector.extract_strided_slice %58 {offsets = [0, 0], sizes = [1, 2], strides = [1, 1]} : vector<2x4xf32> to vector<1x2xf32>
    %c16 = arith.constant 16 : index
    %c0_47 = arith.constant 0 : index
    %c0_48 = arith.constant 0 : index
    %60 = vector.load %arg5[%c16, %c0_47, %c0_48] : memref<18x2x4xf32, #tpu.memory_space<vmem>>, vector<1x2x4xf32>
    %61 = vector.shape_cast %60 : vector<1x2x4xf32> to vector<2x4xf32>
    %62 = vector.extract_strided_slice %61 {offsets = [0, 0], sizes = [1, 2], strides = [1, 1]} : vector<2x4xf32> to vector<1x2xf32>
    %c17 = arith.constant 17 : index
    %c0_49 = arith.constant 0 : index
    %c0_50 = arith.constant 0 : index
    %63 = vector.load %arg5[%c17, %c0_49, %c0_50] : memref<18x2x4xf32, #tpu.memory_space<vmem>>, vector<1x2x4xf32>
    %64 = vector.shape_cast %63 : vector<1x2x4xf32> to vector<2x4xf32>
    %65 = vector.extract_strided_slice %64 {offsets = [0, 0], sizes = [1, 2], strides = [1, 1]} : vector<2x4xf32> to vector<1x2xf32>
    %c1_51 = arith.constant 1 : index
    %c0_52 = arith.constant 0 : index
    %c0_53 = arith.constant 0 : index
    %66 = vector.load %arg6[%c1_51, %c0_52, %c0_53] : memref<2x2x3xf32, #tpu.memory_space<vmem>>, vector<1x2x3xf32>
    %67 = vector.shape_cast %66 : vector<1x2x3xf32> to vector<2x3xf32>
    %68 = vector.extract_strided_slice %67 {offsets = [0, 0], sizes = [1, 1], strides = [1, 1]} : vector<2x3xf32> to vector<1x1xf32>
    %69 = vector.extract_strided_slice %67 {offsets = [0, 1], sizes = [1, 1], strides = [1, 1]} : vector<2x3xf32> to vector<1x1xf32>
    %70 = vector.extract_strided_slice %67 {offsets = [0, 2], sizes = [1, 1], strides = [1, 1]} : vector<2x3xf32> to vector<1x1xf32>
    %c0_54 = arith.constant 0 : index
    %c0_55 = arith.constant 0 : index
    %71 = vector.load %arg2[%c0_54, %c0_55] : memref<9x256xf32, #tpu.memory_space<vmem>>, vector<9x256xf32>
    %c0_56 = arith.constant 0 : index
    %c0_57 = arith.constant 0 : index
    %c0_58 = arith.constant 0 : index
    %72 = vector.load %arg1[%c0_56, %c0_57, %c0_58] : memref<2x4x256xf32, #tpu.memory_space<vmem>>, vector<1x4x256xf32>
    %73 = vector.shape_cast %72 : vector<1x4x256xf32> to vector<4x256xf32>
    %74 = vector.extract_strided_slice %2 {offsets = [0, 0], sizes = [2, 1], strides = [1, 1]} : vector<2x4xf32> to vector<2x1xf32>
    %75 = vector.extract_strided_slice %73 {offsets = [0, 0], sizes = [1, 256], strides = [1, 1]} : vector<4x256xf32> to vector<1x256xf32>
    %76 = vector.broadcast %74 : vector<2x1xf32> to vector<2x256xf32>
    %77 = vector.broadcast %75 : vector<1x256xf32> to vector<2x256xf32>
    %78 = arith.mulf %76, %77 : vector<2x256xf32>
    %79 = vector.extract_strided_slice %2 {offsets = [0, 1], sizes = [2, 1], strides = [1, 1]} : vector<2x4xf32> to vector<2x1xf32>
    %80 = vector.extract_strided_slice %73 {offsets = [1, 0], sizes = [1, 256], strides = [1, 1]} : vector<4x256xf32> to vector<1x256xf32>
    %81 = vector.broadcast %79 : vector<2x1xf32> to vector<2x256xf32>
    %82 = vector.broadcast %80 : vector<1x256xf32> to vector<2x256xf32>
    %83 = arith.mulf %81, %82 : vector<2x256xf32>
    %84 = arith.addf %78, %83 : vector<2x256xf32>
    %85 = vector.extract_strided_slice %2 {offsets = [0, 2], sizes = [2, 1], strides = [1, 1]} : vector<2x4xf32> to vector<2x1xf32>
    %86 = vector.extract_strided_slice %73 {offsets = [2, 0], sizes = [1, 256], strides = [1, 1]} : vector<4x256xf32> to vector<1x256xf32>
    %87 = vector.broadcast %85 : vector<2x1xf32> to vector<2x256xf32>
    %88 = vector.broadcast %86 : vector<1x256xf32> to vector<2x256xf32>
    %89 = arith.mulf %87, %88 : vector<2x256xf32>
    %90 = arith.addf %84, %89 : vector<2x256xf32>
    %91 = vector.extract_strided_slice %2 {offsets = [0, 3], sizes = [2, 1], strides = [1, 1]} : vector<2x4xf32> to vector<2x1xf32>
    %92 = vector.extract_strided_slice %73 {offsets = [3, 0], sizes = [1, 256], strides = [1, 1]} : vector<4x256xf32> to vector<1x256xf32>
    %93 = vector.broadcast %91 : vector<2x1xf32> to vector<2x256xf32>
    %94 = vector.broadcast %92 : vector<1x256xf32> to vector<2x256xf32>
    %95 = arith.mulf %93, %94 : vector<2x256xf32>
    %96 = arith.addf %90, %95 : vector<2x256xf32>
    %97 = vector.broadcast %5 : vector<2x1xf32> to vector<2x256xf32>
    %98 = arith.addf %96, %97 : vector<2x256xf32>
    %cst = arith.constant 0.000000e+00 : f32
    %99 = vector.broadcast %cst : f32 to vector<2x256xf32>
    %100 = arith.maximumf %98, %99 : vector<2x256xf32>
    %cst_59 = arith.constant dense<0.000000e+00> : vector<2xf32>
    %101 = vector.multi_reduction <add>, %100, %cst_59 [1] : vector<2x256xf32> to vector<2xf32>
    %102 = vector.shape_cast %101 : vector<2xf32> to vector<2x1xf32>
    %cst_60 = arith.constant 3.906250e-03 : f32
    %103 = vector.broadcast %cst_60 : f32 to vector<2x1xf32>
    %104 = arith.mulf %102, %103 : vector<2x1xf32>
    %105 = vector.broadcast %104 : vector<2x1xf32> to vector<2x256xf32>
    %106 = arith.subf %100, %105 : vector<2x256xf32>
    %107 = arith.mulf %106, %106 : vector<2x256xf32>
    %cst_61 = arith.constant dense<0.000000e+00> : vector<2xf32>
    %108 = vector.multi_reduction <add>, %107, %cst_61 [1] : vector<2x256xf32> to vector<2xf32>
    %109 = vector.shape_cast %108 : vector<2xf32> to vector<2x1xf32>
    %cst_62 = arith.constant 3.906250e-03 : f32
    %110 = vector.broadcast %cst_62 : f32 to vector<2x1xf32>
    %111 = arith.mulf %109, %110 : vector<2x1xf32>
    %cst_63 = arith.constant 9.99999974E-6 : f32
    %112 = vector.broadcast %cst_63 : f32 to vector<2x1xf32>
    %113 = arith.addf %111, %112 : vector<2x1xf32>
    %114 = math.rsqrt %113 : vector<2x1xf32>
    %115 = vector.broadcast %114 : vector<2x1xf32> to vector<2x256xf32>
    %116 = arith.mulf %106, %115 : vector<2x256xf32>
    %117 = vector.broadcast %6 : vector<2x1xf32> to vector<2x256xf32>
    %118 = arith.mulf %116, %117 : vector<2x256xf32>
    %119 = vector.broadcast %7 : vector<2x1xf32> to vector<2x256xf32>
    %120 = arith.addf %118, %119 : vector<2x256xf32>
    %121 = vector.extract_strided_slice %10 {offsets = [0, 0], sizes = [8, 1], strides = [1, 1]} : vector<8x2xf32> to vector<8x1xf32>
    %122 = vector.extract_strided_slice %120 {offsets = [0, 0], sizes = [1, 256], strides = [1, 1]} : vector<2x256xf32> to vector<1x256xf32>
    %123 = vector.broadcast %121 : vector<8x1xf32> to vector<8x256xf32>
    %124 = vector.broadcast %122 : vector<1x256xf32> to vector<8x256xf32>
    %125 = arith.mulf %123, %124 : vector<8x256xf32>
    %126 = vector.extract_strided_slice %10 {offsets = [0, 1], sizes = [8, 1], strides = [1, 1]} : vector<8x2xf32> to vector<8x1xf32>
    %127 = vector.extract_strided_slice %120 {offsets = [1, 0], sizes = [1, 256], strides = [1, 1]} : vector<2x256xf32> to vector<1x256xf32>
    %128 = vector.broadcast %126 : vector<8x1xf32> to vector<8x256xf32>
    %129 = vector.broadcast %127 : vector<1x256xf32> to vector<8x256xf32>
    %130 = arith.mulf %128, %129 : vector<8x256xf32>
    %131 = arith.addf %125, %130 : vector<8x256xf32>
    %132 = vector.broadcast %13 : vector<8x1xf32> to vector<8x256xf32>
    %133 = arith.addf %131, %132 : vector<8x256xf32>
    %cst_64 = arith.constant 0.000000e+00 : f32
    %134 = vector.broadcast %cst_64 : f32 to vector<8x256xf32>
    %135 = arith.maximumf %133, %134 : vector<8x256xf32>
    %cst_65 = arith.constant dense<0.000000e+00> : vector<8xf32>
    %136 = vector.multi_reduction <add>, %135, %cst_65 [1] : vector<8x256xf32> to vector<8xf32>
    %137 = vector.shape_cast %136 : vector<8xf32> to vector<8x1xf32>
    %cst_66 = arith.constant 3.906250e-03 : f32
    %138 = vector.broadcast %cst_66 : f32 to vector<8x1xf32>
    %139 = arith.mulf %137, %138 : vector<8x1xf32>
    %140 = vector.broadcast %139 : vector<8x1xf32> to vector<8x256xf32>
    %141 = arith.subf %135, %140 : vector<8x256xf32>
    %142 = arith.mulf %141, %141 : vector<8x256xf32>
    %cst_67 = arith.constant dense<0.000000e+00> : vector<8xf32>
    %143 = vector.multi_reduction <add>, %142, %cst_67 [1] : vector<8x256xf32> to vector<8xf32>
    %144 = vector.shape_cast %143 : vector<8xf32> to vector<8x1xf32>
    %cst_68 = arith.constant 3.906250e-03 : f32
    %145 = vector.broadcast %cst_68 : f32 to vector<8x1xf32>
    %146 = arith.mulf %144, %145 : vector<8x1xf32>
    %cst_69 = arith.constant 9.99999974E-6 : f32
    %147 = vector.broadcast %cst_69 : f32 to vector<8x1xf32>
    %148 = arith.addf %146, %147 : vector<8x1xf32>
    %149 = math.rsqrt %148 : vector<8x1xf32>
    %150 = vector.broadcast %149 : vector<8x1xf32> to vector<8x256xf32>
    %151 = arith.mulf %141, %150 : vector<8x256xf32>
    %152 = vector.broadcast %14 : vector<8x1xf32> to vector<8x256xf32>
    %153 = arith.mulf %151, %152 : vector<8x256xf32>
    %154 = vector.broadcast %15 : vector<8x1xf32> to vector<8x256xf32>
    %155 = arith.addf %153, %154 : vector<8x256xf32>
    %c17_i32 = arith.constant 17 : i32
    %156 = tpu.dynamic_rotate %73 by %c17_i32 dim 1 : vector<4x256xf32>, i32 -> vector<4x256xf32>
    %157 = vector.extract_strided_slice %17 {offsets = [0, 0], sizes = [2, 1], strides = [1, 1]} : vector<2x4xf32> to vector<2x1xf32>
    %158 = vector.extract_strided_slice %156 {offsets = [0, 0], sizes = [1, 256], strides = [1, 1]} : vector<4x256xf32> to vector<1x256xf32>
    %159 = vector.broadcast %157 : vector<2x1xf32> to vector<2x256xf32>
    %160 = vector.broadcast %158 : vector<1x256xf32> to vector<2x256xf32>
    %161 = arith.mulf %159, %160 : vector<2x256xf32>
    %162 = vector.extract_strided_slice %17 {offsets = [0, 1], sizes = [2, 1], strides = [1, 1]} : vector<2x4xf32> to vector<2x1xf32>
    %163 = vector.extract_strided_slice %156 {offsets = [1, 0], sizes = [1, 256], strides = [1, 1]} : vector<4x256xf32> to vector<1x256xf32>
    %164 = vector.broadcast %162 : vector<2x1xf32> to vector<2x256xf32>
    %165 = vector.broadcast %163 : vector<1x256xf32> to vector<2x256xf32>
    %166 = arith.mulf %164, %165 : vector<2x256xf32>
    %167 = arith.addf %161, %166 : vector<2x256xf32>
    %168 = vector.extract_strided_slice %17 {offsets = [0, 2], sizes = [2, 1], strides = [1, 1]} : vector<2x4xf32> to vector<2x1xf32>
    %169 = vector.extract_strided_slice %156 {offsets = [2, 0], sizes = [1, 256], strides = [1, 1]} : vector<4x256xf32> to vector<1x256xf32>
    %170 = vector.broadcast %168 : vector<2x1xf32> to vector<2x256xf32>
    %171 = vector.broadcast %169 : vector<1x256xf32> to vector<2x256xf32>
    %172 = arith.mulf %170, %171 : vector<2x256xf32>
    %173 = arith.addf %167, %172 : vector<2x256xf32>
    %174 = vector.extract_strided_slice %17 {offsets = [0, 3], sizes = [2, 1], strides = [1, 1]} : vector<2x4xf32> to vector<2x1xf32>
    %175 = vector.extract_strided_slice %156 {offsets = [3, 0], sizes = [1, 256], strides = [1, 1]} : vector<4x256xf32> to vector<1x256xf32>
    %176 = vector.broadcast %174 : vector<2x1xf32> to vector<2x256xf32>
    %177 = vector.broadcast %175 : vector<1x256xf32> to vector<2x256xf32>
    %178 = arith.mulf %176, %177 : vector<2x256xf32>
    %179 = arith.addf %173, %178 : vector<2x256xf32>
    %180 = vector.extract_strided_slice %71 {offsets = [0, 0], sizes = [1, 256], strides = [1, 1]} : vector<9x256xf32> to vector<1x256xf32>
    %181 = vector.broadcast %180 : vector<1x256xf32> to vector<2x256xf32>
    %182 = arith.mulf %181, %179 : vector<2x256xf32>
    %c16_i32 = arith.constant 16 : i32
    %183 = tpu.dynamic_rotate %73 by %c16_i32 dim 1 : vector<4x256xf32>, i32 -> vector<4x256xf32>
    %184 = vector.extract_strided_slice %19 {offsets = [0, 0], sizes = [2, 1], strides = [1, 1]} : vector<2x4xf32> to vector<2x1xf32>
    %185 = vector.extract_strided_slice %183 {offsets = [0, 0], sizes = [1, 256], strides = [1, 1]} : vector<4x256xf32> to vector<1x256xf32>
    %186 = vector.broadcast %184 : vector<2x1xf32> to vector<2x256xf32>
    %187 = vector.broadcast %185 : vector<1x256xf32> to vector<2x256xf32>
    %188 = arith.mulf %186, %187 : vector<2x256xf32>
    %189 = vector.extract_strided_slice %19 {offsets = [0, 1], sizes = [2, 1], strides = [1, 1]} : vector<2x4xf32> to vector<2x1xf32>
    %190 = vector.extract_strided_slice %183 {offsets = [1, 0], sizes = [1, 256], strides = [1, 1]} : vector<4x256xf32> to vector<1x256xf32>
    %191 = vector.broadcast %189 : vector<2x1xf32> to vector<2x256xf32>
    %192 = vector.broadcast %190 : vector<1x256xf32> to vector<2x256xf32>
    %193 = arith.mulf %191, %192 : vector<2x256xf32>
    %194 = arith.addf %188, %193 : vector<2x256xf32>
    %195 = vector.extract_strided_slice %19 {offsets = [0, 2], sizes = [2, 1], strides = [1, 1]} : vector<2x4xf32> to vector<2x1xf32>
    %196 = vector.extract_strided_slice %183 {offsets = [2, 0], sizes = [1, 256], strides = [1, 1]} : vector<4x256xf32> to vector<1x256xf32>
    %197 = vector.broadcast %195 : vector<2x1xf32> to vector<2x256xf32>
    %198 = vector.broadcast %196 : vector<1x256xf32> to vector<2x256xf32>
    %199 = arith.mulf %197, %198 : vector<2x256xf32>
    %200 = arith.addf %194, %199 : vector<2x256xf32>
    %201 = vector.extract_strided_slice %19 {offsets = [0, 3], sizes = [2, 1], strides = [1, 1]} : vector<2x4xf32> to vector<2x1xf32>
    %202 = vector.extract_strided_slice %183 {offsets = [3, 0], sizes = [1, 256], strides = [1, 1]} : vector<4x256xf32> to vector<1x256xf32>
    %203 = vector.broadcast %201 : vector<2x1xf32> to vector<2x256xf32>
    %204 = vector.broadcast %202 : vector<1x256xf32> to vector<2x256xf32>
    %205 = arith.mulf %203, %204 : vector<2x256xf32>
    %206 = arith.addf %200, %205 : vector<2x256xf32>
    %207 = vector.extract_strided_slice %71 {offsets = [1, 0], sizes = [1, 256], strides = [1, 1]} : vector<9x256xf32> to vector<1x256xf32>
    %208 = vector.broadcast %207 : vector<1x256xf32> to vector<2x256xf32>
    %209 = arith.mulf %208, %206 : vector<2x256xf32>
    %210 = arith.addf %182, %209 : vector<2x256xf32>
    %c15_i32 = arith.constant 15 : i32
    %211 = tpu.dynamic_rotate %73 by %c15_i32 dim 1 : vector<4x256xf32>, i32 -> vector<4x256xf32>
    %212 = vector.extract_strided_slice %21 {offsets = [0, 0], sizes = [2, 1], strides = [1, 1]} : vector<2x4xf32> to vector<2x1xf32>
    %213 = vector.extract_strided_slice %211 {offsets = [0, 0], sizes = [1, 256], strides = [1, 1]} : vector<4x256xf32> to vector<1x256xf32>
    %214 = vector.broadcast %212 : vector<2x1xf32> to vector<2x256xf32>
    %215 = vector.broadcast %213 : vector<1x256xf32> to vector<2x256xf32>
    %216 = arith.mulf %214, %215 : vector<2x256xf32>
    %217 = vector.extract_strided_slice %21 {offsets = [0, 1], sizes = [2, 1], strides = [1, 1]} : vector<2x4xf32> to vector<2x1xf32>
    %218 = vector.extract_strided_slice %211 {offsets = [1, 0], sizes = [1, 256], strides = [1, 1]} : vector<4x256xf32> to vector<1x256xf32>
    %219 = vector.broadcast %217 : vector<2x1xf32> to vector<2x256xf32>
    %220 = vector.broadcast %218 : vector<1x256xf32> to vector<2x256xf32>
    %221 = arith.mulf %219, %220 : vector<2x256xf32>
    %222 = arith.addf %216, %221 : vector<2x256xf32>
    %223 = vector.extract_strided_slice %21 {offsets = [0, 2], sizes = [2, 1], strides = [1, 1]} : vector<2x4xf32> to vector<2x1xf32>
    %224 = vector.extract_strided_slice %211 {offsets = [2, 0], sizes = [1, 256], strides = [1, 1]} : vector<4x256xf32> to vector<1x256xf32>
    %225 = vector.broadcast %223 : vector<2x1xf32> to vector<2x256xf32>
    %226 = vector.broadcast %224 : vector<1x256xf32> to vector<2x256xf32>
    %227 = arith.mulf %225, %226 : vector<2x256xf32>
    %228 = arith.addf %222, %227 : vector<2x256xf32>
    %229 = vector.extract_strided_slice %21 {offsets = [0, 3], sizes = [2, 1], strides = [1, 1]} : vector<2x4xf32> to vector<2x1xf32>
    %230 = vector.extract_strided_slice %211 {offsets = [3, 0], sizes = [1, 256], strides = [1, 1]} : vector<4x256xf32> to vector<1x256xf32>
    %231 = vector.broadcast %229 : vector<2x1xf32> to vector<2x256xf32>
    %232 = vector.broadcast %230 : vector<1x256xf32> to vector<2x256xf32>
    %233 = arith.mulf %231, %232 : vector<2x256xf32>
    %234 = arith.addf %228, %233 : vector<2x256xf32>
    %235 = vector.extract_strided_slice %71 {offsets = [2, 0], sizes = [1, 256], strides = [1, 1]} : vector<9x256xf32> to vector<1x256xf32>
    %236 = vector.broadcast %235 : vector<1x256xf32> to vector<2x256xf32>
    %237 = arith.mulf %236, %234 : vector<2x256xf32>
    %238 = arith.addf %210, %237 : vector<2x256xf32>
    %c1_i32 = arith.constant 1 : i32
    %239 = tpu.dynamic_rotate %73 by %c1_i32 dim 1 : vector<4x256xf32>, i32 -> vector<4x256xf32>
    %240 = vector.extract_strided_slice %23 {offsets = [0, 0], sizes = [2, 1], strides = [1, 1]} : vector<2x4xf32> to vector<2x1xf32>
    %241 = vector.extract_strided_slice %239 {offsets = [0, 0], sizes = [1, 256], strides = [1, 1]} : vector<4x256xf32> to vector<1x256xf32>
    %242 = vector.broadcast %240 : vector<2x1xf32> to vector<2x256xf32>
    %243 = vector.broadcast %241 : vector<1x256xf32> to vector<2x256xf32>
    %244 = arith.mulf %242, %243 : vector<2x256xf32>
    %245 = vector.extract_strided_slice %23 {offsets = [0, 1], sizes = [2, 1], strides = [1, 1]} : vector<2x4xf32> to vector<2x1xf32>
    %246 = vector.extract_strided_slice %239 {offsets = [1, 0], sizes = [1, 256], strides = [1, 1]} : vector<4x256xf32> to vector<1x256xf32>
    %247 = vector.broadcast %245 : vector<2x1xf32> to vector<2x256xf32>
    %248 = vector.broadcast %246 : vector<1x256xf32> to vector<2x256xf32>
    %249 = arith.mulf %247, %248 : vector<2x256xf32>
    %250 = arith.addf %244, %249 : vector<2x256xf32>
    %251 = vector.extract_strided_slice %23 {offsets = [0, 2], sizes = [2, 1], strides = [1, 1]} : vector<2x4xf32> to vector<2x1xf32>
    %252 = vector.extract_strided_slice %239 {offsets = [2, 0], sizes = [1, 256], strides = [1, 1]} : vector<4x256xf32> to vector<1x256xf32>
    %253 = vector.broadcast %251 : vector<2x1xf32> to vector<2x256xf32>
    %254 = vector.broadcast %252 : vector<1x256xf32> to vector<2x256xf32>
    %255 = arith.mulf %253, %254 : vector<2x256xf32>
    %256 = arith.addf %250, %255 : vector<2x256xf32>
    %257 = vector.extract_strided_slice %23 {offsets = [0, 3], sizes = [2, 1], strides = [1, 1]} : vector<2x4xf32> to vector<2x1xf32>
    %258 = vector.extract_strided_slice %239 {offsets = [3, 0], sizes = [1, 256], strides = [1, 1]} : vector<4x256xf32> to vector<1x256xf32>
    %259 = vector.broadcast %257 : vector<2x1xf32> to vector<2x256xf32>
    %260 = vector.broadcast %258 : vector<1x256xf32> to vector<2x256xf32>
    %261 = arith.mulf %259, %260 : vector<2x256xf32>
    %262 = arith.addf %256, %261 : vector<2x256xf32>
    %263 = vector.extract_strided_slice %71 {offsets = [3, 0], sizes = [1, 256], strides = [1, 1]} : vector<9x256xf32> to vector<1x256xf32>
    %264 = vector.broadcast %263 : vector<1x256xf32> to vector<2x256xf32>
    %265 = arith.mulf %264, %262 : vector<2x256xf32>
    %266 = arith.addf %238, %265 : vector<2x256xf32>
    %267 = vector.extract_strided_slice %25 {offsets = [0, 0], sizes = [2, 1], strides = [1, 1]} : vector<2x4xf32> to vector<2x1xf32>
    %268 = vector.extract_strided_slice %73 {offsets = [0, 0], sizes = [1, 256], strides = [1, 1]} : vector<4x256xf32> to vector<1x256xf32>
    %269 = vector.broadcast %267 : vector<2x1xf32> to vector<2x256xf32>
    %270 = vector.broadcast %268 : vector<1x256xf32> to vector<2x256xf32>
    %271 = arith.mulf %269, %270 : vector<2x256xf32>
    %272 = vector.extract_strided_slice %25 {offsets = [0, 1], sizes = [2, 1], strides = [1, 1]} : vector<2x4xf32> to vector<2x1xf32>
    %273 = vector.extract_strided_slice %73 {offsets = [1, 0], sizes = [1, 256], strides = [1, 1]} : vector<4x256xf32> to vector<1x256xf32>
    %274 = vector.broadcast %272 : vector<2x1xf32> to vector<2x256xf32>
    %275 = vector.broadcast %273 : vector<1x256xf32> to vector<2x256xf32>
    %276 = arith.mulf %274, %275 : vector<2x256xf32>
    %277 = arith.addf %271, %276 : vector<2x256xf32>
    %278 = vector.extract_strided_slice %25 {offsets = [0, 2], sizes = [2, 1], strides = [1, 1]} : vector<2x4xf32> to vector<2x1xf32>
    %279 = vector.extract_strided_slice %73 {offsets = [2, 0], sizes = [1, 256], strides = [1, 1]} : vector<4x256xf32> to vector<1x256xf32>
    %280 = vector.broadcast %278 : vector<2x1xf32> to vector<2x256xf32>
    %281 = vector.broadcast %279 : vector<1x256xf32> to vector<2x256xf32>
    %282 = arith.mulf %280, %281 : vector<2x256xf32>
    %283 = arith.addf %277, %282 : vector<2x256xf32>
    %284 = vector.extract_strided_slice %25 {offsets = [0, 3], sizes = [2, 1], strides = [1, 1]} : vector<2x4xf32> to vector<2x1xf32>
    %285 = vector.extract_strided_slice %73 {offsets = [3, 0], sizes = [1, 256], strides = [1, 1]} : vector<4x256xf32> to vector<1x256xf32>
    %286 = vector.broadcast %284 : vector<2x1xf32> to vector<2x256xf32>
    %287 = vector.broadcast %285 : vector<1x256xf32> to vector<2x256xf32>
    %288 = arith.mulf %286, %287 : vector<2x256xf32>
    %289 = arith.addf %283, %288 : vector<2x256xf32>
    %290 = arith.addf %266, %289 : vector<2x256xf32>
    %c255_i32 = arith.constant 255 : i32
    %291 = tpu.dynamic_rotate %73 by %c255_i32 dim 1 : vector<4x256xf32>, i32 -> vector<4x256xf32>
    %292 = vector.extract_strided_slice %27 {offsets = [0, 0], sizes = [2, 1], strides = [1, 1]} : vector<2x4xf32> to vector<2x1xf32>
    %293 = vector.extract_strided_slice %291 {offsets = [0, 0], sizes = [1, 256], strides = [1, 1]} : vector<4x256xf32> to vector<1x256xf32>
    %294 = vector.broadcast %292 : vector<2x1xf32> to vector<2x256xf32>
    %295 = vector.broadcast %293 : vector<1x256xf32> to vector<2x256xf32>
    %296 = arith.mulf %294, %295 : vector<2x256xf32>
    %297 = vector.extract_strided_slice %27 {offsets = [0, 1], sizes = [2, 1], strides = [1, 1]} : vector<2x4xf32> to vector<2x1xf32>
    %298 = vector.extract_strided_slice %291 {offsets = [1, 0], sizes = [1, 256], strides = [1, 1]} : vector<4x256xf32> to vector<1x256xf32>
    %299 = vector.broadcast %297 : vector<2x1xf32> to vector<2x256xf32>
    %300 = vector.broadcast %298 : vector<1x256xf32> to vector<2x256xf32>
    %301 = arith.mulf %299, %300 : vector<2x256xf32>
    %302 = arith.addf %296, %301 : vector<2x256xf32>
    %303 = vector.extract_strided_slice %27 {offsets = [0, 2], sizes = [2, 1], strides = [1, 1]} : vector<2x4xf32> to vector<2x1xf32>
    %304 = vector.extract_strided_slice %291 {offsets = [2, 0], sizes = [1, 256], strides = [1, 1]} : vector<4x256xf32> to vector<1x256xf32>
    %305 = vector.broadcast %303 : vector<2x1xf32> to vector<2x256xf32>
    %306 = vector.broadcast %304 : vector<1x256xf32> to vector<2x256xf32>
    %307 = arith.mulf %305, %306 : vector<2x256xf32>
    %308 = arith.addf %302, %307 : vector<2x256xf32>
    %309 = vector.extract_strided_slice %27 {offsets = [0, 3], sizes = [2, 1], strides = [1, 1]} : vector<2x4xf32> to vector<2x1xf32>
    %310 = vector.extract_strided_slice %291 {offsets = [3, 0], sizes = [1, 256], strides = [1, 1]} : vector<4x256xf32> to vector<1x256xf32>
    %311 = vector.broadcast %309 : vector<2x1xf32> to vector<2x256xf32>
    %312 = vector.broadcast %310 : vector<1x256xf32> to vector<2x256xf32>
    %313 = arith.mulf %311, %312 : vector<2x256xf32>
    %314 = arith.addf %308, %313 : vector<2x256xf32>
    %315 = vector.extract_strided_slice %71 {offsets = [5, 0], sizes = [1, 256], strides = [1, 1]} : vector<9x256xf32> to vector<1x256xf32>
    %316 = vector.broadcast %315 : vector<1x256xf32> to vector<2x256xf32>
    %317 = arith.mulf %316, %314 : vector<2x256xf32>
    %318 = arith.addf %290, %317 : vector<2x256xf32>
    %c241_i32 = arith.constant 241 : i32
    %319 = tpu.dynamic_rotate %73 by %c241_i32 dim 1 : vector<4x256xf32>, i32 -> vector<4x256xf32>
    %320 = vector.extract_strided_slice %29 {offsets = [0, 0], sizes = [2, 1], strides = [1, 1]} : vector<2x4xf32> to vector<2x1xf32>
    %321 = vector.extract_strided_slice %319 {offsets = [0, 0], sizes = [1, 256], strides = [1, 1]} : vector<4x256xf32> to vector<1x256xf32>
    %322 = vector.broadcast %320 : vector<2x1xf32> to vector<2x256xf32>
    %323 = vector.broadcast %321 : vector<1x256xf32> to vector<2x256xf32>
    %324 = arith.mulf %322, %323 : vector<2x256xf32>
    %325 = vector.extract_strided_slice %29 {offsets = [0, 1], sizes = [2, 1], strides = [1, 1]} : vector<2x4xf32> to vector<2x1xf32>
    %326 = vector.extract_strided_slice %319 {offsets = [1, 0], sizes = [1, 256], strides = [1, 1]} : vector<4x256xf32> to vector<1x256xf32>
    %327 = vector.broadcast %325 : vector<2x1xf32> to vector<2x256xf32>
    %328 = vector.broadcast %326 : vector<1x256xf32> to vector<2x256xf32>
    %329 = arith.mulf %327, %328 : vector<2x256xf32>
    %330 = arith.addf %324, %329 : vector<2x256xf32>
    %331 = vector.extract_strided_slice %29 {offsets = [0, 2], sizes = [2, 1], strides = [1, 1]} : vector<2x4xf32> to vector<2x1xf32>
    %332 = vector.extract_strided_slice %319 {offsets = [2, 0], sizes = [1, 256], strides = [1, 1]} : vector<4x256xf32> to vector<1x256xf32>
    %333 = vector.broadcast %331 : vector<2x1xf32> to vector<2x256xf32>
    %334 = vector.broadcast %332 : vector<1x256xf32> to vector<2x256xf32>
    %335 = arith.mulf %333, %334 : vector<2x256xf32>
    %336 = arith.addf %330, %335 : vector<2x256xf32>
    %337 = vector.extract_strided_slice %29 {offsets = [0, 3], sizes = [2, 1], strides = [1, 1]} : vector<2x4xf32> to vector<2x1xf32>
    %338 = vector.extract_strided_slice %319 {offsets = [3, 0], sizes = [1, 256], strides = [1, 1]} : vector<4x256xf32> to vector<1x256xf32>
    %339 = vector.broadcast %337 : vector<2x1xf32> to vector<2x256xf32>
    %340 = vector.broadcast %338 : vector<1x256xf32> to vector<2x256xf32>
    %341 = arith.mulf %339, %340 : vector<2x256xf32>
    %342 = arith.addf %336, %341 : vector<2x256xf32>
    %343 = vector.extract_strided_slice %71 {offsets = [6, 0], sizes = [1, 256], strides = [1, 1]} : vector<9x256xf32> to vector<1x256xf32>
    %344 = vector.broadcast %343 : vector<1x256xf32> to vector<2x256xf32>
    %345 = arith.mulf %344, %342 : vector<2x256xf32>
    %346 = arith.addf %318, %345 : vector<2x256xf32>
    %c240_i32 = arith.constant 240 : i32
    %347 = tpu.dynamic_rotate %73 by %c240_i32 dim 1 : vector<4x256xf32>, i32 -> vector<4x256xf32>
    %348 = vector.extract_strided_slice %31 {offsets = [0, 0], sizes = [2, 1], strides = [1, 1]} : vector<2x4xf32> to vector<2x1xf32>
    %349 = vector.extract_strided_slice %347 {offsets = [0, 0], sizes = [1, 256], strides = [1, 1]} : vector<4x256xf32> to vector<1x256xf32>
    %350 = vector.broadcast %348 : vector<2x1xf32> to vector<2x256xf32>
    %351 = vector.broadcast %349 : vector<1x256xf32> to vector<2x256xf32>
    %352 = arith.mulf %350, %351 : vector<2x256xf32>
    %353 = vector.extract_strided_slice %31 {offsets = [0, 1], sizes = [2, 1], strides = [1, 1]} : vector<2x4xf32> to vector<2x1xf32>
    %354 = vector.extract_strided_slice %347 {offsets = [1, 0], sizes = [1, 256], strides = [1, 1]} : vector<4x256xf32> to vector<1x256xf32>
    %355 = vector.broadcast %353 : vector<2x1xf32> to vector<2x256xf32>
    %356 = vector.broadcast %354 : vector<1x256xf32> to vector<2x256xf32>
    %357 = arith.mulf %355, %356 : vector<2x256xf32>
    %358 = arith.addf %352, %357 : vector<2x256xf32>
    %359 = vector.extract_strided_slice %31 {offsets = [0, 2], sizes = [2, 1], strides = [1, 1]} : vector<2x4xf32> to vector<2x1xf32>
    %360 = vector.extract_strided_slice %347 {offsets = [2, 0], sizes = [1, 256], strides = [1, 1]} : vector<4x256xf32> to vector<1x256xf32>
    %361 = vector.broadcast %359 : vector<2x1xf32> to vector<2x256xf32>
    %362 = vector.broadcast %360 : vector<1x256xf32> to vector<2x256xf32>
    %363 = arith.mulf %361, %362 : vector<2x256xf32>
    %364 = arith.addf %358, %363 : vector<2x256xf32>
    %365 = vector.extract_strided_slice %31 {offsets = [0, 3], sizes = [2, 1], strides = [1, 1]} : vector<2x4xf32> to vector<2x1xf32>
    %366 = vector.extract_strided_slice %347 {offsets = [3, 0], sizes = [1, 256], strides = [1, 1]} : vector<4x256xf32> to vector<1x256xf32>
    %367 = vector.broadcast %365 : vector<2x1xf32> to vector<2x256xf32>
    %368 = vector.broadcast %366 : vector<1x256xf32> to vector<2x256xf32>
    %369 = arith.mulf %367, %368 : vector<2x256xf32>
    %370 = arith.addf %364, %369 : vector<2x256xf32>
    %371 = vector.extract_strided_slice %71 {offsets = [7, 0], sizes = [1, 256], strides = [1, 1]} : vector<9x256xf32> to vector<1x256xf32>
    %372 = vector.broadcast %371 : vector<1x256xf32> to vector<2x256xf32>
    %373 = arith.mulf %372, %370 : vector<2x256xf32>
    %374 = arith.addf %346, %373 : vector<2x256xf32>
    %c239_i32 = arith.constant 239 : i32
    %375 = tpu.dynamic_rotate %73 by %c239_i32 dim 1 : vector<4x256xf32>, i32 -> vector<4x256xf32>
    %376 = vector.extract_strided_slice %33 {offsets = [0, 0], sizes = [2, 1], strides = [1, 1]} : vector<2x4xf32> to vector<2x1xf32>
    %377 = vector.extract_strided_slice %375 {offsets = [0, 0], sizes = [1, 256], strides = [1, 1]} : vector<4x256xf32> to vector<1x256xf32>
    %378 = vector.broadcast %376 : vector<2x1xf32> to vector<2x256xf32>
    %379 = vector.broadcast %377 : vector<1x256xf32> to vector<2x256xf32>
    %380 = arith.mulf %378, %379 : vector<2x256xf32>
    %381 = vector.extract_strided_slice %33 {offsets = [0, 1], sizes = [2, 1], strides = [1, 1]} : vector<2x4xf32> to vector<2x1xf32>
    %382 = vector.extract_strided_slice %375 {offsets = [1, 0], sizes = [1, 256], strides = [1, 1]} : vector<4x256xf32> to vector<1x256xf32>
    %383 = vector.broadcast %381 : vector<2x1xf32> to vector<2x256xf32>
    %384 = vector.broadcast %382 : vector<1x256xf32> to vector<2x256xf32>
    %385 = arith.mulf %383, %384 : vector<2x256xf32>
    %386 = arith.addf %380, %385 : vector<2x256xf32>
    %387 = vector.extract_strided_slice %33 {offsets = [0, 2], sizes = [2, 1], strides = [1, 1]} : vector<2x4xf32> to vector<2x1xf32>
    %388 = vector.extract_strided_slice %375 {offsets = [2, 0], sizes = [1, 256], strides = [1, 1]} : vector<4x256xf32> to vector<1x256xf32>
    %389 = vector.broadcast %387 : vector<2x1xf32> to vector<2x256xf32>
    %390 = vector.broadcast %388 : vector<1x256xf32> to vector<2x256xf32>
    %391 = arith.mulf %389, %390 : vector<2x256xf32>
    %392 = arith.addf %386, %391 : vector<2x256xf32>
    %393 = vector.extract_strided_slice %33 {offsets = [0, 3], sizes = [2, 1], strides = [1, 1]} : vector<2x4xf32> to vector<2x1xf32>
    %394 = vector.extract_strided_slice %375 {offsets = [3, 0], sizes = [1, 256], strides = [1, 1]} : vector<4x256xf32> to vector<1x256xf32>
    %395 = vector.broadcast %393 : vector<2x1xf32> to vector<2x256xf32>
    %396 = vector.broadcast %394 : vector<1x256xf32> to vector<2x256xf32>
    %397 = arith.mulf %395, %396 : vector<2x256xf32>
    %398 = arith.addf %392, %397 : vector<2x256xf32>
    %399 = vector.extract_strided_slice %71 {offsets = [8, 0], sizes = [1, 256], strides = [1, 1]} : vector<9x256xf32> to vector<1x256xf32>
    %400 = vector.broadcast %399 : vector<1x256xf32> to vector<2x256xf32>
    %401 = arith.mulf %400, %398 : vector<2x256xf32>
    %402 = arith.addf %374, %401 : vector<2x256xf32>
    %403 = vector.broadcast %36 : vector<2x1xf32> to vector<2x256xf32>
    %404 = arith.addf %402, %403 : vector<2x256xf32>
    %cst_70 = arith.constant 0.000000e+00 : f32
    %405 = vector.broadcast %cst_70 : f32 to vector<2x256xf32>
    %406 = arith.maximumf %404, %405 : vector<2x256xf32>
    %cst_71 = arith.constant dense<0.000000e+00> : vector<2xf32>
    %407 = vector.multi_reduction <add>, %406, %cst_71 [1] : vector<2x256xf32> to vector<2xf32>
    %408 = vector.shape_cast %407 : vector<2xf32> to vector<2x1xf32>
    %cst_72 = arith.constant 3.906250e-03 : f32
    %409 = vector.broadcast %cst_72 : f32 to vector<2x1xf32>
    %410 = arith.mulf %408, %409 : vector<2x1xf32>
    %411 = vector.broadcast %410 : vector<2x1xf32> to vector<2x256xf32>
    %412 = arith.subf %406, %411 : vector<2x256xf32>
    %413 = arith.mulf %412, %412 : vector<2x256xf32>
    %cst_73 = arith.constant dense<0.000000e+00> : vector<2xf32>
    %414 = vector.multi_reduction <add>, %413, %cst_73 [1] : vector<2x256xf32> to vector<2xf32>
    %415 = vector.shape_cast %414 : vector<2xf32> to vector<2x1xf32>
    %cst_74 = arith.constant 3.906250e-03 : f32
    %416 = vector.broadcast %cst_74 : f32 to vector<2x1xf32>
    %417 = arith.mulf %415, %416 : vector<2x1xf32>
    %cst_75 = arith.constant 9.99999974E-6 : f32
    %418 = vector.broadcast %cst_75 : f32 to vector<2x1xf32>
    %419 = arith.addf %417, %418 : vector<2x1xf32>
    %420 = math.rsqrt %419 : vector<2x1xf32>
    %421 = vector.broadcast %420 : vector<2x1xf32> to vector<2x256xf32>
    %422 = arith.mulf %412, %421 : vector<2x256xf32>
    %423 = vector.broadcast %37 : vector<2x1xf32> to vector<2x256xf32>
    %424 = arith.mulf %422, %423 : vector<2x256xf32>
    %425 = vector.broadcast %38 : vector<2x1xf32> to vector<2x256xf32>
    %426 = arith.addf %424, %425 : vector<2x256xf32>
    %c17_i32_76 = arith.constant 17 : i32
    %427 = tpu.dynamic_rotate %426 by %c17_i32_76 dim 1 : vector<2x256xf32>, i32 -> vector<2x256xf32>
    %428 = vector.extract_strided_slice %41 {offsets = [0, 0], sizes = [1, 1], strides = [1, 1]} : vector<1x2xf32> to vector<1x1xf32>
    %429 = vector.extract_strided_slice %427 {offsets = [0, 0], sizes = [1, 256], strides = [1, 1]} : vector<2x256xf32> to vector<1x256xf32>
    %430 = vector.broadcast %428 : vector<1x1xf32> to vector<1x256xf32>
    %431 = arith.mulf %430, %429 : vector<1x256xf32>
    %432 = vector.extract_strided_slice %41 {offsets = [0, 1], sizes = [1, 1], strides = [1, 1]} : vector<1x2xf32> to vector<1x1xf32>
    %433 = vector.extract_strided_slice %427 {offsets = [1, 0], sizes = [1, 256], strides = [1, 1]} : vector<2x256xf32> to vector<1x256xf32>
    %434 = vector.broadcast %432 : vector<1x1xf32> to vector<1x256xf32>
    %435 = arith.mulf %434, %433 : vector<1x256xf32>
    %436 = arith.addf %431, %435 : vector<1x256xf32>
    %437 = vector.extract_strided_slice %71 {offsets = [0, 0], sizes = [1, 256], strides = [1, 1]} : vector<9x256xf32> to vector<1x256xf32>
    %438 = arith.mulf %437, %436 : vector<1x256xf32>
    %c16_i32_77 = arith.constant 16 : i32
    %439 = tpu.dynamic_rotate %426 by %c16_i32_77 dim 1 : vector<2x256xf32>, i32 -> vector<2x256xf32>
    %440 = vector.extract_strided_slice %44 {offsets = [0, 0], sizes = [1, 1], strides = [1, 1]} : vector<1x2xf32> to vector<1x1xf32>
    %441 = vector.extract_strided_slice %439 {offsets = [0, 0], sizes = [1, 256], strides = [1, 1]} : vector<2x256xf32> to vector<1x256xf32>
    %442 = vector.broadcast %440 : vector<1x1xf32> to vector<1x256xf32>
    %443 = arith.mulf %442, %441 : vector<1x256xf32>
    %444 = vector.extract_strided_slice %44 {offsets = [0, 1], sizes = [1, 1], strides = [1, 1]} : vector<1x2xf32> to vector<1x1xf32>
    %445 = vector.extract_strided_slice %439 {offsets = [1, 0], sizes = [1, 256], strides = [1, 1]} : vector<2x256xf32> to vector<1x256xf32>
    %446 = vector.broadcast %444 : vector<1x1xf32> to vector<1x256xf32>
    %447 = arith.mulf %446, %445 : vector<1x256xf32>
    %448 = arith.addf %443, %447 : vector<1x256xf32>
    %449 = vector.extract_strided_slice %71 {offsets = [1, 0], sizes = [1, 256], strides = [1, 1]} : vector<9x256xf32> to vector<1x256xf32>
    %450 = arith.mulf %449, %448 : vector<1x256xf32>
    %451 = arith.addf %438, %450 : vector<1x256xf32>
    %c15_i32_78 = arith.constant 15 : i32
    %452 = tpu.dynamic_rotate %426 by %c15_i32_78 dim 1 : vector<2x256xf32>, i32 -> vector<2x256xf32>
    %453 = vector.extract_strided_slice %47 {offsets = [0, 0], sizes = [1, 1], strides = [1, 1]} : vector<1x2xf32> to vector<1x1xf32>
    %454 = vector.extract_strided_slice %452 {offsets = [0, 0], sizes = [1, 256], strides = [1, 1]} : vector<2x256xf32> to vector<1x256xf32>
    %455 = vector.broadcast %453 : vector<1x1xf32> to vector<1x256xf32>
    %456 = arith.mulf %455, %454 : vector<1x256xf32>
    %457 = vector.extract_strided_slice %47 {offsets = [0, 1], sizes = [1, 1], strides = [1, 1]} : vector<1x2xf32> to vector<1x1xf32>
    %458 = vector.extract_strided_slice %452 {offsets = [1, 0], sizes = [1, 256], strides = [1, 1]} : vector<2x256xf32> to vector<1x256xf32>
    %459 = vector.broadcast %457 : vector<1x1xf32> to vector<1x256xf32>
    %460 = arith.mulf %459, %458 : vector<1x256xf32>
    %461 = arith.addf %456, %460 : vector<1x256xf32>
    %462 = vector.extract_strided_slice %71 {offsets = [2, 0], sizes = [1, 256], strides = [1, 1]} : vector<9x256xf32> to vector<1x256xf32>
    %463 = arith.mulf %462, %461 : vector<1x256xf32>
    %464 = arith.addf %451, %463 : vector<1x256xf32>
    %c1_i32_79 = arith.constant 1 : i32
    %465 = tpu.dynamic_rotate %426 by %c1_i32_79 dim 1 : vector<2x256xf32>, i32 -> vector<2x256xf32>
    %466 = vector.extract_strided_slice %50 {offsets = [0, 0], sizes = [1, 1], strides = [1, 1]} : vector<1x2xf32> to vector<1x1xf32>
    %467 = vector.extract_strided_slice %465 {offsets = [0, 0], sizes = [1, 256], strides = [1, 1]} : vector<2x256xf32> to vector<1x256xf32>
    %468 = vector.broadcast %466 : vector<1x1xf32> to vector<1x256xf32>
    %469 = arith.mulf %468, %467 : vector<1x256xf32>
    %470 = vector.extract_strided_slice %50 {offsets = [0, 1], sizes = [1, 1], strides = [1, 1]} : vector<1x2xf32> to vector<1x1xf32>
    %471 = vector.extract_strided_slice %465 {offsets = [1, 0], sizes = [1, 256], strides = [1, 1]} : vector<2x256xf32> to vector<1x256xf32>
    %472 = vector.broadcast %470 : vector<1x1xf32> to vector<1x256xf32>
    %473 = arith.mulf %472, %471 : vector<1x256xf32>
    %474 = arith.addf %469, %473 : vector<1x256xf32>
    %475 = vector.extract_strided_slice %71 {offsets = [3, 0], sizes = [1, 256], strides = [1, 1]} : vector<9x256xf32> to vector<1x256xf32>
    %476 = arith.mulf %475, %474 : vector<1x256xf32>
    %477 = arith.addf %464, %476 : vector<1x256xf32>
    %478 = vector.extract_strided_slice %53 {offsets = [0, 0], sizes = [1, 1], strides = [1, 1]} : vector<1x2xf32> to vector<1x1xf32>
    %479 = vector.extract_strided_slice %426 {offsets = [0, 0], sizes = [1, 256], strides = [1, 1]} : vector<2x256xf32> to vector<1x256xf32>
    %480 = vector.broadcast %478 : vector<1x1xf32> to vector<1x256xf32>
    %481 = arith.mulf %480, %479 : vector<1x256xf32>
    %482 = vector.extract_strided_slice %53 {offsets = [0, 1], sizes = [1, 1], strides = [1, 1]} : vector<1x2xf32> to vector<1x1xf32>
    %483 = vector.extract_strided_slice %426 {offsets = [1, 0], sizes = [1, 256], strides = [1, 1]} : vector<2x256xf32> to vector<1x256xf32>
    %484 = vector.broadcast %482 : vector<1x1xf32> to vector<1x256xf32>
    %485 = arith.mulf %484, %483 : vector<1x256xf32>
    %486 = arith.addf %481, %485 : vector<1x256xf32>
    %487 = arith.addf %477, %486 : vector<1x256xf32>
    %c255_i32_80 = arith.constant 255 : i32
    %488 = tpu.dynamic_rotate %426 by %c255_i32_80 dim 1 : vector<2x256xf32>, i32 -> vector<2x256xf32>
    %489 = vector.extract_strided_slice %56 {offsets = [0, 0], sizes = [1, 1], strides = [1, 1]} : vector<1x2xf32> to vector<1x1xf32>
    %490 = vector.extract_strided_slice %488 {offsets = [0, 0], sizes = [1, 256], strides = [1, 1]} : vector<2x256xf32> to vector<1x256xf32>
    %491 = vector.broadcast %489 : vector<1x1xf32> to vector<1x256xf32>
    %492 = arith.mulf %491, %490 : vector<1x256xf32>
    %493 = vector.extract_strided_slice %56 {offsets = [0, 1], sizes = [1, 1], strides = [1, 1]} : vector<1x2xf32> to vector<1x1xf32>
    %494 = vector.extract_strided_slice %488 {offsets = [1, 0], sizes = [1, 256], strides = [1, 1]} : vector<2x256xf32> to vector<1x256xf32>
    %495 = vector.broadcast %493 : vector<1x1xf32> to vector<1x256xf32>
    %496 = arith.mulf %495, %494 : vector<1x256xf32>
    %497 = arith.addf %492, %496 : vector<1x256xf32>
    %498 = vector.extract_strided_slice %71 {offsets = [5, 0], sizes = [1, 256], strides = [1, 1]} : vector<9x256xf32> to vector<1x256xf32>
    %499 = arith.mulf %498, %497 : vector<1x256xf32>
    %500 = arith.addf %487, %499 : vector<1x256xf32>
    %c241_i32_81 = arith.constant 241 : i32
    %501 = tpu.dynamic_rotate %426 by %c241_i32_81 dim 1 : vector<2x256xf32>, i32 -> vector<2x256xf32>
    %502 = vector.extract_strided_slice %59 {offsets = [0, 0], sizes = [1, 1], strides = [1, 1]} : vector<1x2xf32> to vector<1x1xf32>
    %503 = vector.extract_strided_slice %501 {offsets = [0, 0], sizes = [1, 256], strides = [1, 1]} : vector<2x256xf32> to vector<1x256xf32>
    %504 = vector.broadcast %502 : vector<1x1xf32> to vector<1x256xf32>
    %505 = arith.mulf %504, %503 : vector<1x256xf32>
    %506 = vector.extract_strided_slice %59 {offsets = [0, 1], sizes = [1, 1], strides = [1, 1]} : vector<1x2xf32> to vector<1x1xf32>
    %507 = vector.extract_strided_slice %501 {offsets = [1, 0], sizes = [1, 256], strides = [1, 1]} : vector<2x256xf32> to vector<1x256xf32>
    %508 = vector.broadcast %506 : vector<1x1xf32> to vector<1x256xf32>
    %509 = arith.mulf %508, %507 : vector<1x256xf32>
    %510 = arith.addf %505, %509 : vector<1x256xf32>
    %511 = vector.extract_strided_slice %71 {offsets = [6, 0], sizes = [1, 256], strides = [1, 1]} : vector<9x256xf32> to vector<1x256xf32>
    %512 = arith.mulf %511, %510 : vector<1x256xf32>
    %513 = arith.addf %500, %512 : vector<1x256xf32>
    %c240_i32_82 = arith.constant 240 : i32
    %514 = tpu.dynamic_rotate %426 by %c240_i32_82 dim 1 : vector<2x256xf32>, i32 -> vector<2x256xf32>
    %515 = vector.extract_strided_slice %62 {offsets = [0, 0], sizes = [1, 1], strides = [1, 1]} : vector<1x2xf32> to vector<1x1xf32>
    %516 = vector.extract_strided_slice %514 {offsets = [0, 0], sizes = [1, 256], strides = [1, 1]} : vector<2x256xf32> to vector<1x256xf32>
    %517 = vector.broadcast %515 : vector<1x1xf32> to vector<1x256xf32>
    %518 = arith.mulf %517, %516 : vector<1x256xf32>
    %519 = vector.extract_strided_slice %62 {offsets = [0, 1], sizes = [1, 1], strides = [1, 1]} : vector<1x2xf32> to vector<1x1xf32>
    %520 = vector.extract_strided_slice %514 {offsets = [1, 0], sizes = [1, 256], strides = [1, 1]} : vector<2x256xf32> to vector<1x256xf32>
    %521 = vector.broadcast %519 : vector<1x1xf32> to vector<1x256xf32>
    %522 = arith.mulf %521, %520 : vector<1x256xf32>
    %523 = arith.addf %518, %522 : vector<1x256xf32>
    %524 = vector.extract_strided_slice %71 {offsets = [7, 0], sizes = [1, 256], strides = [1, 1]} : vector<9x256xf32> to vector<1x256xf32>
    %525 = arith.mulf %524, %523 : vector<1x256xf32>
    %526 = arith.addf %513, %525 : vector<1x256xf32>
    %c239_i32_83 = arith.constant 239 : i32
    %527 = tpu.dynamic_rotate %426 by %c239_i32_83 dim 1 : vector<2x256xf32>, i32 -> vector<2x256xf32>
    %528 = vector.extract_strided_slice %65 {offsets = [0, 0], sizes = [1, 1], strides = [1, 1]} : vector<1x2xf32> to vector<1x1xf32>
    %529 = vector.extract_strided_slice %527 {offsets = [0, 0], sizes = [1, 256], strides = [1, 1]} : vector<2x256xf32> to vector<1x256xf32>
    %530 = vector.broadcast %528 : vector<1x1xf32> to vector<1x256xf32>
    %531 = arith.mulf %530, %529 : vector<1x256xf32>
    %532 = vector.extract_strided_slice %65 {offsets = [0, 1], sizes = [1, 1], strides = [1, 1]} : vector<1x2xf32> to vector<1x1xf32>
    %533 = vector.extract_strided_slice %527 {offsets = [1, 0], sizes = [1, 256], strides = [1, 1]} : vector<2x256xf32> to vector<1x256xf32>
    %534 = vector.broadcast %532 : vector<1x1xf32> to vector<1x256xf32>
    %535 = arith.mulf %534, %533 : vector<1x256xf32>
    %536 = arith.addf %531, %535 : vector<1x256xf32>
    %537 = vector.extract_strided_slice %71 {offsets = [8, 0], sizes = [1, 256], strides = [1, 1]} : vector<9x256xf32> to vector<1x256xf32>
    %538 = arith.mulf %537, %536 : vector<1x256xf32>
    %539 = arith.addf %526, %538 : vector<1x256xf32>
    %540 = vector.broadcast %68 : vector<1x1xf32> to vector<1x256xf32>
    %541 = arith.addf %539, %540 : vector<1x256xf32>
    %cst_84 = arith.constant 0.000000e+00 : f32
    %542 = vector.broadcast %cst_84 : f32 to vector<1x256xf32>
    %543 = arith.maximumf %541, %542 : vector<1x256xf32>
    %cst_85 = arith.constant dense<0.000000e+00> : vector<1xf32>
    %544 = vector.multi_reduction <add>, %543, %cst_85 [1] : vector<1x256xf32> to vector<1xf32>
    %545 = vector.shape_cast %544 : vector<1xf32> to vector<1x1xf32>
    %cst_86 = arith.constant 3.906250e-03 : f32
    %546 = vector.broadcast %cst_86 : f32 to vector<1x1xf32>
    %547 = arith.mulf %545, %546 : vector<1x1xf32>
    %548 = vector.broadcast %547 : vector<1x1xf32> to vector<1x256xf32>
    %549 = arith.subf %543, %548 : vector<1x256xf32>
    %550 = arith.mulf %549, %549 : vector<1x256xf32>
    %cst_87 = arith.constant dense<0.000000e+00> : vector<1xf32>
    %551 = vector.multi_reduction <add>, %550, %cst_87 [1] : vector<1x256xf32> to vector<1xf32>
    %552 = vector.shape_cast %551 : vector<1xf32> to vector<1x1xf32>
    %cst_88 = arith.constant 3.906250e-03 : f32
    %553 = vector.broadcast %cst_88 : f32 to vector<1x1xf32>
    %554 = arith.mulf %552, %553 : vector<1x1xf32>
    %cst_89 = arith.constant 9.99999974E-6 : f32
    %555 = vector.broadcast %cst_89 : f32 to vector<1x1xf32>
    %556 = arith.addf %554, %555 : vector<1x1xf32>
    %557 = math.rsqrt %556 : vector<1x1xf32>
    %558 = vector.broadcast %557 : vector<1x1xf32> to vector<1x256xf32>
    %559 = arith.mulf %549, %558 : vector<1x256xf32>
    %560 = vector.broadcast %69 : vector<1x1xf32> to vector<1x256xf32>
    %561 = arith.mulf %559, %560 : vector<1x256xf32>
    %562 = vector.broadcast %70 : vector<1x1xf32> to vector<1x256xf32>
    %563 = arith.addf %561, %562 : vector<1x256xf32>
    %564 = vector.broadcast %563 : vector<1x256xf32> to vector<8x256xf32>
    %565 = arith.mulf %155, %564 : vector<8x256xf32>
    %c0_90 = arith.constant 0 : index
    %c0_91 = arith.constant 0 : index
    %c0_92 = arith.constant 0 : index
    %566 = vector.load %arg7[%c0_90, %c0_91, %c0_92] : memref<2x8x256xf32, #tpu.memory_space<vmem>>, vector<1x8x256xf32>
    %567 = vector.shape_cast %566 : vector<1x8x256xf32> to vector<8x256xf32>
    %568 = vector.shape_cast %565 : vector<8x256xf32> to vector<1x8x256xf32>
    tpu.vector_store %arg7[%c0_90, %c0_91, %c0_92], %568 {strides = array<i32>} : memref<2x8x256xf32, #tpu.memory_space<vmem>>, vector<1x8x256xf32>,
    %c1_93 = arith.constant 1 : index
    %c0_94 = arith.constant 0 : index
    %c0_95 = arith.constant 0 : index
    %569 = vector.load %arg1[%c1_93, %c0_94, %c0_95] : memref<2x4x256xf32, #tpu.memory_space<vmem>>, vector<1x4x256xf32>
    %570 = vector.shape_cast %569 : vector<1x4x256xf32> to vector<4x256xf32>
    %571 = vector.extract_strided_slice %2 {offsets = [0, 0], sizes = [2, 1], strides = [1, 1]} : vector<2x4xf32> to vector<2x1xf32>
    %572 = vector.extract_strided_slice %570 {offsets = [0, 0], sizes = [1, 256], strides = [1, 1]} : vector<4x256xf32> to vector<1x256xf32>
    %573 = vector.broadcast %571 : vector<2x1xf32> to vector<2x256xf32>
    %574 = vector.broadcast %572 : vector<1x256xf32> to vector<2x256xf32>
    %575 = arith.mulf %573, %574 : vector<2x256xf32>
    %576 = vector.extract_strided_slice %2 {offsets = [0, 1], sizes = [2, 1], strides = [1, 1]} : vector<2x4xf32> to vector<2x1xf32>
    %577 = vector.extract_strided_slice %570 {offsets = [1, 0], sizes = [1, 256], strides = [1, 1]} : vector<4x256xf32> to vector<1x256xf32>
    %578 = vector.broadcast %576 : vector<2x1xf32> to vector<2x256xf32>
    %579 = vector.broadcast %577 : vector<1x256xf32> to vector<2x256xf32>
    %580 = arith.mulf %578, %579 : vector<2x256xf32>
    %581 = arith.addf %575, %580 : vector<2x256xf32>
    %582 = vector.extract_strided_slice %2 {offsets = [0, 2], sizes = [2, 1], strides = [1, 1]} : vector<2x4xf32> to vector<2x1xf32>
    %583 = vector.extract_strided_slice %570 {offsets = [2, 0], sizes = [1, 256], strides = [1, 1]} : vector<4x256xf32> to vector<1x256xf32>
    %584 = vector.broadcast %582 : vector<2x1xf32> to vector<2x256xf32>
    %585 = vector.broadcast %583 : vector<1x256xf32> to vector<2x256xf32>
    %586 = arith.mulf %584, %585 : vector<2x256xf32>
    %587 = arith.addf %581, %586 : vector<2x256xf32>
    %588 = vector.extract_strided_slice %2 {offsets = [0, 3], sizes = [2, 1], strides = [1, 1]} : vector<2x4xf32> to vector<2x1xf32>
    %589 = vector.extract_strided_slice %570 {offsets = [3, 0], sizes = [1, 256], strides = [1, 1]} : vector<4x256xf32> to vector<1x256xf32>
    %590 = vector.broadcast %588 : vector<2x1xf32> to vector<2x256xf32>
    %591 = vector.broadcast %589 : vector<1x256xf32> to vector<2x256xf32>
    %592 = arith.mulf %590, %591 : vector<2x256xf32>
    %593 = arith.addf %587, %592 : vector<2x256xf32>
    %594 = vector.broadcast %5 : vector<2x1xf32> to vector<2x256xf32>
    %595 = arith.addf %593, %594 : vector<2x256xf32>
    %cst_96 = arith.constant 0.000000e+00 : f32
    %596 = vector.broadcast %cst_96 : f32 to vector<2x256xf32>
    %597 = arith.maximumf %595, %596 : vector<2x256xf32>
    %cst_97 = arith.constant dense<0.000000e+00> : vector<2xf32>
    %598 = vector.multi_reduction <add>, %597, %cst_97 [1] : vector<2x256xf32> to vector<2xf32>
    %599 = vector.shape_cast %598 : vector<2xf32> to vector<2x1xf32>
    %cst_98 = arith.constant 3.906250e-03 : f32
    %600 = vector.broadcast %cst_98 : f32 to vector<2x1xf32>
    %601 = arith.mulf %599, %600 : vector<2x1xf32>
    %602 = vector.broadcast %601 : vector<2x1xf32> to vector<2x256xf32>
    %603 = arith.subf %597, %602 : vector<2x256xf32>
    %604 = arith.mulf %603, %603 : vector<2x256xf32>
    %cst_99 = arith.constant dense<0.000000e+00> : vector<2xf32>
    %605 = vector.multi_reduction <add>, %604, %cst_99 [1] : vector<2x256xf32> to vector<2xf32>
    %606 = vector.shape_cast %605 : vector<2xf32> to vector<2x1xf32>
    %cst_100 = arith.constant 3.906250e-03 : f32
    %607 = vector.broadcast %cst_100 : f32 to vector<2x1xf32>
    %608 = arith.mulf %606, %607 : vector<2x1xf32>
    %cst_101 = arith.constant 9.99999974E-6 : f32
    %609 = vector.broadcast %cst_101 : f32 to vector<2x1xf32>
    %610 = arith.addf %608, %609 : vector<2x1xf32>
    %611 = math.rsqrt %610 : vector<2x1xf32>
    %612 = vector.broadcast %611 : vector<2x1xf32> to vector<2x256xf32>
    %613 = arith.mulf %603, %612 : vector<2x256xf32>
    %614 = vector.broadcast %6 : vector<2x1xf32> to vector<2x256xf32>
    %615 = arith.mulf %613, %614 : vector<2x256xf32>
    %616 = vector.broadcast %7 : vector<2x1xf32> to vector<2x256xf32>
    %617 = arith.addf %615, %616 : vector<2x256xf32>
    %618 = vector.extract_strided_slice %10 {offsets = [0, 0], sizes = [8, 1], strides = [1, 1]} : vector<8x2xf32> to vector<8x1xf32>
    %619 = vector.extract_strided_slice %617 {offsets = [0, 0], sizes = [1, 256], strides = [1, 1]} : vector<2x256xf32> to vector<1x256xf32>
    %620 = vector.broadcast %618 : vector<8x1xf32> to vector<8x256xf32>
    %621 = vector.broadcast %619 : vector<1x256xf32> to vector<8x256xf32>
    %622 = arith.mulf %620, %621 : vector<8x256xf32>
    %623 = vector.extract_strided_slice %10 {offsets = [0, 1], sizes = [8, 1], strides = [1, 1]} : vector<8x2xf32> to vector<8x1xf32>
    %624 = vector.extract_strided_slice %617 {offsets = [1, 0], sizes = [1, 256], strides = [1, 1]} : vector<2x256xf32> to vector<1x256xf32>
    %625 = vector.broadcast %623 : vector<8x1xf32> to vector<8x256xf32>
    %626 = vector.broadcast %624 : vector<1x256xf32> to vector<8x256xf32>
    %627 = arith.mulf %625, %626 : vector<8x256xf32>
    %628 = arith.addf %622, %627 : vector<8x256xf32>
    %629 = vector.broadcast %13 : vector<8x1xf32> to vector<8x256xf32>
    %630 = arith.addf %628, %629 : vector<8x256xf32>
    %cst_102 = arith.constant 0.000000e+00 : f32
    %631 = vector.broadcast %cst_102 : f32 to vector<8x256xf32>
    %632 = arith.maximumf %630, %631 : vector<8x256xf32>
    %cst_103 = arith.constant dense<0.000000e+00> : vector<8xf32>
    %633 = vector.multi_reduction <add>, %632, %cst_103 [1] : vector<8x256xf32> to vector<8xf32>
    %634 = vector.shape_cast %633 : vector<8xf32> to vector<8x1xf32>
    %cst_104 = arith.constant 3.906250e-03 : f32
    %635 = vector.broadcast %cst_104 : f32 to vector<8x1xf32>
    %636 = arith.mulf %634, %635 : vector<8x1xf32>
    %637 = vector.broadcast %636 : vector<8x1xf32> to vector<8x256xf32>
    %638 = arith.subf %632, %637 : vector<8x256xf32>
    %639 = arith.mulf %638, %638 : vector<8x256xf32>
    %cst_105 = arith.constant dense<0.000000e+00> : vector<8xf32>
    %640 = vector.multi_reduction <add>, %639, %cst_105 [1] : vector<8x256xf32> to vector<8xf32>
    %641 = vector.shape_cast %640 : vector<8xf32> to vector<8x1xf32>
    %cst_106 = arith.constant 3.906250e-03 : f32
    %642 = vector.broadcast %cst_106 : f32 to vector<8x1xf32>
    %643 = arith.mulf %641, %642 : vector<8x1xf32>
    %cst_107 = arith.constant 9.99999974E-6 : f32
    %644 = vector.broadcast %cst_107 : f32 to vector<8x1xf32>
    %645 = arith.addf %643, %644 : vector<8x1xf32>
    %646 = math.rsqrt %645 : vector<8x1xf32>
    %647 = vector.broadcast %646 : vector<8x1xf32> to vector<8x256xf32>
    %648 = arith.mulf %638, %647 : vector<8x256xf32>
    %649 = vector.broadcast %14 : vector<8x1xf32> to vector<8x256xf32>
    %650 = arith.mulf %648, %649 : vector<8x256xf32>
    %651 = vector.broadcast %15 : vector<8x1xf32> to vector<8x256xf32>
    %652 = arith.addf %650, %651 : vector<8x256xf32>
    %c17_i32_108 = arith.constant 17 : i32
    %653 = tpu.dynamic_rotate %570 by %c17_i32_108 dim 1 : vector<4x256xf32>, i32 -> vector<4x256xf32>
    %654 = vector.extract_strided_slice %17 {offsets = [0, 0], sizes = [2, 1], strides = [1, 1]} : vector<2x4xf32> to vector<2x1xf32>
    %655 = vector.extract_strided_slice %653 {offsets = [0, 0], sizes = [1, 256], strides = [1, 1]} : vector<4x256xf32> to vector<1x256xf32>
    %656 = vector.broadcast %654 : vector<2x1xf32> to vector<2x256xf32>
    %657 = vector.broadcast %655 : vector<1x256xf32> to vector<2x256xf32>
    %658 = arith.mulf %656, %657 : vector<2x256xf32>
    %659 = vector.extract_strided_slice %17 {offsets = [0, 1], sizes = [2, 1], strides = [1, 1]} : vector<2x4xf32> to vector<2x1xf32>
    %660 = vector.extract_strided_slice %653 {offsets = [1, 0], sizes = [1, 256], strides = [1, 1]} : vector<4x256xf32> to vector<1x256xf32>
    %661 = vector.broadcast %659 : vector<2x1xf32> to vector<2x256xf32>
    %662 = vector.broadcast %660 : vector<1x256xf32> to vector<2x256xf32>
    %663 = arith.mulf %661, %662 : vector<2x256xf32>
    %664 = arith.addf %658, %663 : vector<2x256xf32>
    %665 = vector.extract_strided_slice %17 {offsets = [0, 2], sizes = [2, 1], strides = [1, 1]} : vector<2x4xf32> to vector<2x1xf32>
    %666 = vector.extract_strided_slice %653 {offsets = [2, 0], sizes = [1, 256], strides = [1, 1]} : vector<4x256xf32> to vector<1x256xf32>
    %667 = vector.broadcast %665 : vector<2x1xf32> to vector<2x256xf32>
    %668 = vector.broadcast %666 : vector<1x256xf32> to vector<2x256xf32>
    %669 = arith.mulf %667, %668 : vector<2x256xf32>
    %670 = arith.addf %664, %669 : vector<2x256xf32>
    %671 = vector.extract_strided_slice %17 {offsets = [0, 3], sizes = [2, 1], strides = [1, 1]} : vector<2x4xf32> to vector<2x1xf32>
    %672 = vector.extract_strided_slice %653 {offsets = [3, 0], sizes = [1, 256], strides = [1, 1]} : vector<4x256xf32> to vector<1x256xf32>
    %673 = vector.broadcast %671 : vector<2x1xf32> to vector<2x256xf32>
    %674 = vector.broadcast %672 : vector<1x256xf32> to vector<2x256xf32>
    %675 = arith.mulf %673, %674 : vector<2x256xf32>
    %676 = arith.addf %670, %675 : vector<2x256xf32>
    %677 = vector.extract_strided_slice %71 {offsets = [0, 0], sizes = [1, 256], strides = [1, 1]} : vector<9x256xf32> to vector<1x256xf32>
    %678 = vector.broadcast %677 : vector<1x256xf32> to vector<2x256xf32>
    %679 = arith.mulf %678, %676 : vector<2x256xf32>
    %c16_i32_109 = arith.constant 16 : i32
    %680 = tpu.dynamic_rotate %570 by %c16_i32_109 dim 1 : vector<4x256xf32>, i32 -> vector<4x256xf32>
    %681 = vector.extract_strided_slice %19 {offsets = [0, 0], sizes = [2, 1], strides = [1, 1]} : vector<2x4xf32> to vector<2x1xf32>
    %682 = vector.extract_strided_slice %680 {offsets = [0, 0], sizes = [1, 256], strides = [1, 1]} : vector<4x256xf32> to vector<1x256xf32>
    %683 = vector.broadcast %681 : vector<2x1xf32> to vector<2x256xf32>
    %684 = vector.broadcast %682 : vector<1x256xf32> to vector<2x256xf32>
    %685 = arith.mulf %683, %684 : vector<2x256xf32>
    %686 = vector.extract_strided_slice %19 {offsets = [0, 1], sizes = [2, 1], strides = [1, 1]} : vector<2x4xf32> to vector<2x1xf32>
    %687 = vector.extract_strided_slice %680 {offsets = [1, 0], sizes = [1, 256], strides = [1, 1]} : vector<4x256xf32> to vector<1x256xf32>
    %688 = vector.broadcast %686 : vector<2x1xf32> to vector<2x256xf32>
    %689 = vector.broadcast %687 : vector<1x256xf32> to vector<2x256xf32>
    %690 = arith.mulf %688, %689 : vector<2x256xf32>
    %691 = arith.addf %685, %690 : vector<2x256xf32>
    %692 = vector.extract_strided_slice %19 {offsets = [0, 2], sizes = [2, 1], strides = [1, 1]} : vector<2x4xf32> to vector<2x1xf32>
    %693 = vector.extract_strided_slice %680 {offsets = [2, 0], sizes = [1, 256], strides = [1, 1]} : vector<4x256xf32> to vector<1x256xf32>
    %694 = vector.broadcast %692 : vector<2x1xf32> to vector<2x256xf32>
    %695 = vector.broadcast %693 : vector<1x256xf32> to vector<2x256xf32>
    %696 = arith.mulf %694, %695 : vector<2x256xf32>
    %697 = arith.addf %691, %696 : vector<2x256xf32>
    %698 = vector.extract_strided_slice %19 {offsets = [0, 3], sizes = [2, 1], strides = [1, 1]} : vector<2x4xf32> to vector<2x1xf32>
    %699 = vector.extract_strided_slice %680 {offsets = [3, 0], sizes = [1, 256], strides = [1, 1]} : vector<4x256xf32> to vector<1x256xf32>
    %700 = vector.broadcast %698 : vector<2x1xf32> to vector<2x256xf32>
    %701 = vector.broadcast %699 : vector<1x256xf32> to vector<2x256xf32>
    %702 = arith.mulf %700, %701 : vector<2x256xf32>
    %703 = arith.addf %697, %702 : vector<2x256xf32>
    %704 = vector.extract_strided_slice %71 {offsets = [1, 0], sizes = [1, 256], strides = [1, 1]} : vector<9x256xf32> to vector<1x256xf32>
    %705 = vector.broadcast %704 : vector<1x256xf32> to vector<2x256xf32>
    %706 = arith.mulf %705, %703 : vector<2x256xf32>
    %707 = arith.addf %679, %706 : vector<2x256xf32>
    %c15_i32_110 = arith.constant 15 : i32
    %708 = tpu.dynamic_rotate %570 by %c15_i32_110 dim 1 : vector<4x256xf32>, i32 -> vector<4x256xf32>
    %709 = vector.extract_strided_slice %21 {offsets = [0, 0], sizes = [2, 1], strides = [1, 1]} : vector<2x4xf32> to vector<2x1xf32>
    %710 = vector.extract_strided_slice %708 {offsets = [0, 0], sizes = [1, 256], strides = [1, 1]} : vector<4x256xf32> to vector<1x256xf32>
    %711 = vector.broadcast %709 : vector<2x1xf32> to vector<2x256xf32>
    %712 = vector.broadcast %710 : vector<1x256xf32> to vector<2x256xf32>
    %713 = arith.mulf %711, %712 : vector<2x256xf32>
    %714 = vector.extract_strided_slice %21 {offsets = [0, 1], sizes = [2, 1], strides = [1, 1]} : vector<2x4xf32> to vector<2x1xf32>
    %715 = vector.extract_strided_slice %708 {offsets = [1, 0], sizes = [1, 256], strides = [1, 1]} : vector<4x256xf32> to vector<1x256xf32>
    %716 = vector.broadcast %714 : vector<2x1xf32> to vector<2x256xf32>
    %717 = vector.broadcast %715 : vector<1x256xf32> to vector<2x256xf32>
    %718 = arith.mulf %716, %717 : vector<2x256xf32>
    %719 = arith.addf %713, %718 : vector<2x256xf32>
    %720 = vector.extract_strided_slice %21 {offsets = [0, 2], sizes = [2, 1], strides = [1, 1]} : vector<2x4xf32> to vector<2x1xf32>
    %721 = vector.extract_strided_slice %708 {offsets = [2, 0], sizes = [1, 256], strides = [1, 1]} : vector<4x256xf32> to vector<1x256xf32>
    %722 = vector.broadcast %720 : vector<2x1xf32> to vector<2x256xf32>
    %723 = vector.broadcast %721 : vector<1x256xf32> to vector<2x256xf32>
    %724 = arith.mulf %722, %723 : vector<2x256xf32>
    %725 = arith.addf %719, %724 : vector<2x256xf32>
    %726 = vector.extract_strided_slice %21 {offsets = [0, 3], sizes = [2, 1], strides = [1, 1]} : vector<2x4xf32> to vector<2x1xf32>
    %727 = vector.extract_strided_slice %708 {offsets = [3, 0], sizes = [1, 256], strides = [1, 1]} : vector<4x256xf32> to vector<1x256xf32>
    %728 = vector.broadcast %726 : vector<2x1xf32> to vector<2x256xf32>
    %729 = vector.broadcast %727 : vector<1x256xf32> to vector<2x256xf32>
    %730 = arith.mulf %728, %729 : vector<2x256xf32>
    %731 = arith.addf %725, %730 : vector<2x256xf32>
    %732 = vector.extract_strided_slice %71 {offsets = [2, 0], sizes = [1, 256], strides = [1, 1]} : vector<9x256xf32> to vector<1x256xf32>
    %733 = vector.broadcast %732 : vector<1x256xf32> to vector<2x256xf32>
    %734 = arith.mulf %733, %731 : vector<2x256xf32>
    %735 = arith.addf %707, %734 : vector<2x256xf32>
    %c1_i32_111 = arith.constant 1 : i32
    %736 = tpu.dynamic_rotate %570 by %c1_i32_111 dim 1 : vector<4x256xf32>, i32 -> vector<4x256xf32>
    %737 = vector.extract_strided_slice %23 {offsets = [0, 0], sizes = [2, 1], strides = [1, 1]} : vector<2x4xf32> to vector<2x1xf32>
    %738 = vector.extract_strided_slice %736 {offsets = [0, 0], sizes = [1, 256], strides = [1, 1]} : vector<4x256xf32> to vector<1x256xf32>
    %739 = vector.broadcast %737 : vector<2x1xf32> to vector<2x256xf32>
    %740 = vector.broadcast %738 : vector<1x256xf32> to vector<2x256xf32>
    %741 = arith.mulf %739, %740 : vector<2x256xf32>
    %742 = vector.extract_strided_slice %23 {offsets = [0, 1], sizes = [2, 1], strides = [1, 1]} : vector<2x4xf32> to vector<2x1xf32>
    %743 = vector.extract_strided_slice %736 {offsets = [1, 0], sizes = [1, 256], strides = [1, 1]} : vector<4x256xf32> to vector<1x256xf32>
    %744 = vector.broadcast %742 : vector<2x1xf32> to vector<2x256xf32>
    %745 = vector.broadcast %743 : vector<1x256xf32> to vector<2x256xf32>
    %746 = arith.mulf %744, %745 : vector<2x256xf32>
    %747 = arith.addf %741, %746 : vector<2x256xf32>
    %748 = vector.extract_strided_slice %23 {offsets = [0, 2], sizes = [2, 1], strides = [1, 1]} : vector<2x4xf32> to vector<2x1xf32>
    %749 = vector.extract_strided_slice %736 {offsets = [2, 0], sizes = [1, 256], strides = [1, 1]} : vector<4x256xf32> to vector<1x256xf32>
    %750 = vector.broadcast %748 : vector<2x1xf32> to vector<2x256xf32>
    %751 = vector.broadcast %749 : vector<1x256xf32> to vector<2x256xf32>
    %752 = arith.mulf %750, %751 : vector<2x256xf32>
    %753 = arith.addf %747, %752 : vector<2x256xf32>
    %754 = vector.extract_strided_slice %23 {offsets = [0, 3], sizes = [2, 1], strides = [1, 1]} : vector<2x4xf32> to vector<2x1xf32>
    %755 = vector.extract_strided_slice %736 {offsets = [3, 0], sizes = [1, 256], strides = [1, 1]} : vector<4x256xf32> to vector<1x256xf32>
    %756 = vector.broadcast %754 : vector<2x1xf32> to vector<2x256xf32>
    %757 = vector.broadcast %755 : vector<1x256xf32> to vector<2x256xf32>
    %758 = arith.mulf %756, %757 : vector<2x256xf32>
    %759 = arith.addf %753, %758 : vector<2x256xf32>
    %760 = vector.extract_strided_slice %71 {offsets = [3, 0], sizes = [1, 256], strides = [1, 1]} : vector<9x256xf32> to vector<1x256xf32>
    %761 = vector.broadcast %760 : vector<1x256xf32> to vector<2x256xf32>
    %762 = arith.mulf %761, %759 : vector<2x256xf32>
    %763 = arith.addf %735, %762 : vector<2x256xf32>
    %764 = vector.extract_strided_slice %25 {offsets = [0, 0], sizes = [2, 1], strides = [1, 1]} : vector<2x4xf32> to vector<2x1xf32>
    %765 = vector.extract_strided_slice %570 {offsets = [0, 0], sizes = [1, 256], strides = [1, 1]} : vector<4x256xf32> to vector<1x256xf32>
    %766 = vector.broadcast %764 : vector<2x1xf32> to vector<2x256xf32>
    %767 = vector.broadcast %765 : vector<1x256xf32> to vector<2x256xf32>
    %768 = arith.mulf %766, %767 : vector<2x256xf32>
    %769 = vector.extract_strided_slice %25 {offsets = [0, 1], sizes = [2, 1], strides = [1, 1]} : vector<2x4xf32> to vector<2x1xf32>
    %770 = vector.extract_strided_slice %570 {offsets = [1, 0], sizes = [1, 256], strides = [1, 1]} : vector<4x256xf32> to vector<1x256xf32>
    %771 = vector.broadcast %769 : vector<2x1xf32> to vector<2x256xf32>
    %772 = vector.broadcast %770 : vector<1x256xf32> to vector<2x256xf32>
    %773 = arith.mulf %771, %772 : vector<2x256xf32>
    %774 = arith.addf %768, %773 : vector<2x256xf32>
    %775 = vector.extract_strided_slice %25 {offsets = [0, 2], sizes = [2, 1], strides = [1, 1]} : vector<2x4xf32> to vector<2x1xf32>
    %776 = vector.extract_strided_slice %570 {offsets = [2, 0], sizes = [1, 256], strides = [1, 1]} : vector<4x256xf32> to vector<1x256xf32>
    %777 = vector.broadcast %775 : vector<2x1xf32> to vector<2x256xf32>
    %778 = vector.broadcast %776 : vector<1x256xf32> to vector<2x256xf32>
    %779 = arith.mulf %777, %778 : vector<2x256xf32>
    %780 = arith.addf %774, %779 : vector<2x256xf32>
    %781 = vector.extract_strided_slice %25 {offsets = [0, 3], sizes = [2, 1], strides = [1, 1]} : vector<2x4xf32> to vector<2x1xf32>
    %782 = vector.extract_strided_slice %570 {offsets = [3, 0], sizes = [1, 256], strides = [1, 1]} : vector<4x256xf32> to vector<1x256xf32>
    %783 = vector.broadcast %781 : vector<2x1xf32> to vector<2x256xf32>
    %784 = vector.broadcast %782 : vector<1x256xf32> to vector<2x256xf32>
    %785 = arith.mulf %783, %784 : vector<2x256xf32>
    %786 = arith.addf %780, %785 : vector<2x256xf32>
    %787 = arith.addf %763, %786 : vector<2x256xf32>
    %c255_i32_112 = arith.constant 255 : i32
    %788 = tpu.dynamic_rotate %570 by %c255_i32_112 dim 1 : vector<4x256xf32>, i32 -> vector<4x256xf32>
    %789 = vector.extract_strided_slice %27 {offsets = [0, 0], sizes = [2, 1], strides = [1, 1]} : vector<2x4xf32> to vector<2x1xf32>
    %790 = vector.extract_strided_slice %788 {offsets = [0, 0], sizes = [1, 256], strides = [1, 1]} : vector<4x256xf32> to vector<1x256xf32>
    %791 = vector.broadcast %789 : vector<2x1xf32> to vector<2x256xf32>
    %792 = vector.broadcast %790 : vector<1x256xf32> to vector<2x256xf32>
    %793 = arith.mulf %791, %792 : vector<2x256xf32>
    %794 = vector.extract_strided_slice %27 {offsets = [0, 1], sizes = [2, 1], strides = [1, 1]} : vector<2x4xf32> to vector<2x1xf32>
    %795 = vector.extract_strided_slice %788 {offsets = [1, 0], sizes = [1, 256], strides = [1, 1]} : vector<4x256xf32> to vector<1x256xf32>
    %796 = vector.broadcast %794 : vector<2x1xf32> to vector<2x256xf32>
    %797 = vector.broadcast %795 : vector<1x256xf32> to vector<2x256xf32>
    %798 = arith.mulf %796, %797 : vector<2x256xf32>
    %799 = arith.addf %793, %798 : vector<2x256xf32>
    %800 = vector.extract_strided_slice %27 {offsets = [0, 2], sizes = [2, 1], strides = [1, 1]} : vector<2x4xf32> to vector<2x1xf32>
    %801 = vector.extract_strided_slice %788 {offsets = [2, 0], sizes = [1, 256], strides = [1, 1]} : vector<4x256xf32> to vector<1x256xf32>
    %802 = vector.broadcast %800 : vector<2x1xf32> to vector<2x256xf32>
    %803 = vector.broadcast %801 : vector<1x256xf32> to vector<2x256xf32>
    %804 = arith.mulf %802, %803 : vector<2x256xf32>
    %805 = arith.addf %799, %804 : vector<2x256xf32>
    %806 = vector.extract_strided_slice %27 {offsets = [0, 3], sizes = [2, 1], strides = [1, 1]} : vector<2x4xf32> to vector<2x1xf32>
    %807 = vector.extract_strided_slice %788 {offsets = [3, 0], sizes = [1, 256], strides = [1, 1]} : vector<4x256xf32> to vector<1x256xf32>
    %808 = vector.broadcast %806 : vector<2x1xf32> to vector<2x256xf32>
    %809 = vector.broadcast %807 : vector<1x256xf32> to vector<2x256xf32>
    %810 = arith.mulf %808, %809 : vector<2x256xf32>
    %811 = arith.addf %805, %810 : vector<2x256xf32>
    %812 = vector.extract_strided_slice %71 {offsets = [5, 0], sizes = [1, 256], strides = [1, 1]} : vector<9x256xf32> to vector<1x256xf32>
    %813 = vector.broadcast %812 : vector<1x256xf32> to vector<2x256xf32>
    %814 = arith.mulf %813, %811 : vector<2x256xf32>
    %815 = arith.addf %787, %814 : vector<2x256xf32>
    %c241_i32_113 = arith.constant 241 : i32
    %816 = tpu.dynamic_rotate %570 by %c241_i32_113 dim 1 : vector<4x256xf32>, i32 -> vector<4x256xf32>
    %817 = vector.extract_strided_slice %29 {offsets = [0, 0], sizes = [2, 1], strides = [1, 1]} : vector<2x4xf32> to vector<2x1xf32>
    %818 = vector.extract_strided_slice %816 {offsets = [0, 0], sizes = [1, 256], strides = [1, 1]} : vector<4x256xf32> to vector<1x256xf32>
    %819 = vector.broadcast %817 : vector<2x1xf32> to vector<2x256xf32>
    %820 = vector.broadcast %818 : vector<1x256xf32> to vector<2x256xf32>
    %821 = arith.mulf %819, %820 : vector<2x256xf32>
    %822 = vector.extract_strided_slice %29 {offsets = [0, 1], sizes = [2, 1], strides = [1, 1]} : vector<2x4xf32> to vector<2x1xf32>
    %823 = vector.extract_strided_slice %816 {offsets = [1, 0], sizes = [1, 256], strides = [1, 1]} : vector<4x256xf32> to vector<1x256xf32>
    %824 = vector.broadcast %822 : vector<2x1xf32> to vector<2x256xf32>
    %825 = vector.broadcast %823 : vector<1x256xf32> to vector<2x256xf32>
    %826 = arith.mulf %824, %825 : vector<2x256xf32>
    %827 = arith.addf %821, %826 : vector<2x256xf32>
    %828 = vector.extract_strided_slice %29 {offsets = [0, 2], sizes = [2, 1], strides = [1, 1]} : vector<2x4xf32> to vector<2x1xf32>
    %829 = vector.extract_strided_slice %816 {offsets = [2, 0], sizes = [1, 256], strides = [1, 1]} : vector<4x256xf32> to vector<1x256xf32>
    %830 = vector.broadcast %828 : vector<2x1xf32> to vector<2x256xf32>
    %831 = vector.broadcast %829 : vector<1x256xf32> to vector<2x256xf32>
    %832 = arith.mulf %830, %831 : vector<2x256xf32>
    %833 = arith.addf %827, %832 : vector<2x256xf32>
    %834 = vector.extract_strided_slice %29 {offsets = [0, 3], sizes = [2, 1], strides = [1, 1]} : vector<2x4xf32> to vector<2x1xf32>
    %835 = vector.extract_strided_slice %816 {offsets = [3, 0], sizes = [1, 256], strides = [1, 1]} : vector<4x256xf32> to vector<1x256xf32>
    %836 = vector.broadcast %834 : vector<2x1xf32> to vector<2x256xf32>
    %837 = vector.broadcast %835 : vector<1x256xf32> to vector<2x256xf32>
    %838 = arith.mulf %836, %837 : vector<2x256xf32>
    %839 = arith.addf %833, %838 : vector<2x256xf32>
    %840 = vector.extract_strided_slice %71 {offsets = [6, 0], sizes = [1, 256], strides = [1, 1]} : vector<9x256xf32> to vector<1x256xf32>
    %841 = vector.broadcast %840 : vector<1x256xf32> to vector<2x256xf32>
    %842 = arith.mulf %841, %839 : vector<2x256xf32>
    %843 = arith.addf %815, %842 : vector<2x256xf32>
    %c240_i32_114 = arith.constant 240 : i32
    %844 = tpu.dynamic_rotate %570 by %c240_i32_114 dim 1 : vector<4x256xf32>, i32 -> vector<4x256xf32>
    %845 = vector.extract_strided_slice %31 {offsets = [0, 0], sizes = [2, 1], strides = [1, 1]} : vector<2x4xf32> to vector<2x1xf32>
    %846 = vector.extract_strided_slice %844 {offsets = [0, 0], sizes = [1, 256], strides = [1, 1]} : vector<4x256xf32> to vector<1x256xf32>
    %847 = vector.broadcast %845 : vector<2x1xf32> to vector<2x256xf32>
    %848 = vector.broadcast %846 : vector<1x256xf32> to vector<2x256xf32>
    %849 = arith.mulf %847, %848 : vector<2x256xf32>
    %850 = vector.extract_strided_slice %31 {offsets = [0, 1], sizes = [2, 1], strides = [1, 1]} : vector<2x4xf32> to vector<2x1xf32>
    %851 = vector.extract_strided_slice %844 {offsets = [1, 0], sizes = [1, 256], strides = [1, 1]} : vector<4x256xf32> to vector<1x256xf32>
    %852 = vector.broadcast %850 : vector<2x1xf32> to vector<2x256xf32>
    %853 = vector.broadcast %851 : vector<1x256xf32> to vector<2x256xf32>
    %854 = arith.mulf %852, %853 : vector<2x256xf32>
    %855 = arith.addf %849, %854 : vector<2x256xf32>
    %856 = vector.extract_strided_slice %31 {offsets = [0, 2], sizes = [2, 1], strides = [1, 1]} : vector<2x4xf32> to vector<2x1xf32>
    %857 = vector.extract_strided_slice %844 {offsets = [2, 0], sizes = [1, 256], strides = [1, 1]} : vector<4x256xf32> to vector<1x256xf32>
    %858 = vector.broadcast %856 : vector<2x1xf32> to vector<2x256xf32>
    %859 = vector.broadcast %857 : vector<1x256xf32> to vector<2x256xf32>
    %860 = arith.mulf %858, %859 : vector<2x256xf32>
    %861 = arith.addf %855, %860 : vector<2x256xf32>
    %862 = vector.extract_strided_slice %31 {offsets = [0, 3], sizes = [2, 1], strides = [1, 1]} : vector<2x4xf32> to vector<2x1xf32>
    %863 = vector.extract_strided_slice %844 {offsets = [3, 0], sizes = [1, 256], strides = [1, 1]} : vector<4x256xf32> to vector<1x256xf32>
    %864 = vector.broadcast %862 : vector<2x1xf32> to vector<2x256xf32>
    %865 = vector.broadcast %863 : vector<1x256xf32> to vector<2x256xf32>
    %866 = arith.mulf %864, %865 : vector<2x256xf32>
    %867 = arith.addf %861, %866 : vector<2x256xf32>
    %868 = vector.extract_strided_slice %71 {offsets = [7, 0], sizes = [1, 256], strides = [1, 1]} : vector<9x256xf32> to vector<1x256xf32>
    %869 = vector.broadcast %868 : vector<1x256xf32> to vector<2x256xf32>
    %870 = arith.mulf %869, %867 : vector<2x256xf32>
    %871 = arith.addf %843, %870 : vector<2x256xf32>
    %c239_i32_115 = arith.constant 239 : i32
    %872 = tpu.dynamic_rotate %570 by %c239_i32_115 dim 1 : vector<4x256xf32>, i32 -> vector<4x256xf32>
    %873 = vector.extract_strided_slice %33 {offsets = [0, 0], sizes = [2, 1], strides = [1, 1]} : vector<2x4xf32> to vector<2x1xf32>
    %874 = vector.extract_strided_slice %872 {offsets = [0, 0], sizes = [1, 256], strides = [1, 1]} : vector<4x256xf32> to vector<1x256xf32>
    %875 = vector.broadcast %873 : vector<2x1xf32> to vector<2x256xf32>
    %876 = vector.broadcast %874 : vector<1x256xf32> to vector<2x256xf32>
    %877 = arith.mulf %875, %876 : vector<2x256xf32>
    %878 = vector.extract_strided_slice %33 {offsets = [0, 1], sizes = [2, 1], strides = [1, 1]} : vector<2x4xf32> to vector<2x1xf32>
    %879 = vector.extract_strided_slice %872 {offsets = [1, 0], sizes = [1, 256], strides = [1, 1]} : vector<4x256xf32> to vector<1x256xf32>
    %880 = vector.broadcast %878 : vector<2x1xf32> to vector<2x256xf32>
    %881 = vector.broadcast %879 : vector<1x256xf32> to vector<2x256xf32>
    %882 = arith.mulf %880, %881 : vector<2x256xf32>
    %883 = arith.addf %877, %882 : vector<2x256xf32>
    %884 = vector.extract_strided_slice %33 {offsets = [0, 2], sizes = [2, 1], strides = [1, 1]} : vector<2x4xf32> to vector<2x1xf32>
    %885 = vector.extract_strided_slice %872 {offsets = [2, 0], sizes = [1, 256], strides = [1, 1]} : vector<4x256xf32> to vector<1x256xf32>
    %886 = vector.broadcast %884 : vector<2x1xf32> to vector<2x256xf32>
    %887 = vector.broadcast %885 : vector<1x256xf32> to vector<2x256xf32>
    %888 = arith.mulf %886, %887 : vector<2x256xf32>
    %889 = arith.addf %883, %888 : vector<2x256xf32>
    %890 = vector.extract_strided_slice %33 {offsets = [0, 3], sizes = [2, 1], strides = [1, 1]} : vector<2x4xf32> to vector<2x1xf32>
    %891 = vector.extract_strided_slice %872 {offsets = [3, 0], sizes = [1, 256], strides = [1, 1]} : vector<4x256xf32> to vector<1x256xf32>
    %892 = vector.broadcast %890 : vector<2x1xf32> to vector<2x256xf32>
    %893 = vector.broadcast %891 : vector<1x256xf32> to vector<2x256xf32>
    %894 = arith.mulf %892, %893 : vector<2x256xf32>
    %895 = arith.addf %889, %894 : vector<2x256xf32>
    %896 = vector.extract_strided_slice %71 {offsets = [8, 0], sizes = [1, 256], strides = [1, 1]} : vector<9x256xf32> to vector<1x256xf32>
    %897 = vector.broadcast %896 : vector<1x256xf32> to vector<2x256xf32>
    %898 = arith.mulf %897, %895 : vector<2x256xf32>
    %899 = arith.addf %871, %898 : vector<2x256xf32>
    %900 = vector.broadcast %36 : vector<2x1xf32> to vector<2x256xf32>
    %901 = arith.addf %899, %900 : vector<2x256xf32>
    %cst_116 = arith.constant 0.000000e+00 : f32
    %902 = vector.broadcast %cst_116 : f32 to vector<2x256xf32>
    %903 = arith.maximumf %901, %902 : vector<2x256xf32>
    %cst_117 = arith.constant dense<0.000000e+00> : vector<2xf32>
    %904 = vector.multi_reduction <add>, %903, %cst_117 [1] : vector<2x256xf32> to vector<2xf32>
    %905 = vector.shape_cast %904 : vector<2xf32> to vector<2x1xf32>
    %cst_118 = arith.constant 3.906250e-03 : f32
    %906 = vector.broadcast %cst_118 : f32 to vector<2x1xf32>
    %907 = arith.mulf %905, %906 : vector<2x1xf32>
    %908 = vector.broadcast %907 : vector<2x1xf32> to vector<2x256xf32>
    %909 = arith.subf %903, %908 : vector<2x256xf32>
    %910 = arith.mulf %909, %909 : vector<2x256xf32>
    %cst_119 = arith.constant dense<0.000000e+00> : vector<2xf32>
    %911 = vector.multi_reduction <add>, %910, %cst_119 [1] : vector<2x256xf32> to vector<2xf32>
    %912 = vector.shape_cast %911 : vector<2xf32> to vector<2x1xf32>
    %cst_120 = arith.constant 3.906250e-03 : f32
    %913 = vector.broadcast %cst_120 : f32 to vector<2x1xf32>
    %914 = arith.mulf %912, %913 : vector<2x1xf32>
    %cst_121 = arith.constant 9.99999974E-6 : f32
    %915 = vector.broadcast %cst_121 : f32 to vector<2x1xf32>
    %916 = arith.addf %914, %915 : vector<2x1xf32>
    %917 = math.rsqrt %916 : vector<2x1xf32>
    %918 = vector.broadcast %917 : vector<2x1xf32> to vector<2x256xf32>
    %919 = arith.mulf %909, %918 : vector<2x256xf32>
    %920 = vector.broadcast %37 : vector<2x1xf32> to vector<2x256xf32>
    %921 = arith.mulf %919, %920 : vector<2x256xf32>
    %922 = vector.broadcast %38 : vector<2x1xf32> to vector<2x256xf32>
    %923 = arith.addf %921, %922 : vector<2x256xf32>
    %c17_i32_122 = arith.constant 17 : i32
    %924 = tpu.dynamic_rotate %923 by %c17_i32_122 dim 1 : vector<2x256xf32>, i32 -> vector<2x256xf32>
    %925 = vector.extract_strided_slice %41 {offsets = [0, 0], sizes = [1, 1], strides = [1, 1]} : vector<1x2xf32> to vector<1x1xf32>
    %926 = vector.extract_strided_slice %924 {offsets = [0, 0], sizes = [1, 256], strides = [1, 1]} : vector<2x256xf32> to vector<1x256xf32>
    %927 = vector.broadcast %925 : vector<1x1xf32> to vector<1x256xf32>
    %928 = arith.mulf %927, %926 : vector<1x256xf32>
    %929 = vector.extract_strided_slice %41 {offsets = [0, 1], sizes = [1, 1], strides = [1, 1]} : vector<1x2xf32> to vector<1x1xf32>
    %930 = vector.extract_strided_slice %924 {offsets = [1, 0], sizes = [1, 256], strides = [1, 1]} : vector<2x256xf32> to vector<1x256xf32>
    %931 = vector.broadcast %929 : vector<1x1xf32> to vector<1x256xf32>
    %932 = arith.mulf %931, %930 : vector<1x256xf32>
    %933 = arith.addf %928, %932 : vector<1x256xf32>
    %934 = vector.extract_strided_slice %71 {offsets = [0, 0], sizes = [1, 256], strides = [1, 1]} : vector<9x256xf32> to vector<1x256xf32>
    %935 = arith.mulf %934, %933 : vector<1x256xf32>
    %c16_i32_123 = arith.constant 16 : i32
    %936 = tpu.dynamic_rotate %923 by %c16_i32_123 dim 1 : vector<2x256xf32>, i32 -> vector<2x256xf32>
    %937 = vector.extract_strided_slice %44 {offsets = [0, 0], sizes = [1, 1], strides = [1, 1]} : vector<1x2xf32> to vector<1x1xf32>
    %938 = vector.extract_strided_slice %936 {offsets = [0, 0], sizes = [1, 256], strides = [1, 1]} : vector<2x256xf32> to vector<1x256xf32>
    %939 = vector.broadcast %937 : vector<1x1xf32> to vector<1x256xf32>
    %940 = arith.mulf %939, %938 : vector<1x256xf32>
    %941 = vector.extract_strided_slice %44 {offsets = [0, 1], sizes = [1, 1], strides = [1, 1]} : vector<1x2xf32> to vector<1x1xf32>
    %942 = vector.extract_strided_slice %936 {offsets = [1, 0], sizes = [1, 256], strides = [1, 1]} : vector<2x256xf32> to vector<1x256xf32>
    %943 = vector.broadcast %941 : vector<1x1xf32> to vector<1x256xf32>
    %944 = arith.mulf %943, %942 : vector<1x256xf32>
    %945 = arith.addf %940, %944 : vector<1x256xf32>
    %946 = vector.extract_strided_slice %71 {offsets = [1, 0], sizes = [1, 256], strides = [1, 1]} : vector<9x256xf32> to vector<1x256xf32>
    %947 = arith.mulf %946, %945 : vector<1x256xf32>
    %948 = arith.addf %935, %947 : vector<1x256xf32>
    %c15_i32_124 = arith.constant 15 : i32
    %949 = tpu.dynamic_rotate %923 by %c15_i32_124 dim 1 : vector<2x256xf32>, i32 -> vector<2x256xf32>
    %950 = vector.extract_strided_slice %47 {offsets = [0, 0], sizes = [1, 1], strides = [1, 1]} : vector<1x2xf32> to vector<1x1xf32>
    %951 = vector.extract_strided_slice %949 {offsets = [0, 0], sizes = [1, 256], strides = [1, 1]} : vector<2x256xf32> to vector<1x256xf32>
    %952 = vector.broadcast %950 : vector<1x1xf32> to vector<1x256xf32>
    %953 = arith.mulf %952, %951 : vector<1x256xf32>
    %954 = vector.extract_strided_slice %47 {offsets = [0, 1], sizes = [1, 1], strides = [1, 1]} : vector<1x2xf32> to vector<1x1xf32>
    %955 = vector.extract_strided_slice %949 {offsets = [1, 0], sizes = [1, 256], strides = [1, 1]} : vector<2x256xf32> to vector<1x256xf32>
    %956 = vector.broadcast %954 : vector<1x1xf32> to vector<1x256xf32>
    %957 = arith.mulf %956, %955 : vector<1x256xf32>
    %958 = arith.addf %953, %957 : vector<1x256xf32>
    %959 = vector.extract_strided_slice %71 {offsets = [2, 0], sizes = [1, 256], strides = [1, 1]} : vector<9x256xf32> to vector<1x256xf32>
    %960 = arith.mulf %959, %958 : vector<1x256xf32>
    %961 = arith.addf %948, %960 : vector<1x256xf32>
    %c1_i32_125 = arith.constant 1 : i32
    %962 = tpu.dynamic_rotate %923 by %c1_i32_125 dim 1 : vector<2x256xf32>, i32 -> vector<2x256xf32>
    %963 = vector.extract_strided_slice %50 {offsets = [0, 0], sizes = [1, 1], strides = [1, 1]} : vector<1x2xf32> to vector<1x1xf32>
    %964 = vector.extract_strided_slice %962 {offsets = [0, 0], sizes = [1, 256], strides = [1, 1]} : vector<2x256xf32> to vector<1x256xf32>
    %965 = vector.broadcast %963 : vector<1x1xf32> to vector<1x256xf32>
    %966 = arith.mulf %965, %964 : vector<1x256xf32>
    %967 = vector.extract_strided_slice %50 {offsets = [0, 1], sizes = [1, 1], strides = [1, 1]} : vector<1x2xf32> to vector<1x1xf32>
    %968 = vector.extract_strided_slice %962 {offsets = [1, 0], sizes = [1, 256], strides = [1, 1]} : vector<2x256xf32> to vector<1x256xf32>
    %969 = vector.broadcast %967 : vector<1x1xf32> to vector<1x256xf32>
    %970 = arith.mulf %969, %968 : vector<1x256xf32>
    %971 = arith.addf %966, %970 : vector<1x256xf32>
    %972 = vector.extract_strided_slice %71 {offsets = [3, 0], sizes = [1, 256], strides = [1, 1]} : vector<9x256xf32> to vector<1x256xf32>
    %973 = arith.mulf %972, %971 : vector<1x256xf32>
    %974 = arith.addf %961, %973 : vector<1x256xf32>
    %975 = vector.extract_strided_slice %53 {offsets = [0, 0], sizes = [1, 1], strides = [1, 1]} : vector<1x2xf32> to vector<1x1xf32>
    %976 = vector.extract_strided_slice %923 {offsets = [0, 0], sizes = [1, 256], strides = [1, 1]} : vector<2x256xf32> to vector<1x256xf32>
    %977 = vector.broadcast %975 : vector<1x1xf32> to vector<1x256xf32>
    %978 = arith.mulf %977, %976 : vector<1x256xf32>
    %979 = vector.extract_strided_slice %53 {offsets = [0, 1], sizes = [1, 1], strides = [1, 1]} : vector<1x2xf32> to vector<1x1xf32>
    %980 = vector.extract_strided_slice %923 {offsets = [1, 0], sizes = [1, 256], strides = [1, 1]} : vector<2x256xf32> to vector<1x256xf32>
    %981 = vector.broadcast %979 : vector<1x1xf32> to vector<1x256xf32>
    %982 = arith.mulf %981, %980 : vector<1x256xf32>
    %983 = arith.addf %978, %982 : vector<1x256xf32>
    %984 = arith.addf %974, %983 : vector<1x256xf32>
    %c255_i32_126 = arith.constant 255 : i32
    %985 = tpu.dynamic_rotate %923 by %c255_i32_126 dim 1 : vector<2x256xf32>, i32 -> vector<2x256xf32>
    %986 = vector.extract_strided_slice %56 {offsets = [0, 0], sizes = [1, 1], strides = [1, 1]} : vector<1x2xf32> to vector<1x1xf32>
    %987 = vector.extract_strided_slice %985 {offsets = [0, 0], sizes = [1, 256], strides = [1, 1]} : vector<2x256xf32> to vector<1x256xf32>
    %988 = vector.broadcast %986 : vector<1x1xf32> to vector<1x256xf32>
    %989 = arith.mulf %988, %987 : vector<1x256xf32>
    %990 = vector.extract_strided_slice %56 {offsets = [0, 1], sizes = [1, 1], strides = [1, 1]} : vector<1x2xf32> to vector<1x1xf32>
    %991 = vector.extract_strided_slice %985 {offsets = [1, 0], sizes = [1, 256], strides = [1, 1]} : vector<2x256xf32> to vector<1x256xf32>
    %992 = vector.broadcast %990 : vector<1x1xf32> to vector<1x256xf32>
    %993 = arith.mulf %992, %991 : vector<1x256xf32>
    %994 = arith.addf %989, %993 : vector<1x256xf32>
    %995 = vector.extract_strided_slice %71 {offsets = [5, 0], sizes = [1, 256], strides = [1, 1]} : vector<9x256xf32> to vector<1x256xf32>
    %996 = arith.mulf %995, %994 : vector<1x256xf32>
    %997 = arith.addf %984, %996 : vector<1x256xf32>
    %c241_i32_127 = arith.constant 241 : i32
    %998 = tpu.dynamic_rotate %923 by %c241_i32_127 dim 1 : vector<2x256xf32>, i32 -> vector<2x256xf32>
    %999 = vector.extract_strided_slice %59 {offsets = [0, 0], sizes = [1, 1], strides = [1, 1]} : vector<1x2xf32> to vector<1x1xf32>
    %1000 = vector.extract_strided_slice %998 {offsets = [0, 0], sizes = [1, 256], strides = [1, 1]} : vector<2x256xf32> to vector<1x256xf32>
    %1001 = vector.broadcast %999 : vector<1x1xf32> to vector<1x256xf32>
    %1002 = arith.mulf %1001, %1000 : vector<1x256xf32>
    %1003 = vector.extract_strided_slice %59 {offsets = [0, 1], sizes = [1, 1], strides = [1, 1]} : vector<1x2xf32> to vector<1x1xf32>
    %1004 = vector.extract_strided_slice %998 {offsets = [1, 0], sizes = [1, 256], strides = [1, 1]} : vector<2x256xf32> to vector<1x256xf32>
    %1005 = vector.broadcast %1003 : vector<1x1xf32> to vector<1x256xf32>
    %1006 = arith.mulf %1005, %1004 : vector<1x256xf32>
    %1007 = arith.addf %1002, %1006 : vector<1x256xf32>
    %1008 = vector.extract_strided_slice %71 {offsets = [6, 0], sizes = [1, 256], strides = [1, 1]} : vector<9x256xf32> to vector<1x256xf32>
    %1009 = arith.mulf %1008, %1007 : vector<1x256xf32>
    %1010 = arith.addf %997, %1009 : vector<1x256xf32>
    %c240_i32_128 = arith.constant 240 : i32
    %1011 = tpu.dynamic_rotate %923 by %c240_i32_128 dim 1 : vector<2x256xf32>, i32 -> vector<2x256xf32>
    %1012 = vector.extract_strided_slice %62 {offsets = [0, 0], sizes = [1, 1], strides = [1, 1]} : vector<1x2xf32> to vector<1x1xf32>
    %1013 = vector.extract_strided_slice %1011 {offsets = [0, 0], sizes = [1, 256], strides = [1, 1]} : vector<2x256xf32> to vector<1x256xf32>
    %1014 = vector.broadcast %1012 : vector<1x1xf32> to vector<1x256xf32>
    %1015 = arith.mulf %1014, %1013 : vector<1x256xf32>
    %1016 = vector.extract_strided_slice %62 {offsets = [0, 1], sizes = [1, 1], strides = [1, 1]} : vector<1x2xf32> to vector<1x1xf32>
    %1017 = vector.extract_strided_slice %1011 {offsets = [1, 0], sizes = [1, 256], strides = [1, 1]} : vector<2x256xf32> to vector<1x256xf32>
    %1018 = vector.broadcast %1016 : vector<1x1xf32> to vector<1x256xf32>
    %1019 = arith.mulf %1018, %1017 : vector<1x256xf32>
    %1020 = arith.addf %1015, %1019 : vector<1x256xf32>
    %1021 = vector.extract_strided_slice %71 {offsets = [7, 0], sizes = [1, 256], strides = [1, 1]} : vector<9x256xf32> to vector<1x256xf32>
    %1022 = arith.mulf %1021, %1020 : vector<1x256xf32>
    %1023 = arith.addf %1010, %1022 : vector<1x256xf32>
    %c239_i32_129 = arith.constant 239 : i32
    %1024 = tpu.dynamic_rotate %923 by %c239_i32_129 dim 1 : vector<2x256xf32>, i32 -> vector<2x256xf32>
    %1025 = vector.extract_strided_slice %65 {offsets = [0, 0], sizes = [1, 1], strides = [1, 1]} : vector<1x2xf32> to vector<1x1xf32>
    %1026 = vector.extract_strided_slice %1024 {offsets = [0, 0], sizes = [1, 256], strides = [1, 1]} : vector<2x256xf32> to vector<1x256xf32>
    %1027 = vector.broadcast %1025 : vector<1x1xf32> to vector<1x256xf32>
    %1028 = arith.mulf %1027, %1026 : vector<1x256xf32>
    %1029 = vector.extract_strided_slice %65 {offsets = [0, 1], sizes = [1, 1], strides = [1, 1]} : vector<1x2xf32> to vector<1x1xf32>
    %1030 = vector.extract_strided_slice %1024 {offsets = [1, 0], sizes = [1, 256], strides = [1, 1]} : vector<2x256xf32> to vector<1x256xf32>
    %1031 = vector.broadcast %1029 : vector<1x1xf32> to vector<1x256xf32>
    %1032 = arith.mulf %1031, %1030 : vector<1x256xf32>
    %1033 = arith.addf %1028, %1032 : vector<1x256xf32>
    %1034 = vector.extract_strided_slice %71 {offsets = [8, 0], sizes = [1, 256], strides = [1, 1]} : vector<9x256xf32> to vector<1x256xf32>
    %1035 = arith.mulf %1034, %1033 : vector<1x256xf32>
    %1036 = arith.addf %1023, %1035 : vector<1x256xf32>
    %1037 = vector.broadcast %68 : vector<1x1xf32> to vector<1x256xf32>
    %1038 = arith.addf %1036, %1037 : vector<1x256xf32>
    %cst_130 = arith.constant 0.000000e+00 : f32
    %1039 = vector.broadcast %cst_130 : f32 to vector<1x256xf32>
    %1040 = arith.maximumf %1038, %1039 : vector<1x256xf32>
    %cst_131 = arith.constant dense<0.000000e+00> : vector<1xf32>
    %1041 = vector.multi_reduction <add>, %1040, %cst_131 [1] : vector<1x256xf32> to vector<1xf32>
    %1042 = vector.shape_cast %1041 : vector<1xf32> to vector<1x1xf32>
    %cst_132 = arith.constant 3.906250e-03 : f32
    %1043 = vector.broadcast %cst_132 : f32 to vector<1x1xf32>
    %1044 = arith.mulf %1042, %1043 : vector<1x1xf32>
    %1045 = vector.broadcast %1044 : vector<1x1xf32> to vector<1x256xf32>
    %1046 = arith.subf %1040, %1045 : vector<1x256xf32>
    %1047 = arith.mulf %1046, %1046 : vector<1x256xf32>
    %cst_133 = arith.constant dense<0.000000e+00> : vector<1xf32>
    %1048 = vector.multi_reduction <add>, %1047, %cst_133 [1] : vector<1x256xf32> to vector<1xf32>
    %1049 = vector.shape_cast %1048 : vector<1xf32> to vector<1x1xf32>
    %cst_134 = arith.constant 3.906250e-03 : f32
    %1050 = vector.broadcast %cst_134 : f32 to vector<1x1xf32>
    %1051 = arith.mulf %1049, %1050 : vector<1x1xf32>
    %cst_135 = arith.constant 9.99999974E-6 : f32
    %1052 = vector.broadcast %cst_135 : f32 to vector<1x1xf32>
    %1053 = arith.addf %1051, %1052 : vector<1x1xf32>
    %1054 = math.rsqrt %1053 : vector<1x1xf32>
    %1055 = vector.broadcast %1054 : vector<1x1xf32> to vector<1x256xf32>
    %1056 = arith.mulf %1046, %1055 : vector<1x256xf32>
    %1057 = vector.broadcast %69 : vector<1x1xf32> to vector<1x256xf32>
    %1058 = arith.mulf %1056, %1057 : vector<1x256xf32>
    %1059 = vector.broadcast %70 : vector<1x1xf32> to vector<1x256xf32>
    %1060 = arith.addf %1058, %1059 : vector<1x256xf32>
    %1061 = vector.broadcast %1060 : vector<1x256xf32> to vector<8x256xf32>
    %1062 = arith.mulf %652, %1061 : vector<8x256xf32>
    %c1_136 = arith.constant 1 : index
    %c0_137 = arith.constant 0 : index
    %c0_138 = arith.constant 0 : index
    %1063 = vector.load %arg7[%c1_136, %c0_137, %c0_138] : memref<2x8x256xf32, #tpu.memory_space<vmem>>, vector<1x8x256xf32>
    %1064 = vector.shape_cast %1063 : vector<1x8x256xf32> to vector<8x256xf32>
    %1065 = vector.shape_cast %1062 : vector<8x256xf32> to vector<1x8x256xf32>
    tpu.vector_store %arg7[%c1_136, %c0_137, %c0_138], %1065 {strides = array<i32>} : memref<2x8x256xf32, #tpu.memory_space<vmem>>, vector<1x8x256xf32>,
    return
  }
  func.func @transform_0(%arg0: i32) -> (i32, i32, i32) {
    %c0_i32 = arith.constant 0 : i32
    %c0_i32_0 = arith.constant 0 : i32
    %c0_i32_1 = arith.constant 0 : i32
    return %arg0, %c0_i32, %c0_i32_0 : i32, i32, i32
  }
  func.func @transform_1(%arg0: i32) -> (i32, i32) {
    %c0_i32 = arith.constant 0 : i32
    %c0_i32_0 = arith.constant 0 : i32
    %c0_i32_1 = arith.constant 0 : i32
    return %c0_i32, %c0_i32_0 : i32, i32
  }
  func.func @transform_2(%arg0: i32) -> (i32, i32, i32) {
    %c0_i32 = arith.constant 0 : i32
    %c0_i32_0 = arith.constant 0 : i32
    %c0_i32_1 = arith.constant 0 : i32
    %c0_i32_2 = arith.constant 0 : i32
    return %c0_i32, %c0_i32_0, %c0_i32_1 : i32, i32, i32
  }
  func.func @transform_3(%arg0: i32) -> (i32, i32, i32) {
    %c0_i32 = arith.constant 0 : i32
    %c0_i32_0 = arith.constant 0 : i32
    %c0_i32_1 = arith.constant 0 : i32
    %c0_i32_2 = arith.constant 0 : i32
    return %c0_i32, %c0_i32_0, %c0_i32_1 : i32, i32, i32
  }
  func.func @transform_4(%arg0: i32) -> (i32, i32, i32) {
    %c0_i32 = arith.constant 0 : i32
    %c0_i32_0 = arith.constant 0 : i32
    %c0_i32_1 = arith.constant 0 : i32
    %c0_i32_2 = arith.constant 0 : i32
    return %c0_i32, %c0_i32_0, %c0_i32_1 : i32, i32, i32
  }
  func.func @transform_5(%arg0: i32) -> (i32, i32, i32) {
    %c0_i32 = arith.constant 0 : i32
    %c0_i32_0 = arith.constant 0 : i32
    %c0_i32_1 = arith.constant 0 : i32
    %c0_i32_2 = arith.constant 0 : i32
    return %c0_i32, %c0_i32_0, %c0_i32_1 : i32, i32, i32
  }
  func.func @transform_6(%arg0: i32) -> (i32, i32, i32) {
    %c0_i32 = arith.constant 0 : i32
    %c0_i32_0 = arith.constant 0 : i32
    %c0_i32_1 = arith.constant 0 : i32
    return %arg0, %c0_i32, %c0_i32_0 : i32, i32, i32
  }
}

</mosaic_0001>

<bundles_post_ra>
// kernel: gala_attention_forward.1
= control target key start
LH: loop header
LB: loop body
LE: loop exit
PB: predicated region body
PF: predicated region fallthrough
CT: control target
= control target key end

     0   :  { %v4312_v0 = vmov 2   ;;  %v4314_v1 = vmov 0   ;;  %v4308_v4 = vmov 3   ;;  %s2484_s25 = smov 17   ;;  %s2485_s30 = smov 16   ;;  %v4306_v9 = vmov 1   ;;  %s4297_s2 = inlined_call_operand.vmem [shape: f32[2,8,4], index: 2, kind: input, shape index: {}]   ;;  %s4298_s0 = inlined_call_operand.vmem [shape: f32[2,4,256], index: 0, kind: input, shape index: {}]   ;;  %s4299_s3 = inlined_call_operand.vmem [shape: f32[2,8,3], index: 3, kind: input, shape index: {}]   ;;  %s4300_s4 = inlined_call_operand.vmem [shape: f32[18,2,4], index: 4, kind: input, shape index: {}]   ;;  %s4301_s5 = inlined_call_operand.vmem [shape: f32[2,2,3], index: 5, kind: input, shape index: {}]   ;;  %s4302_s1 = inlined_call_operand.vmem [shape: f32[9,256], index: 1, kind: input, shape index: {}]   ;;  %s4303_s6 = inlined_call_operand.vmem [shape: f32[2,8,256], index: 6, kind: output, shape index: {}]  }
   0x1   :  { %2409 = vset.pattern.permute.xlu1 %v4312_v0  ;;  %2408 = vset.pattern.permute.xlu0 %v4314_v1  ;;  %v23_v2 = vld [vmem:[%s4297_s2] sm:$0xff]  ;;  %v2544_v5 = vld [vmem:[%s4298_s0 + $0x8] sm:$0xff]  ;;  %s2489_s15 = smov 127   ;;  %v4305_v30 = vlaneseq  ;;  %vm185_vm0 = vcmask 1041408   ;;  %s2490_s29 = smov 113   ;;  %vm1368_vm9 = vcmask 1040384  }
   0x2   :  { %125 = vperm.xlu1 %2409, %v23_v2   ;;  %74 = vperm.xlu0 %2408, %v23_v2   ;;  %v2536_v3 = vld [vmem:[%s4298_s0] sm:$0xff]  ;;  %s2486_s0 = smov 15   ;;  %v2560_v7 = vcombine.high %v2544_v5, %v2544_v5  ;;  %v2565_v8 = vld [vmem:[%s4297_s2 + $0x8] sm:$0xff]  ;;  %s2488_s2 = smov 1  }
   0x3   :  { %v24_v6 = vld [vmem:[%s4299_s3] sm:$0xff]  ;;  %v2573_v10 = vcombine.high %v2536_v3, %v2536_v3  ;;  %v2374_v11 = vld [vmem:[%s4299_s3 + $0x8] sm:$0xff]  ;;  %v2694_v33 = vshrl.u32 %v4305_v30, 7  ;;  %s2491_s9 = smov 112   ;;  %s2492_s10 = smov 111  }
   0x4   :  { %v2584_v12 = vld [vmem:[%s4300_s4 + $0x8] sm:$0x3]  ;;  %v29_v13 = vld [vmem:[%s4300_s4] sm:$0x3]  ;;  %v2596_v14 = vld [vmem:[%s4300_s4 + $0xc] sm:$0x3] }
   0x5   :  { %v2375_v15 = vld [vmem:[%s4300_s4 + $0x2] sm:$0x3]  ;;  %v2608_v16 = vld [vmem:[%s4300_s4 + $0xa] sm:$0x3]  ;;  %v2616_v17 = vld [vmem:[%s4300_s4 + $0x4] sm:$0x3] }
   0x6   :  { %2410 = vset.pattern.permute.xlu1 %v4308_v4  ;;  %288 = vrot.lane.b32.xlu0 %v2536_v3, %s2484_s25  ;;  %v2636_v18 = vld [vmem:[%s4300_s4 + $0x6] sm:$0x3]  ;;  %v2702_v36 = vsub.s32 0, %v2694_v33  ;;  %v4304_v37 = vsub.s32 4, %v2694_v33  ;;  %v2706_v38 = vsub.s32 1, %v2694_v33  ;;  %v2711_v39 = vsub.s32 5, %v2694_v33 }
   0x7   :  { %151 = vperm.xlu1 %2410, %v23_v2   ;;  %2428 = vset.pattern.permute.xlu0 %v4312_v0  ;;  %v2716_v41 = vsub.s32 2, %v2694_v33  ;;  %v2719_v42 = vsub.s32 3, %v2694_v33  ;;  %v2722_v43 = vsub.s32 6, %v2694_v33  ;;  %v2725_v44 = vsub.s32 7, %v2694_v33  ;;  %v2744_v51 = vld [vmem:[%s4300_s4 + $0xe] sm:$0x3] }
   0x8   :  { %v81_v45 = vrot.slane %v2536_v3, %v2702_v36  ;;  %v85_v46 = vrot.slane %v2536_v3, %v4304_v37  ;;  %v105_v48 = vrot.slane %v2536_v3, %v2706_v38  ;;  %v109_v49 = vrot.slane %v2536_v3, %v2711_v39 }
   0x9   :  { %4372 = vst [vmem:[#allocation7_spill] sm:$0xff] %v2725_v44  ;;  %v131_v52 = vrot.slane %v2536_v3, %v2716_v41  ;;  %v135_v53 = vrot.slane %v2536_v3, %v2722_v43  ;;  %v157_v54 = vrot.slane %v2536_v3, %v2719_v42  ;;  %v161_v55 = vrot.slane %v2536_v3, %v2725_v44 }
   0xa   :  { %1578 = vrot.lane.b32.xlu0 %v2544_v5, %s2484_s25  ;;  %v2755_v56 = vrot.slane %v81_v45, %v2702_v36  ;;  %v2758_v57 = vrot.slane %v85_v46, %v2702_v36  ;;  %v2762_v58 = vrot.slane %v105_v48, %v2706_v38  ;;  %v2765_v59 = vrot.slane %v109_v49, %v2706_v38 }
   0xb   :  { %2411 = vset.pattern.permute.xlu1 %v4314_v1  ;;  %v2771_v61 = vrot.slane %v131_v52, %v2716_v41  ;;  %v2774_v62 = vrot.slane %v135_v53, %v2716_v41  ;;  %v2777_v63 = vrot.slane %v157_v54, %v2719_v42 }
   0xc   :  { %178 = vperm.xlu1 %2411, %v24_v6   ;;  %4374 = vst [vmem:[#allocation9_spill] sm:$0xff] %v2755_v56  ;;  %4375 = vst [vmem:[#allocation10_spill] sm:$0xff] %v2758_v57 }
   0xd   :  { %4376 = vst [vmem:[#allocation11_spill] sm:$0xff] %v2762_v58  ;;  %4377 = vst [vmem:[#allocation12_spill] sm:$0xff] %v2765_v59 }
   0xe   :  { %1632 = vrot.lane.b32.xlu0 %v2544_v5, %s2485_s30  ;;  %4378 = vst [vmem:[#allocation13_spill] sm:$0xff] %v2777_v63 }
  0x10   :  { %2412 = vset.pattern.permute.xlu1 %v4312_v0 }
  0x11   :  { %213 = vperm.xlu1 %2412, %v24_v6  }
  0x12   :  { %452 = vrot.lane.b32.xlu0 %v2536_v3, %s2486_s0 }
  0x15   :  { %2413 = vset.pattern.permute.xlu1 %v4306_v9 }
  0x16   :  { %234 = vperm.xlu1 %2413, %v2565_v8   ;;  %1690 = vrot.lane.b32.xlu0 %v2560_v7, %s2486_s0 }
  0x1a   :  { %2414 = vset.pattern.permute.xlu1 %v4314_v1  ;;  %536 = vrot.lane.b32.xlu0 %v2573_v10, %s2488_s2 }
  0x1b   :  { %251 = vperm.xlu1 %2414, %v2374_v11  }
  0x1e   :  { %632 = vperm.xlu0 %2428, %v2584_v12  }
  0x1f   :  { %299 = vperm.xlu1 %2414, %v29_v13  }
  0x22   :  { %651 = vrot.lane.b32.xlu0 %v2573_v10, %s2489_s15 }
  0x23   :  { %2415 = vset.pattern.permute.xlu1 %v4306_v9 }
  0x24   :  { %313 = vperm.xlu1 %2415, %v29_v13  }
  0x26   :  { %770 = vperm.xlu0 %2428, %v2596_v14  }
  0x28   :  { %2416 = vset.pattern.permute.xlu1 %v4314_v1 }
  0x29   :  { %379 = vperm.xlu1 %2416, %v2375_v15  }
  0x2a   :  { %2432 = vset.pattern.permute.xlu0 %v4306_v9 }
  0x2b   :  { %99 = vperm.xlu0 %2432, %v23_v2   ;;  %v2780_v2 = vrot.slane %v161_v55, %v2719_v42 }
  0x2d   :  { %2417 = vset.pattern.permute.xlu1 %v4306_v9  ;;  %4379 = vst [vmem:[#allocation14_spill] sm:$0xff] %v2780_v2 }
  0x2e   :  { %393 = vperm.xlu1 %2417, %v2375_v15  }
  0x2f   :  { %207 = vperm.xlu0 %2432, %v24_v6  }
  0x32   :  { %2418 = vset.pattern.permute.xlu1 %v4312_v0 }
  0x33   :  { %329 = vperm.xlu1 %2418, %v29_v13   ;;  %672 = vperm.xlu0 %2432, %v2608_v16  }
  0x37   :  { %409 = vperm.xlu1 %2418, %v2375_v15   ;;  %754 = vperm.xlu0 %2432, %v2596_v14  }
  0x3b   :  { %2419 = vset.pattern.permute.xlu1 %v4314_v1  ;;  %1816 = vrot.lane.b32.xlu0 %v2544_v5, %s2489_s15 }
  0x3c   :  { %461 = vperm.xlu1 %2419, %v2616_v17  }
  0x40   :  { %2420 = vset.pattern.permute.xlu1 %v4306_v9 }
  0x41   :  { %475 = vperm.xlu1 %2420, %v2616_v17  }
  0x45   :  { %290 = vrot.lane.b32.xlu1 %v2573_v10, %s2484_s25 }
  0x46   :  { %2421 = vset.pattern.permute.xlu1 %v4308_v4 }
  0x49   :  { %345 = vperm.xlu1 %2421, %v29_v13  }
  0x4d   :  { %370 = vrot.lane.b32.xlu1 %v2536_v3, %s2485_s30 }
  0x51   :  { %372 = vrot.lane.b32.xlu1 %v2573_v10, %s2485_s30 }
  0x55   :  { %425 = vperm.xlu1 %2421, %v2375_v15  }
  0x59   :  { %2422 = vset.pattern.permute.xlu1 %v4312_v0 }
  0x5a   :  { %491 = vperm.xlu1 %2422, %v2616_v17  }
  0x5e   :  { %2423 = vset.pattern.permute.xlu1 %v4306_v9 }
  0x5f   :  { %557 = vperm.xlu1 %2423, %v2636_v18  }
  0x63   :  { %1580 = vrot.lane.b32.xlu1 %v2560_v7, %s2484_s25 }
  0x64   :  { %2424 = vset.pattern.permute.xlu1 %v4312_v0 }
  0x67   :  { %1634 = vrot.lane.b32.xlu1 %v2560_v7, %s2485_s30 }
  0x6b   :  { %454 = vrot.lane.b32.xlu1 %v2573_v10, %s2486_s0 }
  0x6f   :  { %573 = vperm.xlu1 %2424, %v2636_v18  }
  0x73   :  { %1688 = vrot.lane.b32.xlu1 %v2544_v5, %s2486_s0 }
  0x74   :  { %2425 = vset.pattern.permute.xlu1 %v4308_v4 }
  0x77   :  { %534 = vrot.lane.b32.xlu1 %v2536_v3, %s2488_s2 }
  0x7b   :  { %589 = vperm.xlu1 %2425, %v2636_v18  }
  0x7f   :  { %2426 = vset.pattern.permute.xlu1 %v4306_v9 }
  0x80   :  { %624 = vperm.xlu1 %2426, %v2584_v12  }
  0x81   :  { %v2656_v19 = vpop.permute.xlu0 %74  ;;  %v2658_v20 = vpop.permute.xlu1 %125 }
  0x82   :  { %v96_v11 = vmul.f32 %v2755_v56, %v2656_v19  ;;  %v97_v13 = vmul.f32 %v2758_v57, %v2656_v19  ;;  %v146_v45 = vmul.f32 %v2771_v61, %v2658_v20  ;;  %v147_v46 = vmul.f32 %v2774_v62, %v2658_v20 }
  0x83   :  { %v1483_v57 = vrot.slane %v2544_v5, %v2719_v42  ;;  %v1487_v56 = vrot.slane %v2544_v5, %v2725_v44 }
  0x84   :  { %2427 = vset.pattern.permute.xlu1 %v4314_v1 }
  0x85   :  { %v2661_v21 = vpop.permute.xlu0 %288  ;;  %658 = vperm.xlu1 %2427, %v2608_v16  }
  0x86   :  { %v2664_v22 = vpop.permute.xlu1 %151 }
  0x87   :  { %v172_v53 = vmul.f32 %v2777_v63, %v2664_v22  ;;  %v173_v54 = vmul.f32 %v2780_v2, %v2664_v22 }
  0x89   :  { %v2666_v23 = vpop.permute.xlu0 %1578  ;;  %1744 = vrot.lane.b32.xlu1 %v2544_v5, %s2488_s2 }
  0x8a   :  { %2429 = vset.pattern.permute.xlu1 %v4312_v0 }
  0x8b   :  { %v2671_v24 = vpop.permute.xlu1 %178 }
  0x8c   :  { %4367 = vst [vmem:[#allocation2_spill] sm:$0xff] %v2671_v24 }
  0x8d   :  { %v2673_v25 = vpop.permute.xlu0 %1632  ;;  %1746 = vrot.lane.b32.xlu1 %v2560_v7, %s2488_s2 }
  0x90   :  { %v2677_v26 = vpop.permute.xlu1 %213 }
  0x91   :  { %4368 = vst [vmem:[#allocation3_spill] sm:$0xff] %v2677_v26  ;;  %v2679_v27 = vpop.permute.xlu0 %452  ;;  %688 = vperm.xlu1 %2429, %v2608_v16   ;;  %v4393_v26 = vlaneseq }
  0x95   :  { %v2682_v28 = vpop.permute.xlu0 %1690  ;;  %2430 = vset.pattern.permute.xlu1 %v4314_v1  ;;  %v2685_v29 = vpop.permute.xlu1 %234 }
  0x96   :  { %4369 = vst [vmem:[#allocation4_spill] sm:$0xff] %v2685_v29  ;;  %740 = vperm.xlu1 %2430, %v2596_v14   ;;  %v4391_v29 = vmov 2  }
  0x99   :  { %v2688_v31 = vpop.permute.xlu0 %536 }
  0x9a   :  { %2431 = vset.pattern.permute.xlu1 %v4308_v4  ;;  %v2691_v32 = vpop.permute.xlu1 %251 }
  0x9b   :  { %4370 = vst [vmem:[#allocation5_spill] sm:$0xff] %v2691_v32  ;;  %640 = vperm.xlu1 %2431, %v2584_v12  }
  0x9d   :  { %v2697_v34 = vpop.permute.xlu0 %632 }
  0x9e   :  { %v2699_v35 = vpop.permute.xlu1 %299 }
  0x9f   :  { %649 = vrot.lane.b32.xlu1 %v2536_v3, %s2489_s15 }
  0xa1   :  { %v2713_v40 = vpop.permute.xlu0 %651 }
  0xa2   :  { %4371 = vst [vmem:[#allocation6_spill] sm:$0xff] %v2713_v40 }
  0xa3   :  { %704 = vperm.xlu1 %2431, %v2608_v16   ;;  %v2733_v47 = vpop.permute.xlu1 %313 }
  0xa5   :  { %v2739_v50 = vpop.permute.xlu0 %770 }
  0xa6   :  { %4373 = vst [vmem:[#allocation8_spill] sm:$0xff] %v2739_v50 }
  0xa7   :  { %2433 = vset.pattern.permute.xlu1 %v4314_v1 }
  0xa8   :  { %822 = vperm.xlu1 %2433, %v2744_v51   ;;  %v2768_v60 = vpop.permute.xlu1 %379 }
  0xaa   :  { %v2782_v6 = vpop.permute.xlu0 %99 }
  0xab   :  { %v120_v15 = vmul.f32 %v2762_v58, %v2782_v6  ;;  %v121_v16 = vmul.f32 %v2765_v59, %v2782_v6 }
  0xac   :  { %2434 = vset.pattern.permute.xlu1 %v4306_v9 }
  0xad   :  { %v122_v48 = vadd.f32 %v120_v15, %v96_v11  ;;  %v123_v49 = vadd.f32 %v121_v16, %v97_v13  ;;  %836 = vperm.xlu1 %2434, %v2744_v51   ;;  %v2798_v52 = vpop.permute.xlu1 %393 }
  0xaf   :  { %v148_v55 = vadd.f32 %v146_v45, %v122_v48  ;;  %v149_v37 = vadd.f32 %v147_v46, %v123_v49  ;;  %v2382_v48 = vld [vmem:[%s4300_s4 + $0x10] sm:$0x3] }
  0xb1   :  { %1818 = vrot.lane.b32.xlu1 %v2560_v7, %s2489_s15  ;;  %v174_v30 = vadd.f32 %v172_v53, %v148_v55  ;;  %v175_v9 = vadd.f32 %v173_v54, %v149_v37 }
  0xb2   :  { %v2806_v4 = vpop.permute.xlu1 %329  ;;  %2435 = vset.pattern.permute.xlu1 %v4312_v0 }
  0xb3   :  { %v2810_v11 = vadd.f32 %v2671_v24, %v174_v30  ;;  %v2813_v13 = vadd.f32 %v2671_v24, %v175_v9  ;;  %v1419_v24 = vrot.slane %v2544_v5, %v2702_v36 }
  0xb5   :  { %4380 = vst [vmem:[#allocation15_spill] sm:$0xff] %v2810_v11  ;;  %4381 = vst [vmem:[#allocation16_spill] sm:$0xff] %v2813_v13  ;;  %733 = vrot.lane.b32.xlu1 %v2573_v10, %s2490_s29  ;;  %v4311_v15 = vmax.f32 %v2810_v11, 0.0  ;;  %v4310_v16 = vmax.f32 %v2813_v13, 0.0  ;;  %v1461_v13 = vrot.slane %v2544_v5, %v2716_v41  ;;  %v2936_v63 = vrot.slane %v1419_v24, %v2702_v36 }
  0xb6   :  { %v2819_v37 = vpop.permute.xlu1 %409 }
  0xb7   :  { %v186_v45 = vsel %vm185_vm0, %v4311_v15, 0.0  ;;  %v187_v9 = vsel %vm185_vm0, %v4310_v16, 0.0  ;;  %4398 = vst [vmem:[#allocation27_spill] sm:$0xff] %v2936_v63 }
  0xb8   :  { %v188_v30 = vadd.f32 %v187_v9, %v186_v45  ;;  %v4382_v9 = vmov 3  }
  0xb9   :  { %852 = vperm.xlu1 %2435, %v2744_v51  }
  0xba   :  { %189 = vadd.xlane.f32.xlu0 %v188_v30 }
  0xbb   :  { %v2828_v46 = vpop.permute.xlu1 %461 }
  0xbd   :  { %2436 = vset.pattern.permute.xlu1 %v4314_v1 }
  0xbe   :  { %904 = vperm.xlu1 %2436, %v2382_v48  }
  0xc0   :  { %v2834_v49 = vpop.permute.xlu1 %475 }
  0xc2   :  { %1872 = vrot.lane.b32.xlu1 %v2544_v5, %s2490_s29 }
  0xc3   :  { %2439 = vset.pattern.permute.xlu1 %v4312_v0  ;;  %v4384_v0 = vmov 1  }
  0xc4   :  { %v2839_v53 = vpop.permute.xlu1 %290 }
  0xc6   :  { %1874 = vrot.lane.b32.xlu1 %v2560_v7, %s2490_s29 }
  0xc8   :  { %v2843_v54 = vpop.permute.xlu1 %345 }
  0xca   :  { %815 = vrot.lane.b32.xlu1 %v2573_v10, %s2491_s9 }
  0xcc   :  { %v2847_v55 = vpop.permute.xlu1 %370 }
  0xce   :  { %934 = vperm.xlu1 %2439, %v2382_v48  }
  0xd0   :  { %v2849_v45 = vpop.permute.xlu1 %372  ;;  %731 = vrot.lane.b32.xlu0 %v2536_v3, %s2490_s29 }
  0xd2   :  { %1928 = vrot.lane.b32.xlu1 %v2544_v5, %s2491_s9 }
  0xd3   :  { %2440 = vset.pattern.permute.xlu1 %v4382_v9 }
  0xd4   :  { %918 = vperm.xlu0 %2432, %v2382_v48   ;;  %v2856_v30 = vpop.permute.xlu1 %425 }
  0xd6   :  { %895 = vrot.lane.b32.xlu1 %v2536_v3, %s2492_s10 }
  0xd8   :  { %2437 = vset.pattern.permute.xlu0 %v4382_v9  ;;  %v4385_v9 = vmov 0  }
  0xd9   :  { %507 = vperm.xlu0 %2437, %v2616_v17   ;;  %v2862_v16 = vpop.permute.xlu1 %491 }
  0xda   :  { %950 = vperm.xlu1 %2440, %v2382_v48  }
  0xdd   :  { %786 = vperm.xlu0 %2437, %v2596_v14  }
  0xde   :  { %v2865_v15 = vpop.permute.xlu1 %557  ;;  %1986 = vrot.lane.b32.xlu1 %v2560_v7, %s2492_s10 }
  0xdf   :  { %4383 = vst [vmem:[#allocation17_spill] sm:$0xff] %v2865_v15  ;;  %2442 = vset.pattern.permute.xlu1 %v4384_v0  ;;  %v1439_v0 = vrot.slane %v2544_v5, %v2706_v38  ;;  %v3025_v15 = vmul.f32 %v2697_v34, %v2774_v62 }
  0xe1   :  { %813 = vrot.lane.b32.xlu0 %v2536_v3, %s2491_s9  ;;  %v2930_v50 = vrot.slane %v1439_v0, %v2706_v38  ;;  %v2949_v0 = vld [vmem:[%s4302_s1 + $0x8] sm:$0xff]  ;;  %4405 = vst [vmem:[#allocation34_spill] sm:$0xff] %v3025_v15 }
  0xe2   :  { %v2872_v1 = vpop.permute.xlu1 %1580  ;;  %v2974_v59 = vrot.slane %v2949_v0, %v2702_v36 }
  0xe3   :  { %4396 = vst [vmem:[#allocation25_spill] sm:$0xff] %v2930_v50 }
  0xe5   :  { %868 = vperm.xlu0 %2437, %v2744_v51  }
  0xe6   :  { %v2875_v17 = vpop.permute.xlu1 %1634 }
  0xe9   :  { %2438 = vset.pattern.permute.xlu0 %v4385_v9 }
  0xea   :  { %v2878_v48 = vpop.permute.xlu1 %454  ;;  %220 = vperm.xlu0 %2438, %v2565_v8  }
  0xee   :  { %v2881_v14 = vpop.permute.xlu1 %573  ;;  %543 = vperm.xlu0 %2438, %v2636_v18   ;;  %v46_v18 = vld [vmem:[%s4301_s5] sm:$0x3] }
  0xef   :  { %4386 = vst [vmem:[#allocation18_spill] sm:$0xff] %v2881_v14 }
  0xf2   :  { %v2884_v32 = vpop.permute.xlu1 %1688  ;;  %618 = vperm.xlu0 %2438, %v2584_v12  }
  0xf6   :  { %v2887_v3 = vpop.permute.xlu1 %534  ;;  %1930 = vrot.lane.b32.xlu0 %v2560_v7, %s2491_s9 }
  0xf7   :  { %4387 = vst [vmem:[#allocation19_spill] sm:$0xff] %v2887_v3 }
  0xfa   :  { %897 = vrot.lane.b32.xlu0 %v2573_v10, %s2492_s10  ;;  %v2893_v51 = vpop.permute.xlu1 %589  ;;  %v2908_v10 = vand.u32 127, %v4393_v26  ;;  %v4395_v26 = vsub.s32 4, %v2694_v33 }
  0xfb   :  { %4388 = vst [vmem:[#allocation20_spill] sm:$0xff] %v2893_v51  ;;  %v3017_v51 = vmul.f32 %v2697_v34, %v2771_v61 }
  0xfc   :  { %v1423_v11 = vrot.slane %v2544_v5, %v4395_v26  ;;  %vm294_vm1 = vcmp.lt.s32.totalorder %v2908_v10, 17  ;;  %v2944_v26 = vld [vmem:[%s4302_s1] sm:$0xff]  ;;  %vm374_vm2 = vcmp.lt.s32.totalorder %v2908_v10, 16  ;;  %vm456_vm3 = vcmp.lt.s32.totalorder %v2908_v10, 15 }
  0xfd   :  { %v296_v24 = vsel %vm294_vm1, %v2839_v53, %v2661_v21  ;;  %4404 = vst [vmem:[#allocation33_spill] sm:$0xff] %v3017_v51  ;;  %v3036_v61 = vsel %vm374_vm2, %v2847_v55, %v2849_v45  ;;  %vm538_vm4 = vcmp.lt.s32.totalorder %v2908_v10, 1  ;;  %vm653_vm5 = vcmp.lt.s32.totalorder %v2908_v10, 127 }
  0xfe   :  { %1984 = vrot.lane.b32.xlu0 %v2544_v5, %s2492_s10  ;;  %vm735_vm6 = vcmp.lt.s32.totalorder %v2908_v10, 113  ;;  %vm817_vm7 = vcmp.lt.s32.totalorder %v2908_v10, 112  ;;  %vm899_vm8 = vcmp.lt.s32.totalorder %v2908_v10, 111 }
  0xff   :  { %v2897_v8 = vpop.permute.xlu1 %624 }
 0x100   :  { %4389 = vst [vmem:[#allocation21_spill] sm:$0xff] %v2897_v8 }
 0x102   :  { %979 = vperm.xlu0 %2438, %v46_v18   ;;  %v1443_v18 = vrot.slane %v2544_v5, %v2711_v39 }
 0x104   :  { %v2902_v12 = vpop.permute.xlu1 %658  ;;  %v2939_v33 = vrot.slane %v1443_v18, %v2706_v38  ;;  %v2957_v18 = vrot.slane %v1423_v11, %v2702_v36  ;;  %v305_v11 = vrot.slane %v296_v24, %v2702_v36 }
 0x105   :  { %4390 = vst [vmem:[#allocation22_spill] sm:$0xff] %v2902_v12  ;;  %v2961_v12 = vrot.slane %v1483_v57, %v2719_v42  ;;  %v2985_v57 = vsel %vm294_vm1, %v2661_v21, %v2839_v53  ;;  %v3007_v53 = vsel %vm374_vm2, %v2849_v45, %v2847_v55 }
 0x106   :  { %2441 = vset.pattern.permute.xlu0 %v4391_v29  ;;  %v1465_v29 = vrot.slane %v2544_v5, %v2722_v43  ;;  %4399 = vst [vmem:[#allocation28_spill] sm:$0xff] %v2939_v33  ;;  %v1471_v5 = vrot.slane %v1461_v13, %v2716_v41  ;;  %4400 = vst [vmem:[#allocation29_spill] sm:$0xff] %v2957_v18  ;;  %v2970_v13 = vrot.slane %v2944_v26, %v2702_v36 }
 0x107   :  { %4401 = vst [vmem:[#allocation30_spill] sm:$0xff] %v2961_v12  ;;  %v1498_v21 = vmul.f32 %v2961_v12, %v2664_v22  ;;  %v309_v12 = vrot.slane %v2985_v57, %v2702_v36  ;;  %v323_v14 = vrot.slane %v2985_v57, %v2706_v38  ;;  %v385_v51 = vrot.slane %v3007_v53, %v2702_v36 }
 0x108   :  { %v2905_v7 = vpop.permute.xlu1 %1744  ;;  %v1476_v58 = vmul.f32 %v1471_v5, %v2658_v20  ;;  %v399_v62 = vrot.slane %v3007_v53, %v2706_v38 }
 0x109   :  { %4392 = vst [vmem:[#allocation23_spill] sm:$0xff] %v2905_v7  ;;  %v2964_v7 = vrot.slane %v1487_v56, %v2719_v42  ;;  %v1455_v56 = vmul.f32 %v2939_v33, %v2782_v6  ;;  %v311_v55 = vmul.f32 %v309_v12, %v2699_v35  ;;  %v325_v45 = vmul.f32 %v323_v14, %v2733_v47 }
 0x10a   :  { %v403_v14 = vrot.slane %v3036_v61, %v2706_v38  ;;  %v415_v12 = vrot.slane %v3007_v53, %v2716_v41 }
 0x10b   :  { %4402 = vst [vmem:[#allocation31_spill] sm:$0xff] %v2964_v7  ;;  %v3013_v33 = vmul.f32 %v2964_v7, %v2664_v22 }
 0x10c   :  { %v2912_v9 = vpop.permute.xlu1 %1746 }
 0x10d   :  { %4394 = vst [vmem:[#allocation24_spill] sm:$0xff] %v2912_v9  ;;  %v1454_v9 = vmul.f32 %v2930_v50, %v2782_v6  ;;  %v319_v50 = vrot.slane %v296_v24, %v2706_v38  ;;  %v2999_v6 = vrot.slane %v2949_v0, %v2706_v38 }
 0x110   :  { %v2933_v2 = vpop.permute.xlu1 %688 }
 0x111   :  { %4397 = vst [vmem:[#allocation26_spill] sm:$0xff] %v2933_v2  ;;  %v1475_v2 = vrot.slane %v1465_v29, %v2716_v41  ;;  %v1434_v29 = vmul.f32 %v2936_v63, %v2656_v19  ;;  %v2995_v63 = vrot.slane %v2944_v26, %v2706_v38 }
 0x113   :  { %v1477_v44 = vmul.f32 %v1475_v2, %v2658_v20  ;;  %v1435_v20 = vmul.f32 %v2957_v18, %v2656_v19  ;;  %v310_v19 = vmul.f32 %v305_v11, %v2699_v35 }
 0x115   :  { %v2989_v8 = vpop.permute.xlu1 %740  ;;  %v1457_v22 = vadd.f32 %v1455_v56, %v1435_v20  ;;  %v339_v56 = vrot.slane %v2985_v57, %v2716_v41  ;;  %v351_v20 = vrot.slane %v296_v24, %v2719_v42 }
 0x116   :  { %4403 = vst [vmem:[#allocation32_spill] sm:$0xff] %v2989_v8  ;;  %v1456_v8 = vadd.f32 %v1454_v9, %v1434_v29  ;;  %v324_v9 = vmul.f32 %v319_v50, %v2733_v47  ;;  %v3030_v29 = vmul.f32 %v1471_v5, %v2697_v34  ;;  %v3045_v50 = vmul.f32 %v1475_v2, %v2697_v34 }
 0x117   :  { %v335_v5 = vrot.slane %v296_v24, %v2716_v41  ;;  %v389_v34 = vrot.slane %v3036_v61, %v2702_v36  ;;  %v3061_v2 = vrot.slane %v2949_v0, %v2711_v39 }
 0x118   :  { %4406 = vst [vmem:[#allocation35_spill] sm:$0xff] %v3030_v29  ;;  %4408 = vst [vmem:[#allocation37_spill] sm:$0xff] %v3045_v50  ;;  %v1478_v11 = vadd.f32 %v1476_v58, %v1456_v8  ;;  %v3055_v29 = vrot.slane %v2944_v26, %v2711_v39  ;;  %v326_v18 = vadd.f32 %v324_v9, %v310_v19 }
 0x119   :  { %4410 = vst [vmem:[#allocation39_spill] sm:$0xff] %v3061_v2  ;;  %v1479_v50 = vadd.f32 %v1477_v44, %v1457_v22  ;;  %v390_v58 = vmul.f32 %v385_v51, %v2768_v60  ;;  %v404_v8 = vmul.f32 %v399_v62, %v2798_v52  ;;  %v340_v19 = vmul.f32 %v335_v5, %v2806_v4 }
 0x11a   :  { %v3042_v15 = vpop.permute.xlu1 %640  ;;  %4409 = vst [vmem:[#allocation38_spill] sm:$0xff] %v3055_v29  ;;  %v341_v9 = vmul.f32 %v339_v56, %v2806_v4  ;;  %v355_v39 = vrot.slane %v2985_v57, %v2719_v42  ;;  %v3075_v44 = vadd.f32 %v1498_v21, %v1478_v11  ;;  %v327_v51 = vadd.f32 %v325_v45, %v311_v55 }
 0x11b   :  { %4407 = vst [vmem:[#allocation36_spill] sm:$0xff] %v3042_v15  ;;  %v356_v22 = vmul.f32 %v351_v20, %v2843_v54  ;;  %v3082_v62 = vsel %vm294_vm1, %v2666_v23, %v2872_v1  ;;  %v3088_v5 = vsel %vm294_vm1, %v2872_v1, %v2666_v23  ;;  %v342_v56 = vadd.f32 %v340_v19, %v326_v18 }
 0x11c   :  { %4412 = vst [vmem:[#allocation41_spill] sm:$0xff] %v3075_v44  ;;  %v431_v57 = vrot.slane %v3007_v53, %v2719_v42  ;;  %v3096_v21 = vsel %vm374_vm2, %v2673_v25, %v2875_v17  ;;  %v3102_v11 = vsel %vm374_vm2, %v2875_v17, %v2673_v25  ;;  %v391_v55 = vmul.f32 %v389_v34, %v2768_v60 }
 0x11d   :  { %v405_v1 = vmul.f32 %v403_v14, %v2798_v52  ;;  %v406_v23 = vadd.f32 %v404_v8, %v390_v58  ;;  %v420_v18 = vmul.f32 %v415_v12, %v2819_v37  ;;  %v1587_v53 = vrot.slane %v3088_v5, %v2702_v36 }
 0x11e   :  { %v3069_v24 = vpop.permute.xlu1 %649  ;;  %v1591_v45 = vrot.slane %v3082_v62, %v2702_v36  ;;  %v1597_v20 = vrot.slane %v3088_v5, %v2706_v38  ;;  %v1601_v25 = vrot.slane %v3082_v62, %v2706_v38  ;;  %v1641_v34 = vrot.slane %v3102_v11, %v2702_v36 }
 0x11f   :  { %4411 = vst [vmem:[#allocation40_spill] sm:$0xff] %v3069_v24  ;;  %v1645_v58 = vrot.slane %v3096_v21, %v2702_v36  ;;  %v1651_v14 = vrot.slane %v3102_v11, %v2706_v38  ;;  %v1655_v8 = vrot.slane %v3096_v21, %v2706_v38  ;;  %v343_v12 = vadd.f32 %v341_v9, %v327_v51 }
 0x120   :  { %v357_v19 = vmul.f32 %v355_v39, %v2843_v54  ;;  %v358_v44 = vadd.f32 %v356_v22, %v342_v56  ;;  %v419_v2 = vrot.slane %v3036_v61, %v2716_v41  ;;  %v407_v29 = vadd.f32 %v405_v1, %v391_v55 }
 0x121   :  { %v422_v7 = vadd.f32 %v420_v18, %v406_v23  ;;  %v435_v15 = vrot.slane %v3036_v61, %v2719_v42  ;;  %v1592_v24 = vmul.f32 %v1587_v53, %v2699_v35  ;;  %v1593_v40 = vmul.f32 %v1591_v45, %v2699_v35 }
 0x122   :  { %v3115_v17 = vpop.permute.xlu1 %704  ;;  %v1602_v3 = vmul.f32 %v1597_v20, %v2733_v47  ;;  %v1603_v9 = vmul.f32 %v1601_v25, %v2733_v47  ;;  %v1646_v51 = vmul.f32 %v1641_v34, %v2768_v60  ;;  %v1647_v22 = vmul.f32 %v1645_v58, %v2768_v60 }
 0x123   :  { %4413 = vst [vmem:[#allocation42_spill] sm:$0xff] %v3115_v17  ;;  %v436_v17 = vmul.f32 %v431_v57, %v2856_v30  ;;  %v1656_v56 = vmul.f32 %v1651_v14, %v2798_v52  ;;  %v1657_v61 = vmul.f32 %v1655_v8, %v2798_v52  ;;  %v359_v55 = vadd.f32 %v357_v19, %v343_v12 }
 0x124   :  { %v421_v57 = vmul.f32 %v419_v2, %v2819_v37  ;;  %v1609_v35 = vrot.slane %v3088_v5, %v2716_v41  ;;  %v3146_v1 = vadd.f32 %v3013_v33, %v1479_v50  ;;  %v368_v47 = vmul.f32 %v2970_v13, %v358_v44 }
 0x125   :  { %v1613_v23 = vrot.slane %v3082_v62, %v2716_v41  ;;  %v1663_v60 = vrot.slane %v3102_v11, %v2716_v41  ;;  %v1667_v52 = vrot.slane %v3096_v21, %v2716_v41  ;;  %v437_v2 = vmul.f32 %v435_v15, %v2856_v30 }
 0x126   :  { %4414 = vst [vmem:[#allocation43_spill] sm:$0xff] %v3146_v1  ;;  %v423_v18 = vadd.f32 %v421_v57, %v407_v29  ;;  %v438_v53 = vadd.f32 %v436_v17, %v422_v7  ;;  %v1604_v45 = vadd.f32 %v1602_v3, %v1592_v24  ;;  %v1605_v20 = vadd.f32 %v1603_v9, %v1593_v40  ;;  %v3208_v57 = vpop.permute.xlu0 %207  ;;  %v4445_v1 = vld [vmem:[#allocation25_spill] sm:$0xff] }
 0x127   :  { %v3136_v39 = vpop.permute.xlu1 %822  ;;  %v1621_v33 = vrot.slane %v3088_v5, %v2719_v42  ;;  %v1658_v50 = vadd.f32 %v1656_v56, %v1646_v51  ;;  %v1659_v44 = vadd.f32 %v1657_v61, %v1647_v22  ;;  %v1614_v25 = vmul.f32 %v1609_v35, %v2806_v4  ;;  %4416 = vst [vmem:[#allocation45_spill] sm:$0xff] %v3208_v57 }
 0x128   :  { %v1625_v34 = vrot.slane %v3082_v62, %v2719_v42  ;;  %v1675_v58 = vrot.slane %v3102_v11, %v2719_v42  ;;  %v1679_v29 = vrot.slane %v3096_v21, %v2719_v42  ;;  %v369_v40 = vmul.f32 %v2974_v59, %v359_v55 }
 0x129   :  { %v1615_v3 = vmul.f32 %v1613_v23, %v2806_v4  ;;  %v1668_v7 = vmul.f32 %v1663_v60, %v2819_v37  ;;  %v1669_v24 = vmul.f32 %v1667_v52, %v2819_v37  ;;  %v439_v5 = vadd.f32 %v437_v2, %v423_v18 }
 0x12a   :  { %v1616_v17 = vadd.f32 %v1614_v25, %v1604_v45  ;;  %v3175_v62 = vsel %vm456_vm3, %v2679_v27, %v2878_v48  ;;  %v3181_v21 = vsel %vm456_vm3, %v2878_v48, %v2679_v27  ;;  %v448_v4 = vmul.f32 %v2995_v63, %v438_v53 }
 0x12b   :  { %v1617_v11 = vadd.f32 %v1615_v3, %v1605_v20  ;;  %v1670_v14 = vadd.f32 %v1668_v7, %v1658_v50  ;;  %v1671_v8 = vadd.f32 %v1669_v24, %v1659_v44  ;;  %v1626_v37 = vmul.f32 %v1621_v33, %v2843_v54 }
 0x12c   :  { %v3165_v15 = vpop.permute.xlu1 %836  ;;  %v1627_v12 = vmul.f32 %v1625_v34, %v2843_v54  ;;  %v1680_v19 = vmul.f32 %v1675_v58, %v2856_v30  ;;  %v1681_v9 = vmul.f32 %v1679_v29, %v2856_v30  ;;  %v467_v51 = vrot.slane %v3181_v21, %v2702_v36 }
 0x12d   :  { %4415 = vst [vmem:[#allocation44_spill] sm:$0xff] %v3165_v15  ;;  %v471_v27 = vrot.slane %v3175_v62, %v2702_v36  ;;  %v481_v48 = vrot.slane %v3181_v21, %v2706_v38  ;;  %v485_v22 = vrot.slane %v3175_v62, %v2706_v38  ;;  %v449_v56 = vmul.f32 %v2999_v6, %v439_v5  ;;  %v3258_v5 = vpop.permute.xlu0 %672 }
 0x12e   :  { %v1628_v61 = vadd.f32 %v1626_v37, %v1616_v17  ;;  %v3202_v30 = vrot.slane %v2944_v26, %v2716_v41  ;;  %v3206_v55 = vrot.slane %v2949_v0, %v2716_v41  ;;  %v1629_v35 = vadd.f32 %v1627_v12, %v1617_v11 }
 0x12f   :  { %v1682_v23 = vadd.f32 %v1680_v19, %v1670_v14  ;;  %v1683_v60 = vadd.f32 %v1681_v9, %v1671_v8  ;;  %v3210_v52 = vadd.f32 %v448_v4, %v368_v47  ;;  %v497_v18 = vrot.slane %v3181_v21, %v2716_v41  ;;  %v4443_v14 = vld [vmem:[#allocation23_spill] sm:$0xff] }
 0x130   :  { %v3198_v54 = vpop.permute.xlu1 %1818  ;;  %v501_v2 = vrot.slane %v3175_v62, %v2716_v41  ;;  %v3220_v53 = vsel %vm456_vm3, %v2884_v32, %v2682_v28  ;;  %v3226_v45 = vsel %vm456_vm3, %v2682_v28, %v2884_v32  ;;  %v472_v47 = vmul.f32 %v467_v51, %v2828_v46 }
 0x131   :  { %v473_v20 = vmul.f32 %v471_v27, %v2828_v46  ;;  %v486_v33 = vmul.f32 %v481_v48, %v2834_v49  ;;  %v487_v50 = vmul.f32 %v485_v22, %v2834_v49  ;;  %v1630_v44 = vmul.f32 %v1628_v61, %v2970_v13  ;;  %v4442_v27 = vld [vmem:[#allocation24_spill] sm:$0xff] }
 0x132   :  { %v3234_v25 = vadd.f32 %v449_v56, %v369_v40  ;;  %v3238_v34 = vrot.slane %v2944_v26, %v2722_v43  ;;  %v3242_v28 = vrot.slane %v2949_v0, %v2722_v43  ;;  %v1697_v32 = vrot.slane %v3226_v45, %v2702_v36 }
 0x133   :  { %v1701_v58 = vrot.slane %v3220_v53, %v2702_v36  ;;  %v1707_v29 = vrot.slane %v3226_v45, %v2706_v38  ;;  %v1711_v13 = vrot.slane %v3220_v53, %v2706_v38  ;;  %v1631_v40 = vmul.f32 %v1629_v35, %v2974_v59 }
 0x134   :  { %4417 = vst [vmem:[#allocation46_spill] sm:$0xff] %v3238_v34  ;;  %4418 = vst [vmem:[#allocation47_spill] sm:$0xff] %v3242_v28  ;;  %v1684_v3 = vmul.f32 %v1682_v23, %v2995_v63  ;;  %v1685_v7 = vmul.f32 %v1683_v60, %v2999_v6  ;;  %v502_v43 = vmul.f32 %v497_v18, %v2862_v16  ;;  %v3256_v24 = vpop.permute.xlu1 %733  ;;  %v4419_v6 = vld [vmem:[#allocation19_spill] sm:$0xff]  ;;  %v4454_v28 = vld [vmem:[#allocation42_spill] sm:$0xff] }
 0x135   :  { %v488_v17 = vadd.f32 %v486_v33, %v472_v47  ;;  %v489_v4 = vadd.f32 %v487_v50, %v473_v20  ;;  %v503_v11 = vmul.f32 %v501_v2, %v2862_v16  ;;  %v1719_v59 = vrot.slane %v3226_v45, %v2716_v41  ;;  %v3307_v47 = vpop.permute.xlu0 %754 }
 0x136   :  { %v1723_v63 = vrot.slane %v3220_v53, %v2716_v41  ;;  %v3271_v8 = vsel %vm538_vm4, %v4419_v6, %v2688_v31  ;;  %v3277_v37 = vsel %vm538_vm4, %v2688_v31, %v4419_v6  ;;  %v1702_v12 = vmul.f32 %v1697_v32, %v2828_v46  ;;  %v4421_v32 = vld [vmem:[#allocation40_spill] sm:$0xff] }
 0x137   :  { %v1703_v19 = vmul.f32 %v1701_v58, %v2828_v46  ;;  %v1712_v9 = vmul.f32 %v1707_v29, %v2834_v49  ;;  %v1713_v51 = vmul.f32 %v1711_v13, %v2834_v49  ;;  %v3287_v22 = vadd.f32 %v1684_v3, %v1630_v44  ;;  %v4420_v44 = vld [vmem:[#allocation6_spill] sm:$0xff]  ;;  %v4422_v3 = vld [vmem:[#allocation17_spill] sm:$0xff]  ;;  %v4438_v29 = vld [vmem:[#allocation12_spill] sm:$0xff] }
 0x138   :  { %v3289_v56 = vadd.f32 %v1685_v7, %v1631_v40  ;;  %v563_v46 = vrot.slane %v3277_v37, %v2706_v38  ;;  %v567_v61 = vrot.slane %v3271_v8, %v2706_v38  ;;  %v579_v49 = vrot.slane %v3277_v37, %v2716_v41  ;;  %v3305_v2 = vpop.permute.xlu1 %852 }
 0x139   :  { %v1724_v35 = vmul.f32 %v1719_v59, %v2862_v16  ;;  %v1725_v23 = vmul.f32 %v1723_v63, %v2862_v16  ;;  %v583_v60 = vrot.slane %v3271_v8, %v2716_v41  ;;  %v595_v18 = vrot.slane %v3277_v37, %v2719_v42  ;;  %v4425_v63 = vld [vmem:[#allocation18_spill] sm:$0xff] }
 0x13a   :  { %v1714_v20 = vadd.f32 %v1712_v9, %v1702_v12  ;;  %v1715_v33 = vadd.f32 %v1713_v51, %v1703_v19  ;;  %v599_v50 = vrot.slane %v3271_v8, %v2719_v42  ;;  %v3315_v16 = vsel %vm653_vm5, %v4421_v32, %v4420_v44  ;;  %v1817_v51 = vpop.permute.xlu0 %1816 }
 0x13b   :  { %v3321_v13 = vadd.f32 %v502_v43, %v488_v17  ;;  %v3323_v40 = vadd.f32 %v503_v11, %v489_v4  ;;  %v3326_v7 = vmul.f32 %v563_v46, %v4422_v3  ;;  %v3329_v59 = vmul.f32 %v567_v61, %v4422_v3  ;;  %v4428_v17 = vld [vmem:[#allocation20_spill] sm:$0xff] }
 0x13c   :  { %v3332_v6 = vmul.f32 %v579_v49, %v4425_v63  ;;  %v3338_v12 = vsel %vm653_vm5, %v4420_v44, %v4421_v32  ;;  %v3341_v43 = vmul.f32 %v583_v60, %v4425_v63  ;;  %v3344_v4 = vmul.f32 %v595_v18, %v4428_v17  ;;  %v4431_v49 = vld [vmem:[#allocation7_spill] sm:$0xff] }
 0x13d   :  { %4423 = vst [vmem:[#allocation19_spill] sm:$0xff] %v3326_v7  ;;  %4424 = vst [vmem:[#allocation6_spill] sm:$0xff] %v3329_v59  ;;  %v664_v11 = vrot.slane %v3315_v16, %v2702_v36  ;;  %v678_v19 = vrot.slane %v3315_v16, %v2706_v38  ;;  %v3351_v9 = vmul.f32 %v599_v50, %v4428_v17  ;;  %v3370_v32 = vpop.permute.xlu1 %904 }
 0x13e   :  { %4426 = vst [vmem:[#allocation40_spill] sm:$0xff] %v3332_v6  ;;  %4427 = vst [vmem:[#allocation17_spill] sm:$0xff] %v3341_v43  ;;  %v3353_v46 = vadd.f32 %v1724_v35, %v1714_v20  ;;  %v3355_v61 = vadd.f32 %v1725_v23, %v1715_v33  ;;  %v3359_v60 = vrot.slane %v2944_v26, %v4431_v49  ;;  %v4435_v23 = vld [vmem:[#allocation11_spill] sm:$0xff]  ;;  %v4436_v20 = vld [vmem:[#allocation21_spill] sm:$0xff] }
 0x13f   :  { %4429 = vst [vmem:[#allocation18_spill] sm:$0xff] %v3344_v4  ;;  %4430 = vst [vmem:[#allocation20_spill] sm:$0xff] %v3351_v9  ;;  %v668_v18 = vrot.slane %v3338_v12, %v2702_v36  ;;  %v682_v44 = vrot.slane %v3338_v12, %v2706_v38  ;;  %v3368_v50 = vsel %vm653_vm5, %v1817_v51, %v3198_v54  ;;  %v3453_v43 = vld [vmem:[%s4302_s1 + $0x10] ss:$0 sm:$0xff]  ;;  %v4450_v6 = vld [vmem:[#allocation26_spill] sm:$0xff] }
 0x140   :  { %4432 = vst [vmem:[#allocation7_spill] sm:$0xff] %v3359_v60  ;;  %4433 = vst [vmem:[#allocation48_spill] sm:$0xff] %v3370_v32  ;;  %v3374_v35 = vrot.slane %v2949_v0, %v4431_v49  ;;  %v3378_v33 = vmul.f32 %v4436_v20, %v4435_v23  ;;  %v3382_v58 = vmul.f32 %v4436_v20, %v4438_v29  ;;  %v4444_v23 = vld [vmem:[#allocation22_spill] sm:$0xff]  ;;  %v4447_v32 = vld [vmem:[#allocation28_spill] sm:$0xff] }
 0x141   :  { %v3386_v31 = vrot.slane %v2944_v26, %v2719_v42  ;;  %v3390_v48 = vrot.slane %v2949_v0, %v2719_v42  ;;  %v3396_v49 = vsel %vm538_vm4, %v4443_v14, %v4442_v27  ;;  %v3402_v29 = vsel %vm538_vm4, %v4442_v27, %v4443_v14  ;;  %4449 = vst [vmem:[#allocation22_spill] sm:$0xff] %v3453_v43 }
 0x142   :  { %4434 = vst [vmem:[#allocation49_spill] sm:$0xff] %v3374_v35  ;;  %4437 = vst [vmem:[#allocation11_spill] sm:$0xff] %v3378_v33  ;;  %v669_v57 = vmul.f32 %v664_v11, %v4444_v23  ;;  %v683_v26 = vmul.f32 %v678_v19, %v3258_v5  ;;  %v3408_v0 = vmul.f32 %v4445_v1, %v4436_v20 }
 0x143   :  { %4439 = vst [vmem:[#allocation21_spill] sm:$0xff] %v3382_v58  ;;  %4440 = vst [vmem:[#allocation12_spill] sm:$0xff] %v3386_v31  ;;  %v1825_v31 = vrot.slane %v3368_v50, %v2702_v36  ;;  %v1835_v58 = vrot.slane %v3368_v50, %v2706_v38  ;;  %v670_v14 = vmul.f32 %v668_v18, %v4444_v23 }
 0x144   :  { %4441 = vst [vmem:[#allocation50_spill] sm:$0xff] %v3390_v48  ;;  %4446 = vst [vmem:[#allocation24_spill] sm:$0xff] %v3408_v0  ;;  %v3412_v48 = vmul.f32 %v4447_v32, %v4436_v20  ;;  %v684_v27 = vmul.f32 %v682_v44, %v3258_v5  ;;  %v694_v11 = vrot.slane %v3315_v16, %v2716_v41  ;;  %v1873_v32 = vpop.permute.xlu1 %1872 }
 0x145   :  { %v3425_v1 = vsel %vm653_vm5, %v3198_v54, %v1817_v51  ;;  %v1763_v44 = vrot.slane %v3402_v29, %v2706_v38  ;;  %v1767_v20 = vrot.slane %v3396_v49, %v2706_v38  ;;  %v1775_v54 = vrot.slane %v3402_v29, %v2716_v41 }
 0x146   :  { %4448 = vst [vmem:[#allocation23_spill] sm:$0xff] %v3412_v48  ;;  %v1779_v51 = vrot.slane %v3396_v49, %v2716_v41  ;;  %v685_v48 = vadd.f32 %v683_v26, %v669_v57  ;;  %v698_v0 = vrot.slane %v3338_v12, %v2716_v41  ;;  %v1829_v18 = vrot.slane %v3425_v1, %v2702_v36 }
 0x147   :  { %v3428_v19 = vpop.xlane.xlu0 %189  ;;  %v1830_v33 = vmul.f32 %v1825_v31, %v4444_v23  ;;  %v1839_v9 = vrot.slane %v3425_v1, %v2706_v38  ;;  %v1840_v4 = vmul.f32 %v1835_v58, %v3258_v5  ;;  %v1787_v57 = vrot.slane %v3402_v29, %v2719_v42  ;;  %v3463_v31 = vld [vmem:[%s4302_s1 + $0x18] ss:$0 sm:$0xff] }
 0x148   :  { %v686_v26 = vadd.f32 %v684_v27, %v670_v14  ;;  %v699_v35 = vmul.f32 %v694_v11, %v4450_v6  ;;  %v710_v60 = vrot.slane %v3315_v16, %v2719_v42  ;;  %4451 = vst [vmem:[#allocation25_spill] sm:$0xff] %v3463_v31  ;;  %v3466_v58 = vmul.f32 %v1763_v44, %v4422_v3 }
 0x149   :  { %v3469_v59 = vmul.f32 %v1767_v20, %v4422_v3  ;;  %v1791_v43 = vrot.slane %v3396_v49, %v2719_v42  ;;  %v1847_v14 = vrot.slane %v3368_v50, %v2716_v41  ;;  %v700_v27 = vmul.f32 %v698_v0, %v4450_v6  ;;  %v1875_v0 = vpop.permute.xlu1 %1874 }
 0x14a   :  { %4452 = vst [vmem:[#allocation28_spill] sm:$0xff] %v3466_v58  ;;  %v701_v16 = vadd.f32 %v699_v35, %v685_v48  ;;  %v714_v11 = vrot.slane %v3338_v12, %v2719_v42  ;;  %v1831_v31 = vmul.f32 %v1829_v18, %v4444_v23  ;;  %v1841_v44 = vmul.f32 %v1839_v9, %v3258_v5  ;;  %v4457_v9 = vld [vmem:[#allocation36_spill] sm:$0xff] }
 0x14b   :  { %4453 = vst [vmem:[#allocation26_spill] sm:$0xff] %v3469_v59  ;;  %v732_v7 = vpop.permute.xlu0 %731  ;;  %v1842_v58 = vadd.f32 %v1840_v4, %v1830_v33  ;;  %v3481_v3 = vmul.f32 %v1775_v54, %v4425_v63  ;;  %v3484_v20 = vmul.f32 %v1779_v51, %v4425_v63  ;;  %v702_v59 = vadd.f32 %v700_v27, %v686_v26  ;;  %v4456_v63 = vld [vmem:[#allocation13_spill] sm:$0xff]  ;;  %v4462_v26 = vld [vmem:[#allocation30_spill] sm:$0xff] }
 0x14c   :  { %v715_v34 = vmul.f32 %v710_v60, %v4454_v28  ;;  %v3488_v48 = vmul.f32 %v1787_v57, %v4428_v17  ;;  %v1851_v12 = vrot.slane %v3425_v1, %v2716_v41  ;;  %v1852_v35 = vmul.f32 %v1847_v14, %v4450_v6 }
 0x14d   :  { %v1859_v5 = vrot.slane %v3368_v50, %v2719_v42  ;;  %v3496_v4 = vmul.f32 %v1791_v43, %v4428_v17  ;;  %v3500_v33 = vmul.f32 %v4457_v9, %v4456_v63  ;;  %v716_v60 = vmul.f32 %v714_v11, %v4454_v28  ;;  %v4460_v43 = vld [vmem:[#allocation14_spill] sm:$0xff]  ;;  %v4468_v63 = vld [vmem:[#allocation39_spill] sm:$0xff] }
 0x14e   :  { %v717_v23 = vadd.f32 %v715_v34, %v701_v16  ;;  %v1843_v54 = vadd.f32 %v1841_v44, %v1831_v31  ;;  %v1854_v51 = vadd.f32 %v1852_v35, %v1842_v58  ;;  %v3507_v57 = vsel %vm735_vm6, %v1873_v32, %v1875_v0  ;;  %v4464_v44 = vld [vmem:[#allocation31_spill] sm:$0xff] }
 0x14f   :  { %4455 = vst [vmem:[#allocation42_spill] sm:$0xff] %v3496_v4  ;;  %4458 = vst [vmem:[#allocation13_spill] sm:$0xff] %v3500_v33  ;;  %v3511_v50 = vsel %vm735_vm6, %v1875_v0, %v1873_v32  ;;  %v3515_v17 = vmul.f32 %v4457_v9, %v4460_v43  ;;  %v3519_v14 = vmul.f32 %v4462_v26, %v4457_v9  ;;  %v4474_v4 = vld [vmem:[#allocation8_spill] sm:$0xff] }
 0x150   :  { %v718_v34 = vadd.f32 %v716_v60, %v702_v59  ;;  %v1863_v31 = vrot.slane %v3425_v1, %v2719_v42  ;;  %v1853_v58 = vmul.f32 %v1851_v12, %v4450_v6  ;;  %v1864_v27 = vmul.f32 %v1859_v5, %v4454_v28 }
 0x151   :  { %4461 = vst [vmem:[#allocation14_spill] sm:$0xff] %v3515_v17  ;;  %4463 = vst [vmem:[#allocation30_spill] sm:$0xff] %v3519_v14  ;;  %v3528_v32 = vsel %vm735_vm6, %v732_v7, %v3256_v24  ;;  %v3533_v16 = vsel %vm735_vm6, %v3256_v24, %v732_v7  ;;  %v1881_v59 = vrot.slane %v3507_v57, %v2702_v36  ;;  %v4466_v24 = vld [vmem:[#allocation38_spill] sm:$0xff] }
 0x152   :  { %v1885_v6 = vrot.slane %v3511_v50, %v2702_v36  ;;  %v1891_v1 = vrot.slane %v3507_v57, %v2706_v38  ;;  %v1895_v11 = vrot.slane %v3511_v50, %v2706_v38  ;;  %v3546_v0 = vmul.f32 %v4464_v44, %v4457_v9 }
 0x153   :  { %v3503_v18 = vpop.permute.xlu0 %918  ;;  %v3549_v7 = vmul.f32 %v4466_v24, %v717_v23  ;;  %v1855_v12 = vadd.f32 %v1853_v58, %v1843_v54  ;;  %v1866_v35 = vadd.f32 %v1864_v27, %v1854_v51  ;;  %v3552_v60 = vmul.f32 %v4468_v63, %v718_v34  ;;  %v4470_v34 = vld [vmem:[#allocation32_spill] sm:$0xff] }
 0x154   :  { %4459 = vst [vmem:[#allocation36_spill] sm:$0xff] %v3503_v18  ;;  %4465 = vst [vmem:[#allocation31_spill] sm:$0xff] %v3546_v0  ;;  %v1865_v43 = vmul.f32 %v1863_v31, %v4454_v28  ;;  %v746_v26 = vrot.slane %v3528_v32, %v2702_v36  ;;  %v750_v18 = vrot.slane %v3533_v16, %v2702_v36 }
 0x155   :  { %4467 = vst [vmem:[#allocation38_spill] sm:$0xff] %v3549_v7  ;;  %4469 = vst [vmem:[#allocation39_spill] sm:$0xff] %v3552_v60  ;;  %v1903_v9 = vrot.slane %v3507_v57, %v2716_v41  ;;  %v1907_v23 = vrot.slane %v3511_v50, %v2716_v41  ;;  %v760_v54 = vrot.slane %v3528_v32, %v2706_v38 }
 0x156   :  { %v764_v51 = vrot.slane %v3533_v16, %v2706_v38  ;;  %v1886_v28 = vmul.f32 %v1881_v59, %v4470_v34  ;;  %v1887_v31 = vmul.f32 %v1885_v6, %v4470_v34  ;;  %v1896_v58 = vmul.f32 %v1891_v1, %v3307_v47 }
 0x157   :  { %v1897_v27 = vmul.f32 %v1895_v11, %v3307_v47  ;;  %v3571_v44 = vadd.f32 %v1865_v43, %v1855_v12  ;;  %v3574_v60 = vmul.f32 %v1866_v35, %v4466_v24  ;;  %v776_v7 = vrot.slane %v3528_v32, %v2716_v41 }
 0x158   :  { %v508_v5 = vpop.permute.xlu0 %507  ;;  %v780_v0 = vrot.slane %v3533_v16, %v2716_v41  ;;  %v1915_v59 = vrot.slane %v3507_v57, %v2719_v42  ;;  %v1919_v6 = vrot.slane %v3511_v50, %v2719_v42  ;;  %v751_v1 = vmul.f32 %v746_v26, %v4470_v34 }
 0x159   :  { %4471 = vst [vmem:[#allocation32_spill] sm:$0xff] %v3574_v60  ;;  %v752_v11 = vmul.f32 %v750_v18, %v4470_v34  ;;  %v765_v24 = vmul.f32 %v760_v54, %v3307_v47  ;;  %v766_v12 = vmul.f32 %v764_v51, %v3307_v47  ;;  %v4472_v35 = vrot.slane %v3181_v21, %v2719_v42 }
 0x15a   :  { %v4473_v60 = vrot.slane %v3175_v62, %v2719_v42  ;;  %v1898_v57 = vadd.f32 %v1896_v58, %v1886_v28  ;;  %v1899_v33 = vadd.f32 %v1897_v27, %v1887_v31  ;;  %v1908_v50 = vmul.f32 %v1903_v9, %v4474_v4  ;;  %v816_v62 = vpop.permute.xlu1 %815 }
 0x15b   :  { %v518_v43 = vmul.f32 %v4472_v35, %v508_v5  ;;  %v1909_v26 = vmul.f32 %v1907_v23, %v4474_v4  ;;  %v781_v18 = vmul.f32 %v776_v7, %v4474_v4  ;;  %v782_v54 = vmul.f32 %v780_v0, %v4474_v4 }
 0x15c   :  { %v787_v14 = vpop.permute.xlu0 %786  ;;  %v519_v17 = vmul.f32 %v4473_v60, %v508_v5  ;;  %v4475_v47 = vrot.slane %v3226_v45, %v2719_v42  ;;  %v4476_v21 = vrot.slane %v3220_v53, %v2719_v42  ;;  %v792_v28 = vrot.slane %v3528_v32, %v2719_v42 }
 0x15d   :  { %v796_v9 = vrot.slane %v3533_v16, %v2719_v42  ;;  %v767_v45 = vadd.f32 %v765_v24, %v751_v1  ;;  %v768_v0 = vadd.f32 %v766_v12, %v752_v11  ;;  %v520_v23 = vadd.f32 %v518_v43, %v3321_v13 }
 0x15e   :  { %v1736_v51 = vmul.f32 %v4475_v47, %v508_v5  ;;  %v1737_v34 = vmul.f32 %v4476_v21, %v508_v5  ;;  %v521_v53 = vadd.f32 %v519_v17, %v3323_v40  ;;  %v797_v12 = vmul.f32 %v792_v28, %v787_v14 }
 0x15f   :  { %v798_v43 = vmul.f32 %v796_v9, %v787_v14 }
 0x160   :  { %v814_v60 = vpop.permute.xlu0 %813  ;;  %v1738_v58 = vadd.f32 %v1736_v51, %v3353_v46  ;;  %v1739_v27 = vadd.f32 %v1737_v34, %v3355_v61 }
 0x161   :  { %v818_v7 = vsel %vm817_vm7, %v814_v60, %v816_v62  ;;  %v819_v4 = vsel %vm817_vm7, %v816_v62, %v814_v60  ;;  %v530_v62 = vmul.f32 %v3202_v30, %v520_v23  ;;  %v531_v60 = vmul.f32 %v3206_v55, %v521_v53 }
 0x162   :  { %v828_v5 = vrot.slane %v818_v7, %v2702_v36  ;;  %v832_v31 = vrot.slane %v819_v4, %v2702_v36  ;;  %v842_v32 = vrot.slane %v818_v7, %v2706_v38  ;;  %v846_v16 = vrot.slane %v819_v4, %v2706_v38 }
 0x163   :  { %v858_v35 = vrot.slane %v818_v7, %v2716_v41  ;;  %v862_v1 = vrot.slane %v819_v4, %v2716_v41  ;;  %v874_v46 = vrot.slane %v818_v7, %v2719_v42  ;;  %v878_v61 = vrot.slane %v819_v4, %v2719_v42 }
 0x164   :  { %v3622_v11 = vpop.permute.xlu0 %868  ;;  %v833_v13 = vmul.f32 %v828_v5, %v3136_v39  ;;  %v834_v40 = vmul.f32 %v832_v31, %v3136_v39  ;;  %v847_v17 = vmul.f32 %v842_v32, %v3165_v15  ;;  %v848_v24 = vmul.f32 %v846_v16, %v3165_v15 }
 0x165   :  { %v863_v21 = vmul.f32 %v858_v35, %v3305_v2  ;;  %v864_v34 = vmul.f32 %v862_v1, %v3305_v2  ;;  %v783_v5 = vadd.f32 %v781_v18, %v767_v45  ;;  %v784_v31 = vadd.f32 %v782_v54, %v768_v0 }
 0x166   :  { %v849_v47 = vadd.f32 %v847_v17, %v833_v13  ;;  %v850_v51 = vadd.f32 %v848_v24, %v834_v40  ;;  %v1920_v32 = vmul.f32 %v1915_v59, %v787_v14  ;;  %v1921_v16 = vmul.f32 %v1919_v6, %v787_v14  ;;  %v4481_v17 = vld [vmem:[#allocation46_spill] sm:$0xff] }
 0x167   :  { %v1740_v7 = vmul.f32 %v1738_v58, %v3202_v30  ;;  %v1741_v4 = vmul.f32 %v1739_v27, %v3206_v55  ;;  %v1910_v13 = vadd.f32 %v1908_v50, %v1898_v57  ;;  %v1911_v35 = vadd.f32 %v1909_v26, %v1899_v33  ;;  %v3649_v55 = vpop.permute.xlu1 %934 }
 0x168   :  { %v865_v28 = vadd.f32 %v863_v21, %v849_v47  ;;  %v866_v9 = vadd.f32 %v864_v34, %v850_v51  ;;  %v799_v40 = vadd.f32 %v797_v12, %v783_v5  ;;  %v800_v1 = vadd.f32 %v798_v43, %v784_v31  ;;  %v4487_v21 = vld [vmem:[#allocation7_spill] sm:$0xff] }
 0x169   :  { %v3634_v15 = vpop.permute.xlu0 %220  ;;  %v879_v23 = vmul.f32 %v874_v46, %v3622_v11  ;;  %v880_v53 = vmul.f32 %v878_v61, %v3622_v11  ;;  %v3642_v59 = vmul.f32 %v3571_v44, %v4468_v63  ;;  %v3645_v14 = vmul.f32 0.00390625, %v3428_v19  ;;  %v4485_v61 = vld [vmem:[#allocation28_spill] sm:$0xff] }
 0x16a   :  { %v532_v6 = vadd.f32 %v530_v62, %v3210_v52  ;;  %v533_v30 = vadd.f32 %v531_v60, %v3234_v25  ;;  %v1922_v33 = vadd.f32 %v1920_v32, %v1910_v13  ;;  %v1923_v57 = vadd.f32 %v1921_v16, %v1911_v35  ;;  %v4488_v62 = vld [vmem:[#allocation49_spill] sm:$0xff]  ;;  %v4489_v32 = vld [vmem:[#allocation40_spill] sm:$0xff] }
 0x16b   :  { %v881_v50 = vadd.f32 %v879_v23, %v865_v28  ;;  %v882_v26 = vadd.f32 %v880_v53, %v866_v9  ;;  %v4477_v54 = vrot.slane %v3277_v37, %v2702_v36  ;;  %v4478_v63 = vrot.slane %v3271_v8, %v2702_v36  ;;  %v4482_v37 = vld [vmem:[#allocation47_spill] sm:$0xff]  ;;  %v1929_v31 = vpop.permute.xlu1 %1928  ;;  %v4490_v28 = vld [vmem:[#allocation17_spill] sm:$0xff] }
 0x16c   :  { %v4479_v52 = vrot.slane %v3402_v29, %v2702_v36  ;;  %v4480_v25 = vrot.slane %v3396_v49, %v2702_v36  ;;  %v1742_v58 = vadd.f32 %v1740_v7, %v3287_v22  ;;  %v1743_v27 = vadd.f32 %v1741_v4, %v3289_v56  ;;  %v4483_v8 = vld [vmem:[#allocation19_spill] sm:$0xff]  ;;  %v4484_v29 = vld [vmem:[#allocation6_spill] sm:$0xff]  ;;  %v4491_v13 = vld [vmem:[#allocation9_spill] sm:$0xff] }
 0x16d   :  { %v544_v18 = vpop.permute.xlu0 %543  ;;  %v3666_v24 = vmul.f32 %v4481_v17, %v799_v40  ;;  %v3669_v12 = vmul.f32 %v4482_v37, %v800_v1  ;;  %v4486_v49 = vld [vmem:[#allocation26_spill] sm:$0xff]  ;;  %v3677_v22 = vmul.f32 %v1922_v33, %v4481_v17  ;;  %v3680_v56 = vmul.f32 %v1923_v57, %v4482_v37  ;;  %v4493_v23 = vld [vmem:[#allocation27_spill] sm:$0xff]  ;;  %v4494_v33 = vld [vmem:[#allocation29_spill] sm:$0xff] }
 0x16e   :  { %v554_v45 = vmul.f32 %v4477_v54, %v544_v18  ;;  %v555_v19 = vmul.f32 %v4478_v63, %v544_v18  ;;  %v1758_v44 = vmul.f32 %v4479_v52, %v544_v18  ;;  %v1759_v0 = vmul.f32 %v4480_v25, %v544_v18  ;;  %v4492_v40 = vld [vmem:[#allocation10_spill] sm:$0xff]  ;;  %v4496_v18 = vld [vmem:[#allocation20_spill] sm:$0xff]  ;;  %v4498_v52 = vld [vmem:[#allocation11_spill] sm:$0xff] }
 0x16f   :  { %v3683_v34 = vmul.f32 %v4487_v21, %v881_v50  ;;  %v3686_v60 = vmul.f32 %v4488_v62, %v882_v26  ;;  %v4495_v50 = vld [vmem:[#allocation18_spill] sm:$0xff]  ;;  %v4500_v25 = vld [vmem:[#allocation24_spill] sm:$0xff]  ;;  %v4501_v17 = vld [vmem:[#allocation23_spill] sm:$0xff] }
 0x170   :  { %v570_v43 = vadd.f32 %v4483_v8, %v554_v45  ;;  %v571_v46 = vadd.f32 %v4484_v29, %v555_v19  ;;  %v1770_v47 = vadd.f32 %v4485_v61, %v1758_v44  ;;  %v1771_v51 = vadd.f32 %v4486_v49, %v1759_v0  ;;  %v4497_v63 = vld [vmem:[#allocation42_spill] sm:$0xff]  ;;  %v4499_v44 = vld [vmem:[#allocation21_spill] sm:$0xff] }
 0x171   :  { %v619_v5 = vpop.permute.xlu0 %618 }
 0x172   :  { %v586_v16 = vadd.f32 %v4489_v32, %v570_v43  ;;  %v587_v9 = vadd.f32 %v4490_v28, %v571_v46  ;;  %v1782_v7 = vadd.f32 %v3481_v3, %v1770_v47  ;;  %v1783_v4 = vadd.f32 %v3484_v20, %v1771_v51  ;;  %v4502_v43 = vld [vmem:[#allocation12_spill] sm:$0xff]  ;;  %v4503_v46 = vld [vmem:[#allocation50_spill] sm:$0xff] }
 0x173   :  { %v621_v35 = vmul.f32 %v619_v5, %v4491_v13  ;;  %v622_v1 = vmul.f32 %v619_v5, %v4492_v40  ;;  %v1800_v53 = vmul.f32 %v4493_v23, %v619_v5  ;;  %v1801_v57 = vmul.f32 %v4494_v33, %v619_v5  ;;  %v4505_v5 = vld [vmem:[#allocation34_spill] sm:$0xff]  ;;  %v4508_v23 = vld [vmem:[#allocation13_spill] sm:$0xff] }
 0x174   :  { %v602_v26 = vadd.f32 %v4495_v50, %v586_v16  ;;  %v603_v54 = vadd.f32 %v4496_v18, %v587_v9  ;;  %v1794_v45 = vadd.f32 %v3488_v48, %v1782_v7  ;;  %v1795_v19 = vadd.f32 %v4497_v63, %v1783_v4  ;;  %v4504_v48 = vld [vmem:[#allocation33_spill] sm:$0xff]  ;;  %v4506_v16 = vld [vmem:[#allocation35_spill] sm:$0xff]  ;;  %v896_v4 = vpop.permute.xlu1 %895  ;;  %v4509_v33 = vld [vmem:[#allocation14_spill] sm:$0xff] }
 0x175   :  { %v629_v3 = vadd.f32 %v4498_v52, %v621_v35  ;;  %v630_v20 = vadd.f32 %v4499_v44, %v622_v1  ;;  %v1804_v0 = vadd.f32 %v4500_v25, %v1800_v53  ;;  %v1805_v37 = vadd.f32 %v4501_v17, %v1801_v57  ;;  %v1931_v8 = vpop.permute.xlu0 %1930  ;;  %v4507_v9 = vld [vmem:[#allocation37_spill] sm:$0xff]  ;;  %v4510_v50 = vld [vmem:[#allocation30_spill] sm:$0xff]  ;;  %v4511_v18 = vld [vmem:[#allocation31_spill] sm:$0xff] }
 0x176   :  { %v612_v29 = vmul.f32 %v4502_v43, %v602_v26  ;;  %v613_v61 = vmul.f32 %v4503_v46, %v603_v54  ;;  %v1796_v47 = vmul.f32 %v1794_v45, %v4502_v43  ;;  %v1797_v49 = vmul.f32 %v1795_v19, %v4503_v46 }
 0x177   :  { %v637_v51 = vadd.f32 %v4504_v48, %v629_v3  ;;  %v638_v32 = vadd.f32 %v4505_v5, %v630_v20  ;;  %v1808_v28 = vadd.f32 %v4506_v16, %v1804_v0  ;;  %v1809_v7 = vadd.f32 %v4507_v9, %v1805_v37 }
 0x178   :  { %v614_v13 = vadd.f32 %v612_v29, %v532_v6  ;;  %v615_v35 = vadd.f32 %v613_v61, %v533_v30  ;;  %v1798_v40 = vadd.f32 %v1796_v47, %v1742_v58  ;;  %v1799_v1 = vadd.f32 %v1797_v49, %v1743_v27  ;;  %v3736_v0 = vpop.permute.xlu1 %950  ;;  %v4512_v61 = vld [vmem:[#allocation44_spill] sm:$0xff] }
 0x179   :  { %v645_v53 = vadd.f32 %v4508_v23, %v637_v51  ;;  %v646_v57 = vadd.f32 %v4509_v33, %v638_v32  ;;  %v1812_v26 = vadd.f32 %v4510_v50, %v1808_v28  ;;  %v1813_v54 = vadd.f32 %v4511_v18, %v1809_v7  ;;  %v898_v45 = vpop.permute.xlu0 %897 }
 0x17a   :  { %v1932_v63 = vsel %vm817_vm7, %v1929_v31, %v1931_v8  ;;  %v1933_v19 = vsel %vm817_vm7, %v1931_v8, %v1929_v31  ;;  %v900_v6 = vsel %vm899_vm8, %v896_v4, %v898_v45  ;;  %v901_v30 = vsel %vm899_vm8, %v898_v45, %v896_v4 }
 0x17b   :  { %v3724_v58 = vadd.f32 %v645_v53, %v614_v13  ;;  %v3726_v27 = vadd.f32 %v646_v57, %v615_v35  ;;  %v3728_v52 = vadd.f32 %v1812_v26, %v1798_v40  ;;  %v3730_v3 = vadd.f32 %v1813_v54, %v1799_v1  ;;  %v4513_v1 = vld [vmem:[#allocation48_spill] sm:$0xff] }
 0x17c   :  { %v1937_v44 = vrot.slane %v1932_v63, %v2702_v36  ;;  %v1941_v20 = vrot.slane %v1933_v19, %v2702_v36  ;;  %v1947_v31 = vrot.slane %v1932_v63, %v2706_v38  ;;  %v1951_v25 = vrot.slane %v1933_v19, %v2706_v38  ;;  %v1987_v53 = vpop.permute.xlu1 %1986  ;;  %v4514_v57 = vld [vmem:[#allocation36_spill] sm:$0xff] }
 0x17d   :  { %v1959_v17 = vrot.slane %v1932_v63, %v2716_v41  ;;  %v1963_v37 = vrot.slane %v1933_v19, %v2716_v41  ;;  %v1971_v8 = vrot.slane %v1932_v63, %v2719_v42  ;;  %v1975_v43 = vrot.slane %v1933_v19, %v2719_v42  ;;  %v1985_v33 = vpop.permute.xlu0 %1984 }
 0x17e   :  { %v1942_v29 = vmul.f32 %v1937_v44, %v3136_v39  ;;  %v1943_v46 = vmul.f32 %v1941_v20, %v3136_v39  ;;  %v1952_v47 = vmul.f32 %v1947_v31, %v4512_v61  ;;  %v1953_v49 = vmul.f32 %v1951_v25, %v4512_v61 }
 0x17f   :  { %v1964_v48 = vmul.f32 %v1959_v17, %v3305_v2  ;;  %v1965_v51 = vmul.f32 %v1963_v37, %v3305_v2  ;;  %v1976_v5 = vmul.f32 %v1971_v8, %v3622_v11  ;;  %v1977_v32 = vmul.f32 %v1975_v43, %v3622_v11 }
 0x180   :  { %v1954_v16 = vadd.f32 %v1952_v47, %v1942_v29  ;;  %v1955_v28 = vadd.f32 %v1953_v49, %v1943_v46  ;;  %v910_v9 = vrot.slane %v900_v6, %v2702_v36  ;;  %v914_v7 = vrot.slane %v901_v30, %v2702_v36 }
 0x181   :  { %v924_v39 = vrot.slane %v900_v6, %v2706_v38  ;;  %v928_v4 = vrot.slane %v901_v30, %v2706_v38  ;;  %v940_v13 = vrot.slane %v900_v6, %v2716_v41  ;;  %v944_v35 = vrot.slane %v901_v30, %v2716_v41 }
 0x182   :  { %v1966_v40 = vadd.f32 %v1964_v48, %v1954_v16  ;;  %v1967_v2 = vadd.f32 %v1965_v51, %v1955_v28  ;;  %v915_v23 = vmul.f32 %v910_v9, %v4513_v1  ;;  %v916_v11 = vmul.f32 %v914_v7, %v4513_v1 }
 0x183   :  { %v929_v50 = vmul.f32 %v924_v39, %v4514_v57  ;;  %v930_v26 = vmul.f32 %v928_v4, %v4514_v57  ;;  %v945_v18 = vmul.f32 %v940_v13, %v3649_v55  ;;  %v946_v54 = vmul.f32 %v944_v35, %v3649_v55 }
 0x184   :  { %v1978_v45 = vadd.f32 %v1976_v5, %v1966_v40  ;;  %v1979_v63 = vadd.f32 %v1977_v32, %v1967_v2  ;;  %v956_v19 = vrot.slane %v900_v6, %v2719_v42  ;;  %v960_v44 = vrot.slane %v901_v30, %v2719_v42  ;;  %v4515_v40 = vld [vmem:[#allocation38_spill] sm:$0xff] }
 0x185   :  { %v931_v20 = vadd.f32 %v929_v50, %v915_v23  ;;  %v932_v31 = vadd.f32 %v930_v26, %v916_v11  ;;  %v1988_v25 = vsel %vm899_vm8, %v1985_v33, %v1987_v53  ;;  %v1989_v17 = vsel %vm899_vm8, %v1987_v53, %v1985_v33  ;;  %v4517_v53 = vld [vmem:[#allocation22_spill] sm:$0xff] }
 0x186   :  { %v961_v37 = vmul.f32 %v956_v19, %v3736_v0  ;;  %v962_v8 = vmul.f32 %v960_v44, %v3736_v0  ;;  %v1993_v43 = vrot.slane %v1988_v25, %v2702_v36  ;;  %v1997_v29 = vrot.slane %v1989_v17, %v2702_v36 }
 0x187   :  { %v947_v46 = vadd.f32 %v945_v18, %v931_v20  ;;  %v948_v6 = vadd.f32 %v946_v54, %v932_v31  ;;  %v2003_v30 = vrot.slane %v1988_v25, %v2706_v38  ;;  %v2007_v61 = vrot.slane %v1989_v17, %v2706_v38  ;;  %v4519_v54 = vld [vmem:[#allocation32_spill] sm:$0xff] }
 0x188   :  { %v1998_v47 = vmul.f32 %v1993_v43, %v4513_v1  ;;  %v1999_v49 = vmul.f32 %v1997_v29, %v4513_v1  ;;  %v2015_v48 = vrot.slane %v1988_v25, %v2716_v41  ;;  %v2019_v51 = vrot.slane %v1989_v17, %v2716_v41  ;;  %v4516_v41 = vld [vmem:[#allocation39_spill] sm:$0xff] }
 0x189   :  { %v963_v5 = vadd.f32 %v961_v37, %v947_v46  ;;  %v964_v32 = vadd.f32 %v962_v8, %v948_v6  ;;  %v2008_v16 = vmul.f32 %v2003_v30, %v4514_v57  ;;  %v2009_v28 = vmul.f32 %v2007_v61, %v4514_v57  ;;  %v4518_v57 = vld [vmem:[#allocation25_spill] sm:$0xff]  ;;  %v4524_v6 = vld [vmem:[#allocation2_spill] sm:$0xff] }
 0x18a   :  { %v2020_v9 = vmul.f32 %v2015_v48, %v3649_v55  ;;  %v2021_v7 = vmul.f32 %v2019_v51, %v3649_v55  ;;  %v2027_v39 = vrot.slane %v1988_v25, %v2719_v42  ;;  %v2031_v4 = vrot.slane %v1989_v17, %v2719_v42  ;;  %v4525_v30 = vld [vmem:[#allocation41_spill] sm:$0xff] }
 0x18b   :  { %v2010_v13 = vadd.f32 %v2008_v16, %v1998_v47  ;;  %v2011_v35 = vadd.f32 %v2009_v28, %v1999_v49  ;;  %v729_v2 = vadd.f32 %v4515_v40, %v3724_v58  ;;  %v730_v1 = vadd.f32 %v4516_v41, %v3726_v27 }
 0x18c   :  { %v2032_v23 = vmul.f32 %v2027_v39, %v3736_v0  ;;  %v2033_v11 = vmul.f32 %v2031_v4, %v3736_v0  ;;  %v973_v33 = vmul.f32 %v4517_v53, %v963_v5  ;;  %v974_v55 = vmul.f32 %v4518_v57, %v964_v32 }
 0x18d   :  { %v2022_v50 = vadd.f32 %v2020_v9, %v2010_v13  ;;  %v2023_v26 = vadd.f32 %v2021_v7, %v2011_v35  ;;  %v811_v42 = vadd.f32 %v3666_v24, %v729_v2  ;;  %v812_v18 = vadd.f32 %v3669_v12, %v730_v1  ;;  %v4520_v24 = vld [vmem:[#allocation15_spill] sm:$0xff] }
 0x18e   :  { %v1870_v58 = vadd.f32 %v4519_v54, %v3728_v52  ;;  %v1871_v27 = vadd.f32 %v3642_v59, %v3730_v3  ;;  %v1980_v19 = vmul.f32 %v1978_v45, %v4487_v21  ;;  %v1981_v0 = vmul.f32 %v1979_v63, %v4488_v62  ;;  %v4522_v52 = vld [vmem:[#allocation16_spill] sm:$0xff]  ;;  %v980_v45 = vpop.permute.xlu0 %979 }
 0x18f   :  { %v2034_v44 = vadd.f32 %v2032_v23, %v2022_v50  ;;  %v2035_v20 = vadd.f32 %v2033_v11, %v2023_v26  ;;  %v893_v31 = vadd.f32 %v3683_v34, %v811_v42  ;;  %v894_v25 = vadd.f32 %v3686_v60, %v812_v18 }
 0x190   :  { %v4521_v17 = vmax.f32 %v4520_v24, 0.0  ;;  %v4523_v37 = vmax.f32 %v4522_v52, 0.0  ;;  %v1926_v59 = vadd.f32 %v3677_v22, %v1870_v58  ;;  %v1927_v21 = vadd.f32 %v3680_v56, %v1871_v27  ;;  %v4526_v22 = vld [vmem:[#allocation43_spill] sm:$0xff] }
 0x191   :  { %v975_v62 = vadd.f32 %v973_v33, %v893_v31  ;;  %v976_v3 = vadd.f32 %v974_v55, %v894_v25  ;;  %v2036_v34 = vmul.f32 %v4517_v53, %v2034_v44  ;;  %v2037_v60 = vmul.f32 %v4518_v57, %v2035_v20  ;;  %v2473_v55 = vld [vmem:[%s4301_s5] sm:$0x3] }
 0x192   :  { %v3805_v12 = vsub.f32 %v4521_v17, %v3645_v14  ;;  %v3810_v8 = vsub.f32 %v4523_v37, %v3645_v14  ;;  %v1982_v63 = vadd.f32 %v1980_v19, %v1926_v59  ;;  %v1983_v43 = vadd.f32 %v1981_v0, %v1927_v21 }
 0x193   :  { %v982_v29 = vadd.f32 %v980_v45, %v975_v62  ;;  %v983_v46 = vadd.f32 %v980_v45, %v976_v3  ;;  %v1502_v61 = vadd.f32 %v4525_v30, %v4524_v6  ;;  %v1503_v49 = vadd.f32 %v4526_v22, %v4524_v6  ;;  %v2384_v6 = vld [vmem:[%s4300_s4 + $0x14] sm:$0x3]  ;;  %v2385_v30 = vld [vmem:[%s4300_s4 + $0x16] sm:$0x3] }
 0x194   :  { %v2038_v14 = vadd.f32 %v2036_v34, %v1982_v63  ;;  %v2039_v47 = vadd.f32 %v2037_v60, %v1983_v43  ;;  %v194_v56 = vmul.f32 %v3805_v12, %v3805_v12  ;;  %v195_v48 = vmul.f32 %v3810_v8, %v3810_v8 }
 0x195   :  { %v984_v51 = vmax.f32 %v982_v29, 0.0  ;;  %v985_v5 = vmax.f32 %v983_v46, 0.0  ;;  %v1504_v7 = vmax.f32 %v1502_v61, 0.0  ;;  %v1505_v35 = vmax.f32 %v1503_v49, 0.0  ;;  %v2388_v49 = vld [vmem:[%s4300_s4 + $0x1c] sm:$0x3] }
 0x196   :  { %v2040_v32 = vadd.f32 %v2038_v14, %v980_v45  ;;  %v2041_v16 = vadd.f32 %v2039_v47, %v980_v45  ;;  %v196_v40 = vsel %vm185_vm0, %v194_v56, 0.0  ;;  %v197_v2 = vsel %vm185_vm0, %v195_v48, 0.0  ;;  %v2383_v47 = vld [vmem:[%s4300_s4 + $0x12] sm:$0x3]  ;;  %v2386_v56 = vld [vmem:[%s4300_s4 + $0x18] sm:$0x3] }
 0x197   :  { %v986_v28 = vsel %vm185_vm0, %v984_v51, 0.0  ;;  %v987_v9 = vsel %vm185_vm0, %v985_v5, 0.0  ;;  %v198_v11 = vadd.f32 %v197_v2, %v196_v40  ;;  %v1506_v53 = vsel %vm185_vm0, %v1504_v7, 0.0  ;;  %v2390_v48 = vld [vmem:[%s4300_s4 + $0x20] sm:$0x3] }
 0x198   :  { %v988_v39 = vadd.f32 %v987_v9, %v986_v28  ;;  %v2042_v4 = vmax.f32 %v2040_v32, 0.0  ;;  %v2043_v13 = vmax.f32 %v2041_v16, 0.0  ;;  %v1507_v33 = vsel %vm185_vm0, %v1505_v35, 0.0  ;;  %v2387_v9 = vld [vmem:[%s4300_s4 + $0x1a] sm:$0x3] }
 0x199   :  { %v1508_v57 = vadd.f32 %v1507_v33, %v1506_v53  ;;  %v4527_v50 = vmov 0   ;;  %v4531_v53 = vld [vmem:[#allocation4_spill] sm:$0xff] }
 0x19a   :  { %989 = vadd.xlane.f32.xlu1 %v988_v39  ;;  %v2044_v41 = vsel %vm185_vm0, %v2042_v4, 0.0  ;;  %v2045_v1 = vsel %vm185_vm0, %v2043_v13, 0.0 }
 0x19b   :  { %v2046_v23 = vadd.f32 %v2045_v1, %v2044_v41  ;;  %v3908_v1 = vld [vmem:[%s4300_s4 + $0x22] sm:$0x3] }
 0x19d   :  { %2047 = vadd.xlane.f32.xlu0 %v2046_v23 }
 0x19e   :  { %199 = vadd.xlane.f32.xlu1 %v198_v11 }
 0x1a1   :  { %1509 = vadd.xlane.f32.xlu0 %v1508_v57 }
 0x1b7   :  { %1013 = vperm.xlu0 %2441, %v2473_v55  }
 0x1bb   :  { %2443 = vset.pattern.permute.xlu0 %v4527_v50 }
 0x227   :  { %v990_v26 = vpop.xlane.xlu1 %989 }
 0x228   :  { %v991_v42 = vmul.f32 0.00390625, %v990_v26 }
 0x22a   :  { %v3836_v18 = vsub.f32 %v984_v51, %v991_v42  ;;  %v3838_v54 = vsub.f32 %v985_v5, %v991_v42  ;;  %v2048_v58 = vpop.xlane.xlu0 %2047  ;;  %v4528_v51 = vmov 1   ;;  %v2389_v5 = vld [vmem:[%s4300_s4 + $0x1e] sm:$0x3] }
 0x22b   :  { %v2049_v27 = vmul.f32 0.00390625, %v2048_v58  ;;  %v200_v61 = vpop.xlane.xlu1 %199  ;;  %v4532_v42 = vld [vmem:[#allocation5_spill] sm:$0xff] }
 0x22c   :  { %v994_v19 = vmul.f32 %v3836_v18, %v3836_v18  ;;  %v995_v0 = vmul.f32 %v3838_v54, %v3838_v54  ;;  %v201_v14 = vmul.f32 0.00390625, %v200_v61 }
 0x22d   :  { %v3844_v44 = vsub.f32 %v2042_v4, %v2049_v27  ;;  %v3846_v20 = vsub.f32 %v2043_v13, %v2049_v27  ;;  %v4530_v13 = vld [vmem:[#allocation3_spill] sm:$0xff] }
 0x22e   :  { %v1510_v31 = vpop.xlane.xlu0 %1509  ;;  %v996_v25 = vsel %vm185_vm0, %v994_v19, 0.0  ;;  %v997_v24 = vsel %vm185_vm0, %v995_v0, 0.0  ;;  %v202_v22 = vadd.f32 1e-05, %v201_v14 }
 0x22f   :  { %v2052_v17 = vmul.f32 %v3844_v44, %v3844_v44  ;;  %v2053_v52 = vmul.f32 %v3846_v20, %v3846_v20  ;;  %v1511_v37 = vmul.f32 0.00390625, %v1510_v31  ;;  %v998_v59 = vadd.f32 %v997_v24, %v996_v25 }
 0x230   :  { %2457 = vrsqrt.f32 %v202_v22 }
 0x231   :  { %v3854_v21 = vsub.f32 %v1504_v7, %v1511_v37  ;;  %v3856_v62 = vsub.f32 %v1505_v35, %v1511_v37  ;;  %999 = vadd.xlane.f32.xlu0 %v998_v59  ;;  %v2054_v3 = vsel %vm185_vm0, %v2052_v17, 0.0  ;;  %v2055_v34 = vsel %vm185_vm0, %v2053_v52, 0.0  ;;  %v4529_v7 = vld [vmem:[#allocation45_spill] sm:$0xff] }
 0x232   :  { %v2056_v60 = vadd.f32 %v2055_v34, %v2054_v3 }
 0x233   :  { %v1514_v45 = vmul.f32 %v3854_v21, %v3854_v21  ;;  %v1515_v63 = vmul.f32 %v3856_v62, %v3856_v62 }
 0x234   :  { %2057 = vadd.xlane.f32.xlu1 %v2056_v60 }
 0x235   :  { %v1516_v43 = vsel %vm185_vm0, %v1514_v45, 0.0  ;;  %v1517_v29 = vsel %vm185_vm0, %v1515_v63, 0.0 }
 0x236   :  { %v1518_v46 = vadd.f32 %v1517_v29, %v1516_v43  ;;  %v1014_v25 = vpop.permute.xlu0 %1013 }
 0x238   :  { %1519 = vadd.xlane.f32.xlu1 %v1518_v46 }
 0x23a   :  { %v2458_v32 = vpop.eup %2457 }
 0x23b   :  { %v204_v16 = vmul.f32 %v2458_v32, %v3805_v12  ;;  %v205_v28 = vmul.f32 %v2458_v32, %v3810_v8 }
 0x23d   :  { %v210_v39 = vmul.f32 %v4529_v7, %v204_v16  ;;  %v211_v4 = vmul.f32 %v4529_v7, %v205_v28 }
 0x23f   :  { %v216_v35 = vadd.f32 %v4530_v13, %v210_v39  ;;  %v217_v40 = vadd.f32 %v4530_v13, %v211_v4 }
 0x241   :  { %v226_v12 = vrot.slane %v216_v35, %v2702_v36  ;;  %v230_v8 = vrot.slane %v217_v40, %v2702_v36  ;;  %v240_v2 = vrot.slane %v216_v35, %v2706_v38  ;;  %v244_v41 = vrot.slane %v217_v40, %v2706_v38 }
 0x243   :  { %v231_v23 = vmul.f32 %v226_v12, %v3634_v15  ;;  %v232_v11 = vmul.f32 %v230_v8, %v3634_v15  ;;  %v245_v33 = vmul.f32 %v240_v2, %v4531_v53  ;;  %v246_v57 = vmul.f32 %v244_v41, %v4531_v53 }
 0x245   :  { %v248_v26 = vadd.f32 %v246_v57, %v232_v11 }
 0x247   :  { %1055 = vperm.xlu0 %2443, %v2384_v6   ;;  %v3921_v27 = vadd.f32 %v4532_v42, %v248_v26 }
 0x249   :  { %1007 = vperm.xlu1 %2442, %v2473_v55   ;;  %v247_v55 = vadd.f32 %v245_v33, %v231_v23  ;;  %v257_v0 = vmax.f32 %v3921_v27, 0.0 }
 0x24b   :  { %1098 = vperm.xlu0 %2443, %v2385_v30   ;;  %v3918_v58 = vadd.f32 %v4532_v42, %v247_v55 }
 0x24d   :  { %1061 = vperm.xlu1 %2442, %v2384_v6   ;;  %v256_v19 = vmax.f32 %v3918_v58, 0.0 }
 0x24f   :  { %1026 = vperm.xlu0 %2443, %v2383_v47   ;;  %v258_v31 = vadd.f32 %v257_v0, %v256_v19 }
 0x251   :  { %1032 = vperm.xlu1 %2442, %v2383_v47  }
 0x253   :  { %1207 = vperm.xlu0 %2443, %v2388_v49  }
 0x255   :  { %2444 = vset.pattern.permute.xlu1 %v4527_v50 }
 0x256   :  { %1141 = vperm.xlu1 %2444, %v2386_v56  }
 0x257   :  { %1293 = vperm.xlu0 %2443, %v2390_v48  }
 0x25a   :  { %2445 = vset.pattern.permute.xlu1 %v4528_v51 }
 0x25b   :  { %2448 = vset.pattern.permute.xlu0 %v4528_v51  ;;  %1213 = vperm.xlu1 %2445, %v2388_v49  }
 0x25c   :  { %1104 = vperm.xlu0 %2448, %v2385_v30  }
 0x25f   :  { %2446 = vset.pattern.permute.xlu1 %v4527_v50 }
 0x260   :  { %1147 = vperm.xlu0 %2448, %v2386_v56   ;;  %1250 = vperm.xlu1 %2446, %v2389_v5  }
 0x264   :  { %1256 = vperm.xlu0 %2448, %v2389_v5   ;;  %1178 = vperm.xlu1 %2446, %v2387_v9  }
 0x268   :  { %2447 = vset.pattern.permute.xlu1 %v4528_v51 }
 0x269   :  { %1184 = vperm.xlu1 %2447, %v2387_v9  }
 0x26d   :  { %1299 = vperm.xlu1 %2447, %v2390_v48  }
 0x271   :  { %2449 = vset.pattern.permute.xlu1 %v4527_v50 }
 0x272   :  { %1336 = vperm.xlu1 %2449, %v3908_v1  }
 0x276   :  { %2452 = vset.pattern.permute.xlu1 %v4528_v51 }
 0x283   :  { %259 = vadd.xlane.f32.xlu0 %v258_v31  ;;  %v3987_v31 = vld [vmem:[%s4301_s5 + $0x2] sm:$0x3] }
 0x2be   :  { %v1000_v24 = vpop.xlane.xlu0 %999 }
 0x2bf   :  { %v1001_v17 = vmul.f32 0.00390625, %v1000_v24 }
 0x2c1   :  { %v1002_v52 = vadd.f32 1e-05, %v1001_v17  ;;  %v2058_v37 = vpop.xlane.xlu1 %2057 }
 0x2c2   :  { %v2059_v59 = vmul.f32 0.00390625, %v2058_v37 }
 0x2c3   :  { %2459 = vrsqrt.f32 %v1002_v52 }
 0x2c4   :  { %v2060_v3 = vadd.f32 1e-05, %v2059_v59 }
 0x2c5   :  { %v3929_v34 = vpop.xlane.xlu1 %1519 }
 0x2c6   :  { %2461 = vrsqrt.f32 %v2060_v3  ;;  %v1521_v37 = vmul.f32 0.00390625, %v3929_v34 }
 0x2c8   :  { %v1522_v59 = vadd.f32 1e-05, %v1521_v37 }
 0x2c9   :  { %v1008_v60 = vpop.permute.xlu1 %1007 }
 0x2ca   :  { %2463 = vrsqrt.f32 %v1522_v59 }
 0x2cd   :  { %v2460_v45 = vpop.eup %2459  ;;  %v3931_v63 = vpop.permute.xlu1 %1061 }
 0x2ce   :  { %v1004_v43 = vmul.f32 %v2460_v45, %v3836_v18  ;;  %v1005_v29 = vmul.f32 %v2460_v45, %v3838_v54 }
 0x2d0   :  { %v2462_v46 = vpop.eup %2461  ;;  %v1010_v6 = vmul.f32 %v1008_v60, %v1004_v43  ;;  %v1011_v30 = vmul.f32 %v1008_v60, %v1005_v29 }
 0x2d1   :  { %v2062_v61 = vmul.f32 %v2462_v46, %v3844_v44  ;;  %v3936_v14 = vpop.permute.xlu1 %1032  ;;  %v2063_v47 = vmul.f32 %v2462_v46, %v3846_v20 }
 0x2d2   :  { %v1016_v22 = vadd.f32 %v1014_v25, %v1010_v6  ;;  %v1017_v49 = vadd.f32 %v1014_v25, %v1011_v30 }
 0x2d3   :  { %v2064_v56 = vmul.f32 %v2062_v61, %v1008_v60  ;;  %v2065_v54 = vmul.f32 %v2063_v47, %v1008_v60 }
 0x2d4   :  { %1049 = vrot.lane.b32.xlu0 %v1017_v49, %s2485_s30  ;;  %1047 = vrot.lane.b32.xlu1 %v1016_v22, %s2485_s30  ;;  %v1189_v9 = vrot.slane %v1016_v22, 1  ;;  %v1190_v39 = vrot.slane %v1017_v49, 1  ;;  %v2464_v29 = vpop.eup %2463 }
 0x2d5   :  { %v2066_v48 = vadd.f32 %v2064_v56, %v1014_v25  ;;  %v3941_v18 = vpop.permute.xlu1 %1141  ;;  %v2067_v44 = vadd.f32 %v2065_v54, %v1014_v25  ;;  %v1056_v25 = vpop.permute.xlu0 %1055  ;;  %v1524_v46 = vmul.f32 %v2464_v29, %v3854_v21  ;;  %v1525_v6 = vmul.f32 %v2464_v29, %v3856_v62 }
 0x2d7   :  { %v2194_v4 = vrot.slane %v2066_v48, 1  ;;  %v2195_v35 = vrot.slane %v2067_v44, 1  ;;  %v1526_v56 = vmul.f32 %v1524_v46, %v4529_v7 }
 0x2d8   :  { %1090 = vrot.lane.b32.xlu0 %v1016_v22, %s2486_s0  ;;  %2088 = vrot.lane.b32.xlu1 %v2066_v48, %s2485_s30 }
 0x2da   :  { %v3945_v5 = vpop.permute.xlu1 %1213 }
 0x2dc   :  { %2122 = vrot.lane.b32.xlu0 %v2066_v48, %s2486_s0  ;;  %2090 = vrot.lane.b32.xlu1 %v2067_v44, %s2485_s30 }
 0x2df   :  { %v3949_v20 = vpop.permute.xlu1 %1250 }
 0x2e0   :  { %1018 = vrot.lane.b32.xlu0 %v1016_v22, %s2484_s25  ;;  %1092 = vrot.lane.b32.xlu1 %v1017_v49, %s2486_s0 }
 0x2e3   :  { %v1179_v32 = vpop.permute.xlu1 %1178 }
 0x2e4   :  { %v1181_v16 = vmul.f32 %v1179_v32, %v1016_v22  ;;  %v2190_v28 = vmul.f32 %v2066_v48, %v1179_v32  ;;  %1133 = vrot.lane.b32.xlu0 %v1016_v22, %s2488_s2  ;;  %2124 = vrot.lane.b32.xlu1 %v2067_v44, %s2486_s0  ;;  %v1182_v40 = vmul.f32 %v1179_v32, %v1017_v49 }
 0x2e5   :  { %v2191_v12 = vmul.f32 %v2067_v44, %v1179_v32 }
 0x2e8   :  { %2070 = vrot.lane.b32.xlu0 %v2067_v44, %s2484_s25  ;;  %v1185_v8 = vpop.permute.xlu1 %1184  ;;  %1020 = vrot.lane.b32.xlu1 %v1017_v49, %s2484_s25 }
 0x2e9   :  { %v1193_v2 = vmul.f32 %v1189_v9, %v1185_v8  ;;  %v1194_v41 = vmul.f32 %v1190_v39, %v1185_v8  ;;  %v2198_v23 = vmul.f32 %v2194_v4, %v1185_v8  ;;  %v2199_v11 = vmul.f32 %v2195_v35, %v1185_v8 }
 0x2eb   :  { %v3957_v33 = vadd.f32 %v1193_v2, %v1181_v16  ;;  %v3959_v57 = vadd.f32 %v1194_v41, %v1182_v40  ;;  %v3961_v55 = vadd.f32 %v2198_v23, %v2190_v28  ;;  %v3963_v26 = vadd.f32 %v2199_v11, %v2191_v12 }
 0x2ec   :  { %2158 = vrot.lane.b32.xlu0 %v2067_v44, %s2488_s2  ;;  %1135 = vrot.lane.b32.xlu1 %v1017_v49, %s2488_s2  ;;  %v4009_v60 = vpop.permute.xlu1 %1299  ;;  %v1528_v28 = vadd.f32 %v1526_v56, %v4530_v13 }
 0x2ee   :  { %v1533_v11 = vrot.slane %v1528_v28, %v2702_v36 }
 0x2f0   :  { %1199 = vrot.lane.b32.xlu0 %v1016_v22, %s2489_s15  ;;  %2068 = vrot.lane.b32.xlu1 %v2066_v48, %s2484_s25 }
 0x2f1   :  { %v4011_v45 = vpop.permute.xlu1 %1336 }
 0x2f4   :  { %2206 = vrot.lane.b32.xlu0 %v2067_v44, %s2489_s15  ;;  %2156 = vrot.lane.b32.xlu1 %v2066_v48, %s2488_s2 }
 0x2f8   :  { %1244 = vrot.lane.b32.xlu0 %v1017_v49, %s2490_s29  ;;  %1201 = vrot.lane.b32.xlu1 %v1017_v49, %s2489_s15 }
 0x2fc   :  { %2240 = vrot.lane.b32.xlu0 %v2067_v44, %s2490_s29  ;;  %2204 = vrot.lane.b32.xlu1 %v2066_v48, %s2489_s15 }
 0x300   :  { %1287 = vrot.lane.b32.xlu0 %v1017_v49, %s2491_s9  ;;  %1242 = vrot.lane.b32.xlu1 %v1016_v22, %s2490_s29 }
 0x304   :  { %2274 = vrot.lane.b32.xlu0 %v2067_v44, %s2491_s9  ;;  %2238 = vrot.lane.b32.xlu1 %v2066_v48, %s2490_s29 }
 0x308   :  { %1342 = vperm.xlu0 %2448, %v3908_v1   ;;  %1285 = vrot.lane.b32.xlu1 %v1016_v22, %s2491_s9  ;;  %v3993_v1 = vpop.permute.xlu0 %1098 }
 0x30c   :  { %2306 = vrot.lane.b32.xlu0 %v2066_v48, %s2492_s10  ;;  %2272 = vrot.lane.b32.xlu1 %v2066_v48, %s2491_s9  ;;  %v3996_v24 = vpop.permute.xlu0 %1026  ;;  %v1527_v48 = vmul.f32 %v1525_v6, %v4529_v7 }
 0x30d   :  { %2450 = vset.pattern.permute.xlu0 %v4527_v50 }
 0x30e   :  { %v1529_v9 = vadd.f32 %v1527_v48, %v4530_v13 }
 0x310   :  { %1361 = vperm.xlu0 %2450, %v3987_v31   ;;  %1328 = vrot.lane.b32.xlu1 %v1016_v22, %s2492_s10  ;;  %v3998_v50 = vpop.permute.xlu0 %1207  ;;  %v1537_v37 = vrot.slane %v1529_v9, %v2702_v36 }
 0x314   :  { %2451 = vset.pattern.permute.xlu0 %v4528_v51  ;;  %1330 = vrot.lane.b32.xlu1 %v1017_v49, %s2492_s10  ;;  %v4000_v17 = vpop.permute.xlu0 %1293 }
 0x318   :  { %2308 = vrot.lane.b32.xlu1 %v2067_v44, %s2492_s10  ;;  %v4002_v52 = vpop.permute.xlu0 %1104 }
 0x31c   :  { %v4005_v3 = vpop.permute.xlu0 %1147 }
 0x320   :  { %v4007_v51 = vpop.permute.xlu0 %1256 }
 0x324   :  { %v4013_v43 = vpop.xlane.xlu0 %259 }
 0x346   :  { %v1048_v30 = vpop.permute.xlu1 %1047  ;;  %v1050_v61 = vpop.permute.xlu0 %1049 }
 0x347   :  { %v1051_v34 = vsel %vm374_vm2, %v1048_v30, %v1050_v61  ;;  %v1052_v47 = vsel %vm374_vm2, %v1050_v61, %v1048_v30 }
 0x348   :  { %v1066_v22 = vrot.slane %v1052_v47, 1  ;;  %v1067_v49 = vrot.slane %v1051_v34, 1  ;;  %v1058_v39 = vmul.f32 %v1056_v25, %v1052_v47  ;;  %v1059_v4 = vmul.f32 %v1056_v25, %v1051_v34 }
 0x34a   :  { %v2089_v54 = vpop.permute.xlu1 %2088  ;;  %v1091_v44 = vpop.permute.xlu0 %1090  ;;  %v1070_v21 = vmul.f32 %v1066_v22, %v3931_v63  ;;  %v1071_v62 = vmul.f32 %v1067_v49, %v3931_v63 }
 0x34c   :  { %v1072_v40 = vadd.f32 %v1070_v21, %v1058_v39  ;;  %v1073_v12 = vadd.f32 %v1071_v62, %v1059_v4 }
 0x34e   :  { %v2091_v32 = vpop.permute.xlu1 %2090  ;;  %v2123_v16 = vpop.permute.xlu0 %2122  ;;  %v1076_v47 = vrot.slane %v1072_v40, 7  ;;  %v1077_v22 = vrot.slane %v1073_v12, 7  ;;  %v4052_v40 = vld [vmem:[%s4302_s1] sm:$0xff] }
 0x34f   :  { %v2092_v35 = vsel %vm374_vm2, %v2089_v54, %v2091_v32  ;;  %v2093_v7 = vsel %vm374_vm2, %v2091_v32, %v2089_v54 }
 0x350   :  { %v2098_v8 = vrot.slane %v2093_v7, 1  ;;  %v2099_v2 = vrot.slane %v2092_v35, 1  ;;  %v2094_v6 = vmul.f32 %v2093_v7, %v1056_v25  ;;  %v2095_v30 = vmul.f32 %v2092_v35, %v1056_v25 }
 0x351   :  { %v1547_v25 = vrot.slane %v1529_v9, %v2706_v38  ;;  %v4055_v12 = vmul.f32 %v4052_v40, %v1076_v47  ;;  %v4066_v9 = vmul.f32 %v1533_v11, %v3634_v15 }
 0x352   :  { %v1093_v41 = vpop.permute.xlu1 %1092  ;;  %v1019_v23 = vpop.permute.xlu0 %1018  ;;  %v2102_v13 = vmul.f32 %v2098_v8, %v3931_v63  ;;  %v2103_v59 = vmul.f32 %v2099_v2, %v3931_v63 }
 0x353   :  { %v1094_v29 = vsel %vm456_vm3, %v1091_v44, %v1093_v41  ;;  %v1095_v46 = vsel %vm456_vm3, %v1093_v41, %v1091_v44  ;;  %v1543_v44 = vrot.slane %v1528_v28, %v2706_v38  ;;  %v4060_v38 = vld [vmem:[%s4302_s1 + $0x8] sm:$0xff]  ;;  %v1084_v47 = vrot.slane %v4055_v12, 1 }
 0x354   :  { %v1109_v61 = vrot.slane %v1095_v46, 1  ;;  %v1110_v34 = vrot.slane %v1094_v29, 1  ;;  %v1101_v49 = vmul.f32 %v3993_v1, %v1095_v46  ;;  %v1102_v56 = vmul.f32 %v3993_v1, %v1094_v29 }
 0x355   :  { %v2104_v48 = vadd.f32 %v2102_v13, %v2094_v6  ;;  %v2105_v54 = vadd.f32 %v2103_v59, %v2095_v30  ;;  %v4063_v28 = vmul.f32 %v4060_v38, %v1077_v22  ;;  %v4072_v30 = vmul.f32 %v1543_v44, %v4531_v53 }
 0x356   :  { %v1113_v63 = vmul.f32 %v1109_v61, %v4002_v52  ;;  %v1114_v21 = vmul.f32 %v1110_v34, %v4002_v52  ;;  %v1134_v62 = vpop.permute.xlu0 %1133  ;;  %v2125_v32 = vpop.permute.xlu1 %2124  ;;  %v4075_v61 = vmul.f32 %v1547_v25, %v4531_v53 }
 0x357   :  { %v2126_v35 = vsel %vm456_vm3, %v2123_v16, %v2125_v32  ;;  %v2127_v7 = vsel %vm456_vm3, %v2125_v32, %v2123_v16  ;;  %v4069_v16 = vmul.f32 %v1537_v37, %v3634_v15  ;;  %v2108_v8 = vrot.slane %v2104_v48, 7 }
 0x358   :  { %v1115_v39 = vadd.f32 %v1113_v63, %v1101_v49  ;;  %v1116_v4 = vadd.f32 %v1114_v21, %v1102_v56  ;;  %v2109_v2 = vrot.slane %v2105_v54, 7  ;;  %v2132_v41 = vrot.slane %v2127_v7, 1 }
 0x359   :  { %v2133_v13 = vrot.slane %v2126_v35, 1  ;;  %v2128_v11 = vmul.f32 %v2127_v7, %v3993_v1  ;;  %v2129_v34 = vmul.f32 %v2126_v35, %v3993_v1  ;;  %v1085_v22 = vrot.slane %v4063_v28, 1 }
 0x35a   :  { %v2071_v59 = vpop.permute.xlu0 %2070  ;;  %v1119_v29 = vrot.slane %v1115_v39, 6  ;;  %v1120_v46 = vrot.slane %v1116_v4, 6  ;;  %v1021_v6 = vpop.permute.xlu1 %1020  ;;  %v2136_v15 = vmul.f32 %v2132_v41, %v4002_v52  ;;  %v4088_v53 = vmul.f32 %v4052_v40, %v2108_v8 }
 0x35b   :  { %v2137_v37 = vmul.f32 %v2133_v13, %v4002_v52  ;;  %v1022_v49 = vsel %vm294_vm1, %v1019_v23, %v1021_v6  ;;  %v1023_v56 = vsel %vm294_vm1, %v1021_v6, %v1019_v23  ;;  %v4091_v48 = vmul.f32 %v4060_v38, %v2109_v2 }
 0x35c   :  { %v2138_v1 = vadd.f32 %v2136_v15, %v2128_v11  ;;  %v4094_v52 = vmul.f32 %v4052_v40, %v1119_v29  ;;  %v4097_v21 = vmul.f32 %v4060_v38, %v1120_v46  ;;  %v1037_v32 = vrot.slane %v1023_v56, 1 }
 0x35d   :  { %v2139_v54 = vadd.f32 %v2137_v37, %v2129_v34  ;;  %v1038_v44 = vrot.slane %v1022_v49, 1  ;;  %v1029_v7 = vmul.f32 %v3996_v24, %v1023_v56  ;;  %v1030_v12 = vmul.f32 %v3996_v24, %v1022_v49 }
 0x35e   :  { %v2159_v63 = vpop.permute.xlu0 %2158  ;;  %v1136_v25 = vpop.permute.xlu1 %1135  ;;  %v2142_v39 = vrot.slane %v2138_v1, 6  ;;  %v1041_v28 = vmul.f32 %v1037_v32, %v3936_v14  ;;  %v2116_v2 = vrot.slane %v4088_v53, 1  ;;  %v2117_v41 = vrot.slane %v4091_v48, 1 }
 0x35f   :  { %v2143_v23 = vrot.slane %v2139_v54, 6  ;;  %v1137_v4 = vsel %vm538_vm4, %v1134_v62, %v1136_v25  ;;  %v1138_v35 = vsel %vm538_vm4, %v1136_v25, %v1134_v62  ;;  %v1042_v8 = vmul.f32 %v1038_v44, %v3936_v14 }
 0x360   :  { %v1152_v13 = vrot.slane %v1138_v35, 1  ;;  %v1153_v29 = vrot.slane %v1137_v4, 1  ;;  %v4110_v46 = vmul.f32 %v4052_v40, %v2142_v39  ;;  %v1043_v62 = vadd.f32 %v1041_v28, %v1029_v7 }
 0x361   :  { %v4113_v6 = vmul.f32 %v4060_v38, %v2143_v23  ;;  %v1044_v11 = vadd.f32 %v1042_v8, %v1030_v12  ;;  %v1144_v15 = vmul.f32 %v3941_v18, %v1138_v35  ;;  %v1145_v37 = vmul.f32 %v3941_v18, %v1137_v4 }
 0x362   :  { %v2069_v34 = vpop.permute.xlu1 %2068  ;;  %v1156_v49 = vmul.f32 %v1152_v13, %v4005_v3  ;;  %v1157_v56 = vmul.f32 %v1153_v29, %v4005_v3  ;;  %v1200_v53 = vpop.permute.xlu0 %1199  ;;  %v1127_v48 = vrot.slane %v4094_v52, 2  ;;  %v1128_v1 = vrot.slane %v4097_v21, 2 }
 0x363   :  { %v2072_v54 = vsel %vm294_vm1, %v2069_v34, %v2071_v59  ;;  %v2073_v32 = vsel %vm294_vm1, %v2071_v59, %v2069_v34  ;;  %v1045_v44 = vmul.f32 %v4052_v40, %v1043_v62  ;;  %v1046_v25 = vmul.f32 %v4060_v38, %v1044_v11 }
 0x364   :  { %v1158_v39 = vadd.f32 %v1156_v49, %v1144_v15  ;;  %v1159_v23 = vadd.f32 %v1157_v56, %v1145_v37  ;;  %v2150_v4 = vrot.slane %v4110_v46, 2  ;;  %v2151_v35 = vrot.slane %v4113_v6, 2 }
 0x365   :  { %v2078_v7 = vrot.slane %v2073_v32, 1  ;;  %v2079_v52 = vrot.slane %v2072_v54, 1  ;;  %v2074_v13 = vmul.f32 %v2073_v32, %v3996_v24  ;;  %v2075_v29 = vmul.f32 %v2072_v54, %v3996_v24 }
 0x366   :  { %v2157_v12 = vpop.permute.xlu1 %2156  ;;  %v1162_v21 = vrot.slane %v1158_v39, 5  ;;  %v1163_v28 = vrot.slane %v1159_v23, 5  ;;  %v1088_v6 = vadd.f32 %v1084_v47, %v1045_v44  ;;  %v1089_v11 = vadd.f32 %v1085_v22, %v1046_v25  ;;  %v2207_v37 = vpop.permute.xlu0 %2206 }
 0x367   :  { %v2160_v8 = vsel %vm538_vm4, %v2157_v12, %v2159_v63  ;;  %v2161_v59 = vsel %vm538_vm4, %v2159_v63, %v2157_v12  ;;  %v2082_v62 = vmul.f32 %v2078_v7, %v3936_v14  ;;  %v2083_v46 = vmul.f32 %v2079_v52, %v3936_v14 }
 0x368   :  { %v1166_v34 = vmul.f32 %v4052_v40, %v1162_v21  ;;  %v1167_v15 = vmul.f32 %v4060_v38, %v1163_v28  ;;  %v2166_v39 = vrot.slane %v2161_v59, 1  ;;  %v2167_v23 = vrot.slane %v2160_v8, 1 }
 0x369   :  { %v2084_v49 = vadd.f32 %v2082_v62, %v2074_v13  ;;  %v2085_v56 = vadd.f32 %v2083_v46, %v2075_v29  ;;  %v2162_v32 = vmul.f32 %v2161_v59, %v3941_v18  ;;  %v2163_v24 = vmul.f32 %v2160_v8, %v3941_v18 }
 0x36a   :  { %v1202_v63 = vpop.permute.xlu1 %1201  ;;  %v2170_v44 = vmul.f32 %v2166_v39, %v4005_v3  ;;  %v2171_v25 = vmul.f32 %v2167_v23, %v4005_v3  ;;  %v1131_v7 = vadd.f32 %v1127_v48, %v1088_v6  ;;  %v1132_v52 = vadd.f32 %v1128_v1, %v1089_v11 }
 0x36b   :  { %v1203_v54 = vsel %vm653_vm5, %v1200_v53, %v1202_v63  ;;  %v1204_v14 = vsel %vm653_vm5, %v1202_v63, %v1200_v53  ;;  %v2086_v47 = vmul.f32 %v4052_v40, %v2084_v49  ;;  %v2087_v22 = vmul.f32 %v4060_v38, %v2085_v56  ;;  %v1245_v49 = vpop.permute.xlu0 %1244 }
 0x36c   :  { %v1170_v12 = vrot.slane %v1166_v34, 3  ;;  %v1171_v21 = vrot.slane %v1167_v15, 3  ;;  %v2172_v8 = vadd.f32 %v2170_v44, %v2162_v32  ;;  %v2173_v59 = vadd.f32 %v2171_v25, %v2163_v24 }
 0x36d   :  { %v2120_v28 = vadd.f32 %v2116_v2, %v2086_v47  ;;  %v2121_v18 = vadd.f32 %v2117_v41, %v2087_v22  ;;  %v1210_v29 = vmul.f32 %v3998_v50, %v1203_v54  ;;  %v1211_v53 = vmul.f32 %v3998_v50, %v1204_v14 }
 0x36e   :  { %v2205_v13 = vpop.permute.xlu1 %2204  ;;  %v1218_v62 = vrot.slane %v1203_v54, 1  ;;  %v1219_v46 = vrot.slane %v1204_v14, 1  ;;  %v2176_v63 = vrot.slane %v2172_v8, 5  ;;  %v2177_v3 = vrot.slane %v2173_v59, 5 }
 0x36f   :  { %v2154_v56 = vadd.f32 %v2150_v4, %v2120_v28  ;;  %v2155_v39 = vadd.f32 %v2151_v35, %v2121_v18  ;;  %v2208_v2 = vsel %vm653_vm5, %v2205_v13, %v2207_v37  ;;  %v2209_v41 = vsel %vm653_vm5, %v2207_v37, %v2205_v13 }
 0x370   :  { %v1222_v48 = vmul.f32 %v1218_v62, %v3945_v5  ;;  %v1223_v1 = vmul.f32 %v1219_v46, %v3945_v5  ;;  %v2180_v6 = vmul.f32 %v4052_v40, %v2176_v63  ;;  %v2181_v11 = vmul.f32 %v4060_v38, %v2177_v3 }
 0x371   :  { %v2210_v34 = vmul.f32 %v2208_v2, %v3998_v50  ;;  %v2211_v4 = vmul.f32 %v2209_v41, %v3998_v50  ;;  %v2214_v32 = vrot.slane %v2208_v2, 1  ;;  %v2215_v24 = vrot.slane %v2209_v41, 1  ;;  %v2241_v50 = vpop.permute.xlu0 %2240 }
 0x372   :  { %v1243_v35 = vpop.permute.xlu1 %1242  ;;  %v1224_v15 = vadd.f32 %v1222_v48, %v1210_v29  ;;  %v1225_v23 = vadd.f32 %v1223_v1, %v1211_v53  ;;  %v2184_v54 = vrot.slane %v2180_v6, 3  ;;  %v2185_v14 = vrot.slane %v2181_v11, 3 }
 0x373   :  { %v1246_v47 = vsel %vm735_vm6, %v1243_v35, %v1245_v49  ;;  %v1247_v37 = vsel %vm735_vm6, %v1245_v49, %v1243_v35  ;;  %v2218_v25 = vmul.f32 %v2214_v32, %v3945_v5  ;;  %v2219_v28 = vmul.f32 %v2215_v24, %v3945_v5 }
 0x374   :  { %v1228_v22 = vrot.slane %v1224_v15, 3  ;;  %v1229_v44 = vrot.slane %v1225_v23, 3  ;;  %v1174_v18 = vadd.f32 %v1170_v12, %v1131_v7  ;;  %v1175_v8 = vadd.f32 %v1171_v21, %v1132_v52 }
 0x375   :  { %v4169_v13 = vadd.f32 %v4072_v30, %v4066_v9  ;;  %v4173_v29 = vadd.f32 %v4075_v61, %v4069_v16  ;;  %v2188_v53 = vadd.f32 %v2184_v54, %v2154_v56  ;;  %v2189_v62 = vadd.f32 %v2185_v14, %v2155_v39  ;;  %v1288_v6 = vpop.permute.xlu0 %1287 }
 0x376   :  { %v2239_v59 = vpop.permute.xlu1 %2238  ;;  %v2220_v46 = vadd.f32 %v2218_v25, %v2210_v34  ;;  %v2221_v49 = vadd.f32 %v2219_v28, %v2211_v4  ;;  %v1253_v63 = vmul.f32 %v3949_v20, %v1246_v47  ;;  %v1254_v5 = vmul.f32 %v3949_v20, %v1247_v37 }
 0x377   :  { %v1261_v3 = vrot.slane %v1246_v47, 1  ;;  %v1262_v7 = vrot.slane %v1247_v37, 1  ;;  %v1232_v52 = vmul.f32 %v4052_v40, %v1228_v22  ;;  %v1233_v12 = vmul.f32 %v4060_v38, %v1229_v44 }
 0x378   :  { %v2224_v9 = vrot.slane %v2220_v46, 3  ;;  %v2225_v30 = vrot.slane %v2221_v49, 3  ;;  %v2242_v61 = vsel %vm735_vm6, %v2239_v59, %v2241_v50  ;;  %v2243_v56 = vsel %vm735_vm6, %v2241_v50, %v2239_v59 }
 0x379   :  { %v1265_v21 = vmul.f32 %v1261_v3, %v4007_v51  ;;  %v1266_v16 = vmul.f32 %v1262_v7, %v4007_v51  ;;  %v1197_v48 = vadd.f32 %v3957_v33, %v1174_v18  ;;  %v1198_v1 = vadd.f32 %v3959_v57, %v1175_v8  ;;  %v2275_v59 = vpop.permute.xlu0 %2274 }
 0x37a   :  { %v1286_v39 = vpop.permute.xlu1 %1285  ;;  %v2202_v2 = vadd.f32 %v3961_v55, %v2188_v53  ;;  %v2203_v41 = vadd.f32 %v3963_v26, %v2189_v62  ;;  %v2228_v11 = vmul.f32 %v4052_v40, %v2224_v9  ;;  %v2229_v34 = vmul.f32 %v4060_v38, %v2225_v30 }
 0x37b   :  { %v1267_v4 = vadd.f32 %v1265_v21, %v1253_v63  ;;  %v1268_v35 = vadd.f32 %v1266_v16, %v1254_v5  ;;  %v1236_v15 = vrot.slane %v1232_v52, 5  ;;  %v1237_v23 = vrot.slane %v1233_v12, 5 }
 0x37c   :  { %v2248_v32 = vrot.slane %v2242_v61, 1  ;;  %v2249_v24 = vrot.slane %v2243_v56, 1  ;;  %v1289_v33 = vsel %vm817_vm7, %v1286_v39, %v1288_v6  ;;  %v1290_v57 = vsel %vm817_vm7, %v1288_v6, %v1286_v39 }
 0x37d   :  { %v1271_v54 = vrot.slane %v1267_v4, 2  ;;  %v1272_v14 = vrot.slane %v1268_v35, 2  ;;  %v2244_v26 = vmul.f32 %v2242_v61, %v3949_v20  ;;  %v2245_v47 = vmul.f32 %v2243_v56, %v3949_v20 }
 0x37e   :  { %v2273_v55 = vpop.permute.xlu1 %2272  ;;  %v2252_v37 = vmul.f32 %v2248_v32, %v4007_v51  ;;  %v2253_v22 = vmul.f32 %v2249_v24, %v4007_v51  ;;  %v2232_v44 = vrot.slane %v2228_v11, 5  ;;  %v2233_v25 = vrot.slane %v2229_v34, 5 }
 0x37f   :  { %v1275_v28 = vmul.f32 %v4052_v40, %v1271_v54  ;;  %v1276_v50 = vmul.f32 %v4060_v38, %v1272_v14  ;;  %v1304_v53 = vrot.slane %v1289_v33, 1  ;;  %v1305_v62 = vrot.slane %v1290_v57, 1 }
 0x380   :  { %v2254_v18 = vadd.f32 %v2252_v37, %v2244_v26  ;;  %v2255_v8 = vadd.f32 %v2253_v22, %v2245_v47  ;;  %v1296_v46 = vmul.f32 %v4000_v17, %v1289_v33  ;;  %v1297_v49 = vmul.f32 %v4000_v17, %v1290_v57 }
 0x381   :  { %v2276_v20 = vsel %vm817_vm7, %v2273_v55, %v2275_v59  ;;  %v2277_v51 = vsel %vm817_vm7, %v2275_v59, %v2273_v55  ;;  %v1308_v7 = vmul.f32 %v1304_v53, %v4009_v60  ;;  %v1309_v52 = vmul.f32 %v1305_v62, %v4009_v60 }
 0x382   :  { %v1329_v63 = vpop.permute.xlu1 %1328  ;;  %v2258_v5 = vrot.slane %v2254_v18, 2  ;;  %v2259_v3 = vrot.slane %v2255_v8, 2  ;;  %v1240_v12 = vadd.f32 %v1236_v15, %v1197_v48  ;;  %v1241_v9 = vadd.f32 %v1237_v23, %v1198_v1 }
 0x383   :  { %v2236_v30 = vadd.f32 %v2232_v44, %v2202_v2  ;;  %v2237_v21 = vadd.f32 %v2233_v25, %v2203_v41  ;;  %v1279_v16 = vrot.slane %v1275_v28, 6  ;;  %v1280_v61 = vrot.slane %v1276_v50, 6 }
 0x384   :  { %v1310_v56 = vadd.f32 %v1308_v7, %v1296_v46  ;;  %v1311_v39 = vadd.f32 %v1309_v52, %v1297_v49  ;;  %v2262_v6 = vmul.f32 %v4052_v40, %v2258_v5  ;;  %v2263_v11 = vmul.f32 %v4060_v38, %v2259_v3 }
 0x385   :  { %v2282_v34 = vrot.slane %v2276_v20, 1  ;;  %v2283_v4 = vrot.slane %v2277_v51, 1  ;;  %v2278_v14 = vmul.f32 %v2276_v20, %v4000_v17  ;;  %v2279_v48 = vmul.f32 %v2277_v51, %v4000_v17 }
 0x386   :  { %v1331_v35 = vpop.permute.xlu1 %1330  ;;  %v1314_v24 = vrot.slane %v1310_v56, 1  ;;  %v1315_v54 = vrot.slane %v1311_v39, 1  ;;  %v1283_v23 = vadd.f32 %v1279_v16, %v1240_v12  ;;  %v1284_v33 = vadd.f32 %v1280_v61, %v1241_v9 }
 0x387   :  { %v1343_v32 = vpop.permute.xlu0 %1342  ;;  %v2286_v1 = vmul.f32 %v2282_v34, %v4009_v60  ;;  %v2287_v2 = vmul.f32 %v2283_v4, %v4009_v60  ;;  %v1332_v41 = vsel %vm899_vm8, %v1329_v63, %v1331_v35  ;;  %v1333_v15 = vsel %vm899_vm8, %v1331_v35, %v1329_v63 }
 0x388   :  { %v1318_v57 = vmul.f32 %v4052_v40, %v1314_v24  ;;  %v1319_v55 = vmul.f32 %v4060_v38, %v1315_v54  ;;  %v2266_v26 = vrot.slane %v2262_v6, 6  ;;  %v2267_v47 = vrot.slane %v2263_v11, 6 }
 0x389   :  { %v2288_v37 = vadd.f32 %v2286_v1, %v2278_v14  ;;  %v2289_v17 = vadd.f32 %v2287_v2, %v2279_v48  ;;  %v1339_v60 = vmul.f32 %v4011_v45, %v1332_v41  ;;  %v1340_v25 = vmul.f32 %v4011_v45, %v1333_v15 }
 0x38a   :  { %v2309_v22 = vpop.permute.xlu1 %2308  ;;  %v1347_v28 = vrot.slane %v1332_v41, 1  ;;  %v1348_v50 = vrot.slane %v1333_v15, 1  ;;  %v1322_v62 = vrot.slane %v1318_v57, 7  ;;  %v1323_v46 = vrot.slane %v1319_v55, 7 }
 0x38b   :  { %v2307_v44 = vpop.permute.xlu0 %2306  ;;  %v2292_v18 = vrot.slane %v2288_v37, 1  ;;  %v2293_v8 = vrot.slane %v2289_v17, 1  ;;  %v2270_v4 = vadd.f32 %v2266_v26, %v2236_v30  ;;  %v2271_v35 = vadd.f32 %v2267_v47, %v2237_v21 }
 0x38c   :  { %v2310_v59 = vsel %vm899_vm8, %v2307_v44, %v2309_v22  ;;  %v2311_v53 = vsel %vm899_vm8, %v2309_v22, %v2307_v44  ;;  %v1351_v49 = vmul.f32 %v1347_v28, %v1343_v32  ;;  %v1352_v20 = vmul.f32 %v1348_v50, %v1343_v32 }
 0x38d   :  { %v2296_v51 = vmul.f32 %v4052_v40, %v2292_v18  ;;  %v2297_v63 = vmul.f32 %v4060_v38, %v2293_v8  ;;  %v2316_v5 = vrot.slane %v2310_v59, 1  ;;  %v2317_v3 = vrot.slane %v2311_v53, 1  ;;  %v2476_v40 = vld [vmem:[%s4302_s1 + $0x10] sm:$0x1]  ;;  %v2477_v38 = vld [vmem:[%s4302_s1 + $0x18] sm:$0x1] }
 0x38e   :  { %v1353_v7 = vadd.f32 %v1351_v49, %v1339_v60  ;;  %v1354_v52 = vadd.f32 %v1352_v20, %v1340_v25  ;;  %v2312_v12 = vmul.f32 %v2310_v59, %v4011_v45  ;;  %v2313_v9 = vmul.f32 %v2311_v53, %v4011_v45 }
 0x38f   :  { %v2300_v16 = vrot.slane %v2296_v51, 7  ;;  %v2301_v61 = vrot.slane %v2297_v63, 7  ;;  %v2320_v10 = vmul.f32 %v2316_v5, %v1343_v32  ;;  %v2321_v56 = vmul.f32 %v2317_v3, %v1343_v32  ;;  %v1362_v54 = vpop.permute.xlu0 %1361 }
 0x390   :  { %v1326_v39 = vadd.f32 %v1322_v62, %v1283_v23  ;;  %v1327_v6 = vadd.f32 %v1323_v46, %v1284_v33  ;;  %v1355_v11 = vmul.f32 %v2476_v40, %v1353_v7  ;;  %v1356_v34 = vmul.f32 %v2477_v38, %v1354_v52 }
 0x391   :  { %v2322_v24 = vadd.f32 %v2320_v10, %v2312_v12  ;;  %v2323_v45 = vadd.f32 %v2321_v56, %v2313_v9  ;;  %v1552_v32 = vadd.f32 %v4169_v13, %v4532_v42  ;;  %v2304_v41 = vadd.f32 %v2300_v16, %v2270_v4  ;;  %v2478_v10 = vld [vmem:[%s4299_s3 + $0x8] sm:$0xff] }
 0x392   :  { %v1357_v14 = vadd.f32 %v1355_v11, %v1326_v39  ;;  %v1358_v48 = vadd.f32 %v1356_v34, %v1327_v6  ;;  %v2305_v15 = vadd.f32 %v2301_v61, %v2271_v35  ;;  %v261_v23 = vmul.f32 0.00390625, %v4013_v43 }
 0x393   :  { %v2324_v1 = vmul.f32 %v2476_v40, %v2322_v24  ;;  %v2325_v2 = vmul.f32 %v2477_v38, %v2323_v45  ;;  %v1553_v30 = vadd.f32 %v4173_v29, %v4532_v42  ;;  %v1554_v22 = vmax.f32 %v1552_v32, 0.0 }
 0x394   :  { %v1364_v33 = vadd.f32 %v1362_v54, %v1357_v14  ;;  %v1365_v57 = vadd.f32 %v1362_v54, %v1358_v48  ;;  %v4244_v13 = vsub.f32 %v256_v19, %v261_v23  ;;  %v4248_v43 = vsub.f32 %v257_v0, %v261_v23 }
 0x395   :  { %v2326_v55 = vadd.f32 %v2324_v1, %v2304_v41  ;;  %v2327_v37 = vadd.f32 %v2325_v2, %v2305_v15  ;;  %v1555_v29 = vmax.f32 %v1553_v30, 0.0  ;;  %v4533_v56 = vmov 2  }
 0x396   :  { %v1366_v21 = vmax.f32 %v1364_v33, 0.0  ;;  %v1367_v26 = vmax.f32 %v1365_v57, 0.0  ;;  %v264_v58 = vmul.f32 %v4244_v13, %v4244_v13  ;;  %v265_v27 = vmul.f32 %v4248_v43, %v4248_v43 }
 0x397   :  { %v2328_v47 = vadd.f32 %v2326_v55, %v1362_v54  ;;  %v2329_v17 = vadd.f32 %v2327_v37, %v1362_v54  ;;  %v1556_v0 = vadd.f32 %v1555_v29, %v1554_v22 }
 0x398   :  { %v1369_v44 = vsel %vm1368_vm9, %v1366_v21, 0.0  ;;  %v1370_v60 = vsel %vm1368_vm9, %v1367_v26, 0.0  ;;  %v266_v8 = vadd.f32 %v265_v27, %v264_v58 }
 0x399   :  { %v2330_v25 = vmax.f32 %v2328_v47, 0.0  ;;  %v2331_v28 = vmax.f32 %v2329_v17, 0.0  ;;  %v1371_v42 = vadd.f32 %v1370_v60, %v1369_v44 }
 0x39b   :  { %1372 = vadd.xlane.f32.xlu1 %v1371_v42  ;;  %v2332_v50 = vsel %vm1368_vm9, %v2330_v25, 0.0  ;;  %v2333_v18 = vsel %vm1368_vm9, %v2331_v28, 0.0 }
 0x39c   :  { %v2334_v19 = vadd.f32 %v2333_v18, %v2332_v50 }
 0x39e   :  { %2335 = vadd.xlane.f32.xlu0 %v2334_v19 }
 0x39f   :  { %1557 = vadd.xlane.f32.xlu1 %v1556_v0 }
 0x3a2   :  { %267 = vadd.xlane.f32.xlu0 %v266_v8 }
 0x428   :  { %v1373_v59 = vpop.xlane.xlu1 %1372 }
 0x429   :  { %v1374_v53 = vmul.f32 0.00390625, %v1373_v59 }
 0x42b   :  { %v1375_v62 = vsub.f32 %v1366_v21, %v1374_v53  ;;  %v1376_v46 = vsub.f32 %v1367_v26, %v1374_v53  ;;  %v2336_v39 = vpop.xlane.xlu0 %2335 }
 0x42c   :  { %v1558_v49 = vpop.xlane.xlu1 %1557  ;;  %v2337_v6 = vmul.f32 0.00390625, %v2336_v39 }
 0x42d   :  { %v1377_v20 = vmul.f32 %v1375_v62, %v1375_v62  ;;  %v1378_v51 = vmul.f32 %v1376_v46, %v1376_v46  ;;  %v1559_v63 = vmul.f32 0.00390625, %v1558_v49 }
 0x42e   :  { %v2338_v40 = vsub.f32 %v2330_v25, %v2337_v6  ;;  %v2339_v11 = vsub.f32 %v2331_v28, %v2337_v6 }
 0x42f   :  { %v4258_v5 = vsub.f32 %v1554_v22, %v1559_v63  ;;  %v4260_v3 = vsub.f32 %v1555_v29, %v1559_v63  ;;  %v1379_v7 = vsel %vm1368_vm9, %v1377_v20, 0.0  ;;  %v1380_v52 = vsel %vm1368_vm9, %v1378_v51, 0.0  ;;  %v268_v45 = vpop.xlane.xlu0 %267 }
 0x430   :  { %v1381_v12 = vadd.f32 %v1380_v52, %v1379_v7  ;;  %v2340_v38 = vmul.f32 %v2338_v40, %v2338_v40  ;;  %v2341_v34 = vmul.f32 %v2339_v11, %v2339_v11 }
 0x431   :  { %v1562_v9 = vmul.f32 %v4258_v5, %v4258_v5  ;;  %v1563_v16 = vmul.f32 %v4260_v3, %v4260_v3 }
 0x432   :  { %1382 = vadd.xlane.f32.xlu0 %v1381_v12  ;;  %v2342_v4 = vsel %vm1368_vm9, %v2340_v38, 0.0  ;;  %v2343_v35 = vsel %vm1368_vm9, %v2341_v34, 0.0 }
 0x433   :  { %v1564_v61 = vadd.f32 %v1563_v16, %v1562_v9  ;;  %v2344_v24 = vadd.f32 %v2343_v35, %v2342_v4 }
 0x435   :  { %1565 = vadd.xlane.f32.xlu1 %v1564_v61 }
 0x446   :  { %275 = vperm.xlu1 %2452, %v2478_v10  }
 0x448   :  { %1390 = vperm.xlu0 %2451, %v3987_v31  }
 0x44a   :  { %2453 = vset.pattern.permute.xlu1 %v4533_v56 }
 0x44b   :  { %1396 = vperm.xlu1 %2453, %v3987_v31   ;;  %v269_v31 = vmul.f32 0.00390625, %v268_v45 }
 0x44c   :  { %2454 = vset.pattern.permute.xlu0 %v4533_v56 }
 0x44d   :  { %v270_v32 = vadd.f32 1e-05, %v269_v31 }
 0x46f   :  { %2345 = vadd.xlane.f32.xlu1 %v2344_v24 }
 0x480   :  { %281 = vperm.xlu1 %2453, %v2478_v10  }
 0x4bf   :  { %v1383_v54 = vpop.xlane.xlu0 %1382 }
 0x4c0   :  { %v1384_v14 = vmul.f32 0.00390625, %v1383_v54 }
 0x4c2   :  { %v1385_v48 = vadd.f32 1e-05, %v1384_v14  ;;  %v1566_v1 = vpop.xlane.xlu1 %1565 }
 0x4c3   :  { %v1567_v57 = vmul.f32 0.00390625, %v1566_v1 }
 0x4c4   :  { %2465 = vrsqrt.f32 %v1385_v48 }
 0x4c5   :  { %2467 = vrsqrt.f32 %v270_v32  ;;  %v1568_v26 = vadd.f32 1e-05, %v1567_v57 }
 0x4c6   :  { %v276_v41 = vpop.permute.xlu1 %275 }
 0x4c7   :  { %v1391_v33 = vpop.permute.xlu0 %1390  ;;  %2469 = vrsqrt.f32 %v1568_v26 }
 0x4ca   :  { %v1397_v55 = vpop.permute.xlu1 %1396 }
 0x4ce   :  { %v2466_v2 = vpop.eup %2465 }
 0x4cf   :  { %v1387_v15 = vmul.f32 %v2466_v2, %v1375_v62  ;;  %v1388_v23 = vmul.f32 %v2466_v2, %v1376_v46  ;;  %v2468_v21 = vpop.eup %2467 }
 0x4d0   :  { %v272_v60 = vmul.f32 %v2468_v21, %v4244_v13  ;;  %v273_v25 = vmul.f32 %v2468_v21, %v4248_v43 }
 0x4d1   :  { %v1393_v37 = vmul.f32 %v1391_v33, %v1387_v15  ;;  %v1394_v30 = vmul.f32 %v1391_v33, %v1388_v23  ;;  %v2470_v13 = vpop.eup %2469 }
 0x4d2   :  { %v278_v42 = vmul.f32 %v276_v41, %v272_v60  ;;  %v279_v29 = vmul.f32 %v276_v41, %v273_v25  ;;  %v1570_v62 = vmul.f32 %v2470_v13, %v4258_v5  ;;  %v1571_v46 = vmul.f32 %v2470_v13, %v4260_v3 }
 0x4d3   :  { %v1399_v47 = vadd.f32 %v1397_v55, %v1393_v37  ;;  %v1400_v22 = vadd.f32 %v1397_v55, %v1394_v30 }
 0x4d4   :  { %v1572_v51 = vmul.f32 %v1570_v62, %v276_v41  ;;  %v1573_v63 = vmul.f32 %v1571_v46, %v276_v41 }
 0x4d5   :  { %v1404_v18 = vrot.slane %v1399_v47, %v2702_v36  ;;  %v1408_v19 = vrot.slane %v1400_v22, %v2702_v36 }
 0x4fc   :  { %v2346_v17 = vpop.xlane.xlu1 %2345 }
 0x4fd   :  { %v2347_v44 = vmul.f32 0.00390625, %v2346_v17 }
 0x4ff   :  { %v2348_v28 = vadd.f32 1e-05, %v2347_v44 }
 0x500   :  { %v282_v50 = vpop.permute.xlu1 %281 }
 0x501   :  { %2471 = vrsqrt.f32 %v2348_v28  ;;  %v284_v58 = vadd.f32 %v282_v50, %v278_v42  ;;  %v285_v27 = vadd.f32 %v282_v50, %v279_v29  ;;  %v1574_v12 = vadd.f32 %v1572_v51, %v282_v50 }
 0x502   :  { %v1575_v9 = vadd.f32 %v1573_v63, %v282_v50 }
 0x503   :  { %v1409_v0 = vmul.f32 %v1404_v18, %v284_v58  ;;  %v1410_v8 = vmul.f32 %v1408_v19, %v285_v27 }
 0x505   :  { %1411 = vst [vmem:[%s4303_s6] sm:$0xff] %v1409_v0  ;;  %1412 = vst [vmem:[%s4303_s6 + $0x8] sm:$0xff] %v1410_v8 }
 0x50b   :  { %v2472_v43 = vpop.eup %2471 }
 0x50c   :  { %v2350_v59 = vmul.f32 %v2472_v43, %v2338_v40  ;;  %v2351_v53 = vmul.f32 %v2472_v43, %v2339_v11 }
 0x50e   :  { %v2352_v49 = vmul.f32 %v2350_v59, %v1391_v33  ;;  %v2353_v20 = vmul.f32 %v2351_v53, %v1391_v33 }
 0x510   :  { %v2354_v7 = vadd.f32 %v2352_v49, %v1397_v55  ;;  %v2355_v52 = vadd.f32 %v2353_v20, %v1397_v55 }
 0x512   :  { %v2359_v16 = vrot.slane %v2354_v7, %v2702_v36  ;;  %v2363_v61 = vrot.slane %v2355_v52, %v2702_v36 }
 0x514   :  { %v2364_v10 = vmul.f32 %v2359_v16, %v1574_v12  ;;  %v2365_v56 = vmul.f32 %v2363_v61, %v1575_v9 }
 0x516   :  { %2394 = vst [vmem:[%s4303_s6 + $0x10] sm:$0xff] %v2364_v10  ;;  %2395 = vst [vmem:[%s4303_s6 + $0x18] sm:$0xff] %v2365_v56 }

</bundles_post_ra>
